<compile_context>
chip_gen: v7x
topology: tpu7x:2x2x1
jax: 0.10.0
libtpu: 0.0.40
codegen_flags: <defaults>
</compile_context>

<pallas_src>
import functools

import jax
import jax.numpy as jnp
from jax.experimental import pallas as pl
from jax.experimental.pallas import tpu as pltpu


# Flipped to False automatically by the __main__ smoke test if the installed
# jax does not support BlockSpec(pipeline_mode=pl.Buffered(1)).
_SINGLE_BUFFER_WEIGHTS = True


# ----------------------------------------------------------------------------
# Spec / sizing helpers
# ----------------------------------------------------------------------------
def _weight_spec(a):
    """Whole-array block, same block index every grid step (stays resident).

    When supported, single-buffer the weights (Buffered(1)): the block index
    never changes, so the second pipeline buffer is pure VMEM waste — the
    saving is the difference between fitting and spilling on v7x (64 MiB).
    """
    zeros = (0,) * a.ndim
    idx = lambda i, _z=zeros: _z
    if _SINGLE_BUFFER_WEIGHTS and hasattr(pl, "Buffered"):
        try:
            return pl.BlockSpec(a.shape, idx, pipeline_mode=pl.Buffered(1))
        except TypeError:
            pass
    return pl.BlockSpec(a.shape, idx)


def _pick_batch_tile(B, S):
    """Batch tile: target ~512 GEMM rows (bt*S) but keep >= 2 grid steps (v7x)."""
    if B <= 1 or S % 8 != 0:
        return 1
    bt = max(1, min(B, 512 // max(S, 1)))
    while bt > 1 and (B % bt != 0 or (B // bt) < 2):
        bt -= 1
    return bt


def _pick_kv_tile(S):
    """KV chunk for the in-kernel online softmax (caps the score slab)."""
    for cand in (512, 256):
        if S > cand and S % cand == 0:
            return cand
    return S


def _vmem_capacity_bytes():
    try:
        info = pltpu.get_tpu_info()
        for attr in ("vmem_capacity_bytes", "vmem_size_bytes", "vmem_bytes"):
            v = getattr(info, attr, None)
            if v:
                return int(v)
    except Exception:
        pass
    return 64 * 1024 * 1024  # conservative default (v7x per-TC VMEM)


def _pick_vmem_limit(w_bytes, act_bytes):
    """Generation-aware VMEM budget: ~85% of physical cap, sized from usage."""
    cap = _vmem_capacity_bytes()            # 128 MiB on v5e/v6e, 64 MiB on v7x
    budget = int(1.25 * (w_bytes + act_bytes)) + (8 << 20)
    return int(max(32 << 20, min(int(0.85 * cap), budget)))


# ----------------------------------------------------------------------------
# Pallas kernel: one full transformer encoder block for a tile of bt sequences.
# ----------------------------------------------------------------------------
def _encoder_layer_kernel(
    x_ref,
    wq_ref, bq_ref, wk_ref, bk_ref, wv_ref, bv_ref, wo_ref, bo_ref,
    w1_ref, b1_ref, w2_ref, b2_ref,
    g1_ref, be1_ref, g2_ref, be2_ref,
    out_ref,
    *, num_heads, head_dim, kv_tile, eps,
):
    bt, S, D = x_ref.shape
    H, Dh = num_heads, head_dim
    BH = H * bt
    rows = bt * S
    f32, bf16 = jnp.float32, jnp.bfloat16

    x2 = x_ref[...].astype(f32).reshape(rows, D)   # residual path stays f32
    xb = x2.astype(bf16)                           # MXU operand

    # --- dense QKV projections: (rows, D) @ (D, D), full-width MXU GEMMs ----
    scale = 1.0 / (Dh ** 0.5)
    q = ((jnp.dot(xb, wq_ref[...], preferred_element_type=f32)
          + bq_ref[...]) * scale).astype(bf16)     # scale folded into q
    k = (jnp.dot(xb, wk_ref[...], preferred_element_type=f32)
         + bk_ref[...]).astype(bf16)
    v = (jnp.dot(xb, wv_ref[...], preferred_element_type=f32)
         + bv_ref[...]).astype(bf16)

    # Head split: static lane slices + leading-dim concat (no 4-D transpose,
    # no weight/x replication). Result batch ordering is (head, batch)-major.
    def to_heads(t2):                              # (rows, H*Dh) -> (BH, S, Dh)
        parts = [t2[:, h * Dh:(h + 1) * Dh] for h in range(H)]
        return jnp.concatenate(parts, axis=0).reshape(BH, S, Dh)

    qh, kh, vh = to_heads(q), to_heads(k), to_heads(v)

    # --- attention: online softmax over KV tiles (bounds the score slab) ----
    nk = S // kv_tile
    m_i = jnp.full((BH, S, 1), -jnp.inf, f32)
    l_i = jnp.zeros((BH, S, 1), f32)
    acc = jnp.zeros((BH, S, Dh), f32)
    for c in range(nk):                            # static, small trip count
        kc = kh[:, c * kv_tile:(c + 1) * kv_tile, :]
        vc = vh[:, c * kv_tile:(c + 1) * kv_tile, :]
        s = jnp.einsum("bqd,bkd->bqk", qh, kc,
                       preferred_element_type=f32)          # (BH, S, kv_tile)
        m_new = jnp.maximum(m_i, jnp.max(s, axis=-1, keepdims=True))
        alpha = jnp.exp(m_i - m_new)
        p = jnp.exp(s - m_new)
        l_i = alpha * l_i + jnp.sum(p, axis=-1, keepdims=True)
        acc = alpha * acc + jnp.einsum("bqk,bkd->bqd", p.astype(bf16), vc,
                                       preferred_element_type=f32)
        m_i = m_new
    # approx reciprocal: EUP slot, ~1e-3 rel. error in the probabilities.
    o = acc * pl.reciprocal(l_i, approx=True)      # (BH, S, Dh) f32

    # --- output projection: relayout o to head-concat-on-lanes, dense GEMM ---
    o3 = o.astype(bf16).reshape(H, rows, Dh)
    oc = jnp.concatenate([o3[h] for h in range(H)], axis=-1)   # (rows, D)
    attn = jnp.dot(oc, wo_ref[...], preferred_element_type=f32) + bo_ref[...]

    # --- residual + LayerNorm 1 ---------------------------------------------
    y = x2 + attn
    mu = jnp.mean(y, axis=-1, keepdims=True)
    var = jnp.mean((y - mu) ** 2, axis=-1, keepdims=True)
    y = (y - mu) * jax.lax.rsqrt(var + eps) * g1_ref[...] + be1_ref[...]

    # --- feed-forward: dense 2-D GEMMs, M = bt*S rows -------------------------
    h1 = jnp.maximum(
        jnp.dot(y.astype(bf16), w1_ref[...], preferred_element_type=f32)
        + b1_ref[...],
        0.0,
    )
    ff = (jnp.dot(h1.astype(bf16), w2_ref[...], preferred_element_type=f32)
          + b2_ref[...])

    # --- residual + LayerNorm 2 ---------------------------------------------
    z = y + ff
    mu2 = jnp.mean(z, axis=-1, keepdims=True)
    var2 = jnp.mean((z - mu2) ** 2, axis=-1, keepdims=True)
    z = (z - mu2) * jax.lax.rsqrt(var2 + eps) * g2_ref[...] + be2_ref[...]

    out_ref[...] = z.reshape(bt, S, D).astype(out_ref.dtype)


# ----------------------------------------------------------------------------
# Parameter preparation (hoisted out of the forward path — runs once/layer).
# ----------------------------------------------------------------------------
def prepare_layer_params(p):
    bf16, f32 = jnp.bfloat16, jnp.float32
    return (
        p["wq"].astype(bf16), p["bq"].astype(f32),
        p["wk"].astype(bf16), p["bk"].astype(f32),
        p["wv"].astype(bf16), p["bv"].astype(f32),
        p["wo"].astype(bf16), p["bo"].astype(f32),
        p["w1"].astype(bf16), p["b1"].astype(f32),
        p["w2"].astype(bf16), p["b2"].astype(f32),
        p["g1"].astype(f32), p["be1"].astype(f32),
        p["g2"].astype(f32), p["be2"].astype(f32),
    )


# ----------------------------------------------------------------------------
# Wrapper: one encoder layer as a pallas_call, grid over batch tiles.
# ----------------------------------------------------------------------------
def encoder_layer(x, weights, *, num_heads, eps=1e-5):
    B, S, D = x.shape
    assert D % num_heads == 0
    Dh = D // num_heads
    bt = _pick_batch_tile(B, S)
    assert B % bt == 0
    kv_tile = _pick_kv_tile(S)

    Dff = weights[8].shape[1]          # w1 is (D, Dff)
    rows, BH = bt * S, bt * num_heads

    kern = functools.partial(
        _encoder_layer_kernel,
        num_heads=num_heads, head_dim=Dh, kv_tile=kv_tile, eps=eps,
    )

    in_specs = [pl.BlockSpec((bt, S, D), lambda i: (i, 0, 0))] + [
        _weight_spec(w) for w in weights
    ]

    # VMEM budget: weights (single-buffered) + activation intermediates.
    w_bytes = sum(int(w.size) * w.dtype.itemsize for w in weights)
    act_bytes = (
        4 * rows * D * 4               # x / out blocks, double-buffered, f32
        + 8 * rows * D * 2             # xb, q, k, v (+ head-relayout copies), bf16
        + 2 * BH * S * kv_tile * 4     # per-chunk scores + probs, f32
        + 2 * rows * D * 4             # attention accumulator + o, f32
        + 6 * rows * D * 4             # attn / y / ff / z / LN temporaries, f32
        + rows * Dff * 6               # h1 f32 + bf16 copy
    )
    vmem_limit = _pick_vmem_limit(w_bytes, act_bytes)

    return pl.pallas_call(
        kern,
        out_shape=jax.ShapeDtypeStruct((B, S, D), x.dtype),
        grid=(B // bt,),
        in_specs=in_specs,
        out_specs=pl.BlockSpec((bt, S, D), lambda i: (i, 0, 0)),
        compiler_params=pltpu.CompilerParams(
            dimension_semantics=("parallel",),   # batch tiles split across v7x TCs
            vmem_limit_bytes=vmem_limit,
        ),
    )(x, *weights)


def encoder_forward(x, prepared_layers, *, num_heads):
    # Encoder.forward: for layer in layers: x = layer(x)
    for w in prepared_layers:
        x = encoder_layer(x, w, num_heads=num_heads)
    return x


# ----------------------------------------------------------------------------
# Deterministic parameter init + pure-JAX reference for sanity checking.
# ----------------------------------------------------------------------------
def init_layer_params(key, D, Dff):
    ks = jax.random.split(key, 6)
    sc = 0.05
    f32 = jnp.float32
    return {
        "wq": jax.random.normal(ks[0], (D, D), f32) * sc, "bq": jnp.zeros((1, D), f32),
        "wk": jax.random.normal(ks[1], (D, D), f32) * sc, "bk": jnp.zeros((1, D), f32),
        "wv": jax.random.normal(ks[2], (D, D), f32) * sc, "bv": jnp.zeros((1, D), f32),
        "wo": jax.random.normal(ks[3], (D, D), f32) * sc, "bo": jnp.zeros((1, D), f32),
        "w1": jax.random.normal(ks[4], (D, Dff), f32) * sc, "b1": jnp.zeros((1, Dff), f32),
        "w2": jax.random.normal(ks[5], (Dff, D), f32) * sc, "b2": jnp.zeros((1, D), f32),
        "g1": jnp.ones((1, D), f32), "be1": jnp.zeros((1, D), f32),
        "g2": jnp.ones((1, D), f32), "be2": jnp.zeros((1, D), f32),
    }


def _ln(x, g, b, eps=1e-5):
    mu = jnp.mean(x, axis=-1, keepdims=True)
    var = jnp.mean((x - mu) ** 2, axis=-1, keepdims=True)
    return (x - mu) * jax.lax.rsqrt(var + eps) * g + b


def reference_forward(x, layer_params, *, num_heads):
    B, S, D = x.shape
    Dh = D // num_heads
    for p in layer_params:
        q = x @ p["wq"] + p["bq"]
        k = x @ p["wk"] + p["bk"]
        v = x @ p["wv"] + p["bv"]
        qh = q.reshape(B, S, num_heads, Dh).transpose(0, 2, 1, 3)
        kh = k.reshape(B, S, num_heads, Dh).transpose(0, 2, 1, 3)
        vh = v.reshape(B, S, num_heads, Dh).transpose(0, 2, 1, 3)
        s = jnp.einsum("bhqd,bhkd->bhqk", qh, kh) / (Dh ** 0.5)
        pa = jax.nn.softmax(s, axis=-1)
        o = jnp.einsum("bhqk,bhkd->bhqd", pa, vh).transpose(0, 2, 1, 3).reshape(B, S, D)
        attn = o @ p["wo"] + p["bo"]
        y = _ln(x + attn, p["g1"], p["be1"])
        ff = jnp.maximum(y @ p["w1"] + p["b1"], 0.0) @ p["w2"] + p["b2"]
        x = _ln(y + ff, p["g2"], p["be2"])
    return x


# ----------------------------------------------------------------------------
if __name__ == "__main__":
    B, S, D, H, Dff, NUM_LAYERS = 2, 8, 32, 4, 64, 2

    key = jax.random.PRNGKey(0)
    kx, *klayers = jax.random.split(key, NUM_LAYERS + 1)
    x = jax.random.normal(kx, (B, S, D), jnp.float32)
    raw_params = [init_layer_params(k, D, Dff) for k in klayers]
    # Hoisted out of the forward path: bf16 casts run once, not per call.
    prepared = [prepare_layer_params(p) for p in raw_params]

    fwd = jax.jit(functools.partial(encoder_forward, num_heads=H))
    try:
        out = jax.block_until_ready(fwd(x, prepared))
    except Exception:
        # Fallback for jax versions without BlockSpec pipeline_mode / Buffered(1):
        # retry with default (double-buffered) weight specs.
        _SINGLE_BUFFER_WEIGHTS = False
        fwd = jax.jit(functools.partial(encoder_forward, num_heads=H))
        out = jax.block_until_ready(fwd(x, prepared))

    assert out.shape == (B, S, D)
    assert bool(jnp.all(jnp.isfinite(out)))

    # Compare against the f32 reference; the kernel uses bf16 MXU operands with
    # f32 accumulation and an approx softmax reciprocal, so allow a modest tol.
    ref = reference_forward(x, raw_params, num_heads=H)
    max_diff = float(jnp.max(jnp.abs(out - ref)))
    assert max_diff < 5e-2, f"mismatch vs reference: {max_diff}"

    print("KERNEL_OK")
</pallas_src>

<mosaic_0001>
module attributes {stable_mosaic.version = 11 : i64} {
  func.func @_encoder_layer_kernel(%arg0: i32, %arg1: memref<1x8x32xf32, #tpu.memory_space<vmem>>, %arg2: memref<32x32xbf16, #tpu.memory_space<vmem>>, %arg3: memref<1x32xf32, #tpu.memory_space<vmem>>, %arg4: memref<32x32xbf16, #tpu.memory_space<vmem>>, %arg5: memref<1x32xf32, #tpu.memory_space<vmem>>, %arg6: memref<32x32xbf16, #tpu.memory_space<vmem>>, %arg7: memref<1x32xf32, #tpu.memory_space<vmem>>, %arg8: memref<32x32xbf16, #tpu.memory_space<vmem>>, %arg9: memref<1x32xf32, #tpu.memory_space<vmem>>, %arg10: memref<32x64xbf16, #tpu.memory_space<vmem>>, %arg11: memref<1x64xf32, #tpu.memory_space<vmem>>, %arg12: memref<64x32xbf16, #tpu.memory_space<vmem>>, %arg13: memref<1x32xf32, #tpu.memory_space<vmem>>, %arg14: memref<1x32xf32, #tpu.memory_space<vmem>>, %arg15: memref<1x32xf32, #tpu.memory_space<vmem>>, %arg16: memref<1x32xf32, #tpu.memory_space<vmem>>, %arg17: memref<1x32xf32, #tpu.memory_space<vmem>>, %arg18: memref<1x8x32xf32, #tpu.memory_space<vmem>>) attributes {dimension_semantics = [#tpu.dimension_semantics<parallel>], iteration_bounds = array<i64: 2>, scalar_prefetch = 0 : i64, scratch_operands = 0 : i64, tpu.core_type = #tpu.core_type<tc>, window_params = [{transform_indices = @transform_0, window_bounds = array<i64: 1, 8, 32>}, {pipeline_mode = #tpu.pipeline_mode<synchronous>, transform_indices = @transform_1, window_bounds = array<i64: 32, 32>}, {pipeline_mode = #tpu.pipeline_mode<synchronous>, transform_indices = @transform_2, window_bounds = array<i64: 1, 32>}, {pipeline_mode = #tpu.pipeline_mode<synchronous>, transform_indices = @transform_3, window_bounds = array<i64: 32, 32>}, {pipeline_mode = #tpu.pipeline_mode<synchronous>, transform_indices = @transform_4, window_bounds = array<i64: 1, 32>}, {pipeline_mode = #tpu.pipeline_mode<synchronous>, transform_indices = @transform_5, window_bounds = array<i64: 32, 32>}, {pipeline_mode = #tpu.pipeline_mode<synchronous>, transform_indices = @transform_6, window_bounds = array<i64: 1, 32>}, {pipeline_mode = #tpu.pipeline_mode<synchronous>, transform_indices = @transform_7, window_bounds = array<i64: 32, 32>}, {pipeline_mode = #tpu.pipeline_mode<synchronous>, transform_indices = @transform_8, window_bounds = array<i64: 1, 32>}, {pipeline_mode = #tpu.pipeline_mode<synchronous>, transform_indices = @transform_9, window_bounds = array<i64: 32, 64>}, {pipeline_mode = #tpu.pipeline_mode<synchronous>, transform_indices = @transform_10, window_bounds = array<i64: 1, 64>}, {pipeline_mode = #tpu.pipeline_mode<synchronous>, transform_indices = @transform_11, window_bounds = array<i64: 64, 32>}, {pipeline_mode = #tpu.pipeline_mode<synchronous>, transform_indices = @transform_12, window_bounds = array<i64: 1, 32>}, {pipeline_mode = #tpu.pipeline_mode<synchronous>, transform_indices = @transform_13, window_bounds = array<i64: 1, 32>}, {pipeline_mode = #tpu.pipeline_mode<synchronous>, transform_indices = @transform_14, window_bounds = array<i64: 1, 32>}, {pipeline_mode = #tpu.pipeline_mode<synchronous>, transform_indices = @transform_15, window_bounds = array<i64: 1, 32>}, {pipeline_mode = #tpu.pipeline_mode<synchronous>, transform_indices = @transform_16, window_bounds = array<i64: 1, 32>}, {transform_indices = @transform_17, window_bounds = array<i64: 1, 8, 32>}]} {
    %c0 = arith.constant 0 : index
    %c0_0 = arith.constant 0 : index
    %c0_1 = arith.constant 0 : index
    %0 = vector.load %arg1[%c0, %c0_0, %c0_1] : memref<1x8x32xf32, #tpu.memory_space<vmem>>, vector<1x8x32xf32>
    %1 = vector.shape_cast %0 : vector<1x8x32xf32> to vector<8x32xf32>
    %2 = arith.truncf %1 : vector<8x32xf32> to vector<8x32xbf16>
    %c0_2 = arith.constant 0 : index
    %c0_3 = arith.constant 0 : index
    %3 = vector.load %arg2[%c0_2, %c0_3] : memref<32x32xbf16, #tpu.memory_space<vmem>>, vector<32x32xbf16>
    %cst = arith.constant dense<0.000000e+00> : vector<8x32xf32>
    %4 = tpu.matmul %2, %3, %cst {dimension_numbers = #tpu.dot_dimension_numbers<[1], [0], [0], [1], [0, 0, 1, 1], [], []>} : vector<8x32xbf16>, vector<32x32xbf16>, vector<8x32xf32> -> vector<8x32xf32>
    %c0_4 = arith.constant 0 : index
    %c0_5 = arith.constant 0 : index
    %5 = vector.load %arg3[%c0_4, %c0_5] : memref<1x32xf32, #tpu.memory_space<vmem>>, vector<1x32xf32>
    %6 = vector.broadcast %5 : vector<1x32xf32> to vector<8x32xf32>
    %7 = arith.addf %4, %6 : vector<8x32xf32>
    %cst_6 = arith.constant 0.353553385 : f32
    %8 = vector.broadcast %cst_6 : f32 to vector<8x32xf32>
    %9 = arith.mulf %7, %8 : vector<8x32xf32>
    %10 = arith.truncf %9 : vector<8x32xf32> to vector<8x32xbf16>
    %c0_7 = arith.constant 0 : index
    %c0_8 = arith.constant 0 : index
    %11 = vector.load %arg4[%c0_7, %c0_8] : memref<32x32xbf16, #tpu.memory_space<vmem>>, vector<32x32xbf16>
    %cst_9 = arith.constant dense<0.000000e+00> : vector<8x32xf32>
    %12 = tpu.matmul %2, %11, %cst_9 {dimension_numbers = #tpu.dot_dimension_numbers<[1], [0], [0], [1], [0, 0, 1, 1], [], []>} : vector<8x32xbf16>, vector<32x32xbf16>, vector<8x32xf32> -> vector<8x32xf32>
    %c0_10 = arith.constant 0 : index
    %c0_11 = arith.constant 0 : index
    %13 = vector.load %arg5[%c0_10, %c0_11] : memref<1x32xf32, #tpu.memory_space<vmem>>, vector<1x32xf32>
    %14 = vector.broadcast %13 : vector<1x32xf32> to vector<8x32xf32>
    %15 = arith.addf %12, %14 : vector<8x32xf32>
    %16 = arith.truncf %15 : vector<8x32xf32> to vector<8x32xbf16>
    %c0_12 = arith.constant 0 : index
    %c0_13 = arith.constant 0 : index
    %17 = vector.load %arg6[%c0_12, %c0_13] : memref<32x32xbf16, #tpu.memory_space<vmem>>, vector<32x32xbf16>
    %cst_14 = arith.constant dense<0.000000e+00> : vector<8x32xf32>
    %18 = tpu.matmul %2, %17, %cst_14 {dimension_numbers = #tpu.dot_dimension_numbers<[1], [0], [0], [1], [0, 0, 1, 1], [], []>} : vector<8x32xbf16>, vector<32x32xbf16>, vector<8x32xf32> -> vector<8x32xf32>
    %c0_15 = arith.constant 0 : index
    %c0_16 = arith.constant 0 : index
    %19 = vector.load %arg7[%c0_15, %c0_16] : memref<1x32xf32, #tpu.memory_space<vmem>>, vector<1x32xf32>
    %20 = vector.broadcast %19 : vector<1x32xf32> to vector<8x32xf32>
    %21 = arith.addf %18, %20 : vector<8x32xf32>
    %22 = arith.truncf %21 : vector<8x32xf32> to vector<8x32xbf16>
    %23 = vector.extract_strided_slice %10 {offsets = [0, 0], sizes = [8, 8], strides = [1, 1]} : vector<8x32xbf16> to vector<8x8xbf16>
    %24 = vector.extract_strided_slice %10 {offsets = [0, 8], sizes = [8, 8], strides = [1, 1]} : vector<8x32xbf16> to vector<8x8xbf16>
    %25 = vector.extract_strided_slice %10 {offsets = [0, 16], sizes = [8, 8], strides = [1, 1]} : vector<8x32xbf16> to vector<8x8xbf16>
    %26 = vector.extract_strided_slice %10 {offsets = [0, 24], sizes = [8, 8], strides = [1, 1]} : vector<8x32xbf16> to vector<8x8xbf16>
    %27 = tpu.concatenate %23, %24, %25, %26 in 0 : vector<8x8xbf16>, vector<8x8xbf16>, vector<8x8xbf16>, vector<8x8xbf16> -> vector<32x8xbf16>
    %28 = vector.shape_cast %27 : vector<32x8xbf16> to vector<4x8x8xbf16>
    %29 = vector.extract_strided_slice %16 {offsets = [0, 0], sizes = [8, 8], strides = [1, 1]} : vector<8x32xbf16> to vector<8x8xbf16>
    %30 = vector.extract_strided_slice %16 {offsets = [0, 8], sizes = [8, 8], strides = [1, 1]} : vector<8x32xbf16> to vector<8x8xbf16>
    %31 = vector.extract_strided_slice %16 {offsets = [0, 16], sizes = [8, 8], strides = [1, 1]} : vector<8x32xbf16> to vector<8x8xbf16>
    %32 = vector.extract_strided_slice %16 {offsets = [0, 24], sizes = [8, 8], strides = [1, 1]} : vector<8x32xbf16> to vector<8x8xbf16>
    %33 = tpu.concatenate %29, %30, %31, %32 in 0 : vector<8x8xbf16>, vector<8x8xbf16>, vector<8x8xbf16>, vector<8x8xbf16> -> vector<32x8xbf16>
    %34 = vector.shape_cast %33 : vector<32x8xbf16> to vector<4x8x8xbf16>
    %35 = vector.extract_strided_slice %22 {offsets = [0, 0], sizes = [8, 8], strides = [1, 1]} : vector<8x32xbf16> to vector<8x8xbf16>
    %36 = vector.extract_strided_slice %22 {offsets = [0, 8], sizes = [8, 8], strides = [1, 1]} : vector<8x32xbf16> to vector<8x8xbf16>
    %37 = vector.extract_strided_slice %22 {offsets = [0, 16], sizes = [8, 8], strides = [1, 1]} : vector<8x32xbf16> to vector<8x8xbf16>
    %38 = vector.extract_strided_slice %22 {offsets = [0, 24], sizes = [8, 8], strides = [1, 1]} : vector<8x32xbf16> to vector<8x8xbf16>
    %39 = tpu.concatenate %35, %36, %37, %38 in 0 : vector<8x8xbf16>, vector<8x8xbf16>, vector<8x8xbf16>, vector<8x8xbf16> -> vector<32x8xbf16>
    %40 = vector.shape_cast %39 : vector<32x8xbf16> to vector<4x8x8xbf16>
    %cst_17 = arith.constant 0xFF800000 : f32
    %41 = vector.broadcast %cst_17 : f32 to vector<4x8x1xf32>
    %cst_18 = arith.constant 0.000000e+00 : f32
    %42 = vector.broadcast %cst_18 : f32 to vector<4x8x1xf32>
    %cst_19 = arith.constant 0.000000e+00 : f32
    %43 = vector.broadcast %cst_19 : f32 to vector<4x8x8xf32>
    "tpu.trace_start"() <{level = 10 : i32, message = "bqd,bkd->bqk"}> : () -> ()
    %cst_20 = arith.constant dense<0.000000e+00> : vector<4x8x8xf32>
    %44 = tpu.matmul %28, %34, %cst_20 {dimension_numbers = #tpu.dot_dimension_numbers<[2], [2], [1], [1], [0, 0, 0, 1, 1, 1], [0], [0]>} : vector<4x8x8xbf16>, vector<4x8x8xbf16>, vector<4x8x8xf32> -> vector<4x8x8xf32>
    "tpu.trace_stop"() : () -> ()
    %cst_21 = arith.constant dense<0xFF800000> : vector<4x8xf32>
    %45 = vector.multi_reduction <maximumf>, %44, %cst_21 [2] : vector<4x8x8xf32> to vector<4x8xf32>
    %46 = vector.shape_cast %45 : vector<4x8xf32> to vector<4x8x1xf32>
    %47 = arith.maximumf %41, %46 : vector<4x8x1xf32>
    %48 = arith.subf %41, %47 : vector<4x8x1xf32>
    %49 = math.exp %48 : vector<4x8x1xf32>
    %50 = vector.broadcast %47 : vector<4x8x1xf32> to vector<4x8x8xf32>
    %51 = arith.subf %44, %50 : vector<4x8x8xf32>
    %52 = math.exp %51 : vector<4x8x8xf32>
    %53 = arith.mulf %49, %42 : vector<4x8x1xf32>
    %cst_22 = arith.constant dense<0.000000e+00> : vector<4x8xf32>
    %54 = vector.multi_reduction <add>, %52, %cst_22 [2] : vector<4x8x8xf32> to vector<4x8xf32>
    %55 = vector.shape_cast %54 : vector<4x8xf32> to vector<4x8x1xf32>
    %56 = arith.addf %53, %55 : vector<4x8x1xf32>
    %57 = vector.broadcast %49 : vector<4x8x1xf32> to vector<4x8x8xf32>
    %58 = arith.mulf %57, %43 : vector<4x8x8xf32>
    %59 = arith.truncf %52 : vector<4x8x8xf32> to vector<4x8x8xbf16>
    "tpu.trace_start"() <{level = 10 : i32, message = "bqk,bkd->bqd"}> : () -> ()
    %cst_23 = arith.constant dense<0.000000e+00> : vector<4x8x8xf32>
    %60 = tpu.matmul %59, %40, %cst_23 {dimension_numbers = #tpu.dot_dimension_numbers<[2], [1], [1], [2], [0, 0, 0, 1, 1, 2], [0], [0]>} : vector<4x8x8xbf16>, vector<4x8x8xbf16>, vector<4x8x8xf32> -> vector<4x8x8xf32>
    "tpu.trace_stop"() : () -> ()
    %61 = arith.addf %58, %60 : vector<4x8x8xf32>
    %62 = tpu.reciprocal %56 {approx = true} : vector<4x8x1xf32> -> vector<4x8x1xf32>
    %63 = vector.broadcast %62 : vector<4x8x1xf32> to vector<4x8x8xf32>
    %64 = arith.mulf %61, %63 : vector<4x8x8xf32>
    %65 = arith.truncf %64 : vector<4x8x8xf32> to vector<4x8x8xbf16>
    %66 = vector.extract_strided_slice %65 {offsets = [0, 0, 0], sizes = [1, 8, 8], strides = [1, 1, 1]} : vector<4x8x8xbf16> to vector<1x8x8xbf16>
    %67 = vector.shape_cast %66 : vector<1x8x8xbf16> to vector<8x8xbf16>
    %68 = vector.extract_strided_slice %65 {offsets = [1, 0, 0], sizes = [1, 8, 8], strides = [1, 1, 1]} : vector<4x8x8xbf16> to vector<1x8x8xbf16>
    %69 = vector.shape_cast %68 : vector<1x8x8xbf16> to vector<8x8xbf16>
    %70 = vector.extract_strided_slice %65 {offsets = [2, 0, 0], sizes = [1, 8, 8], strides = [1, 1, 1]} : vector<4x8x8xbf16> to vector<1x8x8xbf16>
    %71 = vector.shape_cast %70 : vector<1x8x8xbf16> to vector<8x8xbf16>
    %72 = vector.extract_strided_slice %65 {offsets = [3, 0, 0], sizes = [1, 8, 8], strides = [1, 1, 1]} : vector<4x8x8xbf16> to vector<1x8x8xbf16>
    %73 = vector.shape_cast %72 : vector<1x8x8xbf16> to vector<8x8xbf16>
    %74 = tpu.concatenate %67, %69, %71, %73 in 1 : vector<8x8xbf16>, vector<8x8xbf16>, vector<8x8xbf16>, vector<8x8xbf16> -> vector<8x32xbf16>
    %c0_24 = arith.constant 0 : index
    %c0_25 = arith.constant 0 : index
    %75 = vector.load %arg8[%c0_24, %c0_25] : memref<32x32xbf16, #tpu.memory_space<vmem>>, vector<32x32xbf16>
    %cst_26 = arith.constant dense<0.000000e+00> : vector<8x32xf32>
    %76 = tpu.matmul %74, %75, %cst_26 {dimension_numbers = #tpu.dot_dimension_numbers<[1], [0], [0], [1], [0, 0, 1, 1], [], []>} : vector<8x32xbf16>, vector<32x32xbf16>, vector<8x32xf32> -> vector<8x32xf32>
    %c0_27 = arith.constant 0 : index
    %c0_28 = arith.constant 0 : index
    %77 = vector.load %arg9[%c0_27, %c0_28] : memref<1x32xf32, #tpu.memory_space<vmem>>, vector<1x32xf32>
    %78 = vector.broadcast %77 : vector<1x32xf32> to vector<8x32xf32>
    %79 = arith.addf %76, %78 : vector<8x32xf32>
    %80 = arith.addf %1, %79 : vector<8x32xf32>
    %cst_29 = arith.constant dense<0.000000e+00> : vector<8xf32>
    %81 = vector.multi_reduction <add>, %80, %cst_29 [1] : vector<8x32xf32> to vector<8xf32>
    %82 = vector.shape_cast %81 : vector<8xf32> to vector<8x1xf32>
    %cst_30 = arith.constant 3.200000e+01 : f32
    %83 = vector.broadcast %cst_30 : f32 to vector<8x1xf32>
    %84 = arith.divf %82, %83 : vector<8x1xf32>
    %85 = vector.broadcast %84 : vector<8x1xf32> to vector<8x32xf32>
    %86 = arith.subf %80, %85 : vector<8x32xf32>
    %87 = arith.mulf %86, %86 : vector<8x32xf32>
    %cst_31 = arith.constant dense<0.000000e+00> : vector<8xf32>
    %88 = vector.multi_reduction <add>, %87, %cst_31 [1] : vector<8x32xf32> to vector<8xf32>
    %89 = vector.shape_cast %88 : vector<8xf32> to vector<8x1xf32>
    %cst_32 = arith.constant 3.200000e+01 : f32
    %90 = vector.broadcast %cst_32 : f32 to vector<8x1xf32>
    %91 = arith.divf %89, %90 : vector<8x1xf32>
    %92 = vector.broadcast %84 : vector<8x1xf32> to vector<8x32xf32>
    %93 = arith.subf %80, %92 : vector<8x32xf32>
    %cst_33 = arith.constant 9.99999974E-6 : f32
    %94 = vector.broadcast %cst_33 : f32 to vector<8x1xf32>
    %95 = arith.addf %91, %94 : vector<8x1xf32>
    %96 = math.rsqrt %95 : vector<8x1xf32>
    %97 = vector.broadcast %96 : vector<8x1xf32> to vector<8x32xf32>
    %98 = arith.mulf %93, %97 : vector<8x32xf32>
    %c0_34 = arith.constant 0 : index
    %c0_35 = arith.constant 0 : index
    %99 = vector.load %arg14[%c0_34, %c0_35] : memref<1x32xf32, #tpu.memory_space<vmem>>, vector<1x32xf32>
    %100 = vector.broadcast %99 : vector<1x32xf32> to vector<8x32xf32>
    %101 = arith.mulf %98, %100 : vector<8x32xf32>
    %c0_36 = arith.constant 0 : index
    %c0_37 = arith.constant 0 : index
    %102 = vector.load %arg15[%c0_36, %c0_37] : memref<1x32xf32, #tpu.memory_space<vmem>>, vector<1x32xf32>
    %103 = vector.broadcast %102 : vector<1x32xf32> to vector<8x32xf32>
    %104 = arith.addf %101, %103 : vector<8x32xf32>
    %105 = arith.truncf %104 : vector<8x32xf32> to vector<8x32xbf16>
    %c0_38 = arith.constant 0 : index
    %c0_39 = arith.constant 0 : index
    %106 = vector.load %arg10[%c0_38, %c0_39] : memref<32x64xbf16, #tpu.memory_space<vmem>>, vector<32x64xbf16>
    %cst_40 = arith.constant dense<0.000000e+00> : vector<8x64xf32>
    %107 = tpu.matmul %105, %106, %cst_40 {dimension_numbers = #tpu.dot_dimension_numbers<[1], [0], [0], [1], [0, 0, 1, 1], [], []>} : vector<8x32xbf16>, vector<32x64xbf16>, vector<8x64xf32> -> vector<8x64xf32>
    %c0_41 = arith.constant 0 : index
    %c0_42 = arith.constant 0 : index
    %108 = vector.load %arg11[%c0_41, %c0_42] : memref<1x64xf32, #tpu.memory_space<vmem>>, vector<1x64xf32>
    %109 = vector.broadcast %108 : vector<1x64xf32> to vector<8x64xf32>
    %110 = arith.addf %107, %109 : vector<8x64xf32>
    %cst_43 = arith.constant 0.000000e+00 : f32
    %111 = vector.broadcast %cst_43 : f32 to vector<8x64xf32>
    %112 = arith.maximumf %110, %111 : vector<8x64xf32>
    %113 = arith.truncf %112 : vector<8x64xf32> to vector<8x64xbf16>
    %c0_44 = arith.constant 0 : index
    %c0_45 = arith.constant 0 : index
    %114 = vector.load %arg12[%c0_44, %c0_45] : memref<64x32xbf16, #tpu.memory_space<vmem>>, vector<64x32xbf16>
    %cst_46 = arith.constant dense<0.000000e+00> : vector<8x32xf32>
    %115 = tpu.matmul %113, %114, %cst_46 {dimension_numbers = #tpu.dot_dimension_numbers<[1], [0], [0], [1], [0, 0, 1, 1], [], []>} : vector<8x64xbf16>, vector<64x32xbf16>, vector<8x32xf32> -> vector<8x32xf32>
    %c0_47 = arith.constant 0 : index
    %c0_48 = arith.constant 0 : index
    %116 = vector.load %arg13[%c0_47, %c0_48] : memref<1x32xf32, #tpu.memory_space<vmem>>, vector<1x32xf32>
    %117 = vector.broadcast %116 : vector<1x32xf32> to vector<8x32xf32>
    %118 = arith.addf %115, %117 : vector<8x32xf32>
    %119 = arith.addf %104, %118 : vector<8x32xf32>
    %cst_49 = arith.constant dense<0.000000e+00> : vector<8xf32>
    %120 = vector.multi_reduction <add>, %119, %cst_49 [1] : vector<8x32xf32> to vector<8xf32>
    %121 = vector.shape_cast %120 : vector<8xf32> to vector<8x1xf32>
    %cst_50 = arith.constant 3.200000e+01 : f32
    %122 = vector.broadcast %cst_50 : f32 to vector<8x1xf32>
    %123 = arith.divf %121, %122 : vector<8x1xf32>
    %124 = vector.broadcast %123 : vector<8x1xf32> to vector<8x32xf32>
    %125 = arith.subf %119, %124 : vector<8x32xf32>
    %126 = arith.mulf %125, %125 : vector<8x32xf32>
    %cst_51 = arith.constant dense<0.000000e+00> : vector<8xf32>
    %127 = vector.multi_reduction <add>, %126, %cst_51 [1] : vector<8x32xf32> to vector<8xf32>
    %128 = vector.shape_cast %127 : vector<8xf32> to vector<8x1xf32>
    %cst_52 = arith.constant 3.200000e+01 : f32
    %129 = vector.broadcast %cst_52 : f32 to vector<8x1xf32>
    %130 = arith.divf %128, %129 : vector<8x1xf32>
    %131 = vector.broadcast %123 : vector<8x1xf32> to vector<8x32xf32>
    %132 = arith.subf %119, %131 : vector<8x32xf32>
    %cst_53 = arith.constant 9.99999974E-6 : f32
    %133 = vector.broadcast %cst_53 : f32 to vector<8x1xf32>
    %134 = arith.addf %130, %133 : vector<8x1xf32>
    %135 = math.rsqrt %134 : vector<8x1xf32>
    %136 = vector.broadcast %135 : vector<8x1xf32> to vector<8x32xf32>
    %137 = arith.mulf %132, %136 : vector<8x32xf32>
    %c0_54 = arith.constant 0 : index
    %c0_55 = arith.constant 0 : index
    %138 = vector.load %arg16[%c0_54, %c0_55] : memref<1x32xf32, #tpu.memory_space<vmem>>, vector<1x32xf32>
    %139 = vector.broadcast %138 : vector<1x32xf32> to vector<8x32xf32>
    %140 = arith.mulf %137, %139 : vector<8x32xf32>
    %c0_56 = arith.constant 0 : index
    %c0_57 = arith.constant 0 : index
    %141 = vector.load %arg17[%c0_56, %c0_57] : memref<1x32xf32, #tpu.memory_space<vmem>>, vector<1x32xf32>
    %142 = vector.broadcast %141 : vector<1x32xf32> to vector<8x32xf32>
    %143 = arith.addf %140, %142 : vector<8x32xf32>
    %144 = vector.shape_cast %143 : vector<8x32xf32> to vector<1x8x32xf32>
    %c0_58 = arith.constant 0 : index
    %c0_59 = arith.constant 0 : index
    %c0_60 = arith.constant 0 : index
    %145 = vector.load %arg18[%c0_58, %c0_59, %c0_60] : memref<1x8x32xf32, #tpu.memory_space<vmem>>, vector<1x8x32xf32>
    tpu.vector_store %arg18[%c0_58, %c0_59, %c0_60], %144 {strides = array<i32>} : memref<1x8x32xf32, #tpu.memory_space<vmem>>, vector<1x8x32xf32>,
    return
  }
  func.func @transform_0(%arg0: i32) -> (i32, i32, i32) {
    %c0_i32 = arith.constant 0 : i32
    %c0_i32_0 = arith.constant 0 : i32
    %c0_i32_1 = arith.constant 0 : i32
    return %arg0, %c0_i32, %c0_i32_0 : i32, i32, i32
  }
  func.func @transform_1(%arg0: i32) -> (i32, i32) {
    %c0_i32 = arith.constant 0 : i32
    %c0_i32_0 = arith.constant 0 : i32
    %c0_i32_1 = arith.constant 0 : i32
    return %c0_i32, %c0_i32_0 : i32, i32
  }
  func.func @transform_2(%arg0: i32) -> (i32, i32) {
    %c0_i32 = arith.constant 0 : i32
    %c0_i32_0 = arith.constant 0 : i32
    %c0_i32_1 = arith.constant 0 : i32
    return %c0_i32, %c0_i32_0 : i32, i32
  }
  func.func @transform_3(%arg0: i32) -> (i32, i32) {
    %c0_i32 = arith.constant 0 : i32
    %c0_i32_0 = arith.constant 0 : i32
    %c0_i32_1 = arith.constant 0 : i32
    return %c0_i32, %c0_i32_0 : i32, i32
  }
  func.func @transform_4(%arg0: i32) -> (i32, i32) {
    %c0_i32 = arith.constant 0 : i32
    %c0_i32_0 = arith.constant 0 : i32
    %c0_i32_1 = arith.constant 0 : i32
    return %c0_i32, %c0_i32_0 : i32, i32
  }
  func.func @transform_5(%arg0: i32) -> (i32, i32) {
    %c0_i32 = arith.constant 0 : i32
    %c0_i32_0 = arith.constant 0 : i32
    %c0_i32_1 = arith.constant 0 : i32
    return %c0_i32, %c0_i32_0 : i32, i32
  }
  func.func @transform_6(%arg0: i32) -> (i32, i32) {
    %c0_i32 = arith.constant 0 : i32
    %c0_i32_0 = arith.constant 0 : i32
    %c0_i32_1 = arith.constant 0 : i32
    return %c0_i32, %c0_i32_0 : i32, i32
  }
  func.func @transform_7(%arg0: i32) -> (i32, i32) {
    %c0_i32 = arith.constant 0 : i32
    %c0_i32_0 = arith.constant 0 : i32
    %c0_i32_1 = arith.constant 0 : i32
    return %c0_i32, %c0_i32_0 : i32, i32
  }
  func.func @transform_8(%arg0: i32) -> (i32, i32) {
    %c0_i32 = arith.constant 0 : i32
    %c0_i32_0 = arith.constant 0 : i32
    %c0_i32_1 = arith.constant 0 : i32
    return %c0_i32, %c0_i32_0 : i32, i32
  }
  func.func @transform_9(%arg0: i32) -> (i32, i32) {
    %c0_i32 = arith.constant 0 : i32
    %c0_i32_0 = arith.constant 0 : i32
    %c0_i32_1 = arith.constant 0 : i32
    return %c0_i32, %c0_i32_0 : i32, i32
  }
  func.func @transform_10(%arg0: i32) -> (i32, i32) {
    %c0_i32 = arith.constant 0 : i32
    %c0_i32_0 = arith.constant 0 : i32
    %c0_i32_1 = arith.constant 0 : i32
    return %c0_i32, %c0_i32_0 : i32, i32
  }
  func.func @transform_11(%arg0: i32) -> (i32, i32) {
    %c0_i32 = arith.constant 0 : i32
    %c0_i32_0 = arith.constant 0 : i32
    %c0_i32_1 = arith.constant 0 : i32
    return %c0_i32, %c0_i32_0 : i32, i32
  }
  func.func @transform_12(%arg0: i32) -> (i32, i32) {
    %c0_i32 = arith.constant 0 : i32
    %c0_i32_0 = arith.constant 0 : i32
    %c0_i32_1 = arith.constant 0 : i32
    return %c0_i32, %c0_i32_0 : i32, i32
  }
  func.func @transform_13(%arg0: i32) -> (i32, i32) {
    %c0_i32 = arith.constant 0 : i32
    %c0_i32_0 = arith.constant 0 : i32
    %c0_i32_1 = arith.constant 0 : i32
    return %c0_i32, %c0_i32_0 : i32, i32
  }
  func.func @transform_14(%arg0: i32) -> (i32, i32) {
    %c0_i32 = arith.constant 0 : i32
    %c0_i32_0 = arith.constant 0 : i32
    %c0_i32_1 = arith.constant 0 : i32
    return %c0_i32, %c0_i32_0 : i32, i32
  }
  func.func @transform_15(%arg0: i32) -> (i32, i32) {
    %c0_i32 = arith.constant 0 : i32
    %c0_i32_0 = arith.constant 0 : i32
    %c0_i32_1 = arith.constant 0 : i32
    return %c0_i32, %c0_i32_0 : i32, i32
  }
  func.func @transform_16(%arg0: i32) -> (i32, i32) {
    %c0_i32 = arith.constant 0 : i32
    %c0_i32_0 = arith.constant 0 : i32
    %c0_i32_1 = arith.constant 0 : i32
    return %c0_i32, %c0_i32_0 : i32, i32
  }
  func.func @transform_17(%arg0: i32) -> (i32, i32, i32) {
    %c0_i32 = arith.constant 0 : i32
    %c0_i32_0 = arith.constant 0 : i32
    %c0_i32_1 = arith.constant 0 : i32
    return %arg0, %c0_i32, %c0_i32_0 : i32, i32, i32
  }
}

module attributes {stable_mosaic.version = 11 : i64} {
  func.func @_encoder_layer_kernel(%arg0: i32, %arg1: memref<1x8x32xf32, #tpu.memory_space<vmem>>, %arg2: memref<32x32xbf16, #tpu.memory_space<vmem>>, %arg3: memref<1x32xf32, #tpu.memory_space<vmem>>, %arg4: memref<32x32xbf16, #tpu.memory_space<vmem>>, %arg5: memref<1x32xf32, #tpu.memory_space<vmem>>, %arg6: memref<32x32xbf16, #tpu.memory_space<vmem>>, %arg7: memref<1x32xf32, #tpu.memory_space<vmem>>, %arg8: memref<32x32xbf16, #tpu.memory_space<vmem>>, %arg9: memref<1x32xf32, #tpu.memory_space<vmem>>, %arg10: memref<32x64xbf16, #tpu.memory_space<vmem>>, %arg11: memref<1x64xf32, #tpu.memory_space<vmem>>, %arg12: memref<64x32xbf16, #tpu.memory_space<vmem>>, %arg13: memref<1x32xf32, #tpu.memory_space<vmem>>, %arg14: memref<1x32xf32, #tpu.memory_space<vmem>>, %arg15: memref<1x32xf32, #tpu.memory_space<vmem>>, %arg16: memref<1x32xf32, #tpu.memory_space<vmem>>, %arg17: memref<1x32xf32, #tpu.memory_space<vmem>>, %arg18: memref<1x8x32xf32, #tpu.memory_space<vmem>>) attributes {dimension_semantics = [#tpu.dimension_semantics<parallel>], iteration_bounds = array<i64: 2>, scalar_prefetch = 0 : i64, scratch_operands = 0 : i64, tpu.core_type = #tpu.core_type<tc>, window_params = [{transform_indices = @transform_0, window_bounds = array<i64: 1, 8, 32>}, {pipeline_mode = #tpu.pipeline_mode<synchronous>, transform_indices = @transform_1, window_bounds = array<i64: 32, 32>}, {pipeline_mode = #tpu.pipeline_mode<synchronous>, transform_indices = @transform_2, window_bounds = array<i64: 1, 32>}, {pipeline_mode = #tpu.pipeline_mode<synchronous>, transform_indices = @transform_3, window_bounds = array<i64: 32, 32>}, {pipeline_mode = #tpu.pipeline_mode<synchronous>, transform_indices = @transform_4, window_bounds = array<i64: 1, 32>}, {pipeline_mode = #tpu.pipeline_mode<synchronous>, transform_indices = @transform_5, window_bounds = array<i64: 32, 32>}, {pipeline_mode = #tpu.pipeline_mode<synchronous>, transform_indices = @transform_6, window_bounds = array<i64: 1, 32>}, {pipeline_mode = #tpu.pipeline_mode<synchronous>, transform_indices = @transform_7, window_bounds = array<i64: 32, 32>}, {pipeline_mode = #tpu.pipeline_mode<synchronous>, transform_indices = @transform_8, window_bounds = array<i64: 1, 32>}, {pipeline_mode = #tpu.pipeline_mode<synchronous>, transform_indices = @transform_9, window_bounds = array<i64: 32, 64>}, {pipeline_mode = #tpu.pipeline_mode<synchronous>, transform_indices = @transform_10, window_bounds = array<i64: 1, 64>}, {pipeline_mode = #tpu.pipeline_mode<synchronous>, transform_indices = @transform_11, window_bounds = array<i64: 64, 32>}, {pipeline_mode = #tpu.pipeline_mode<synchronous>, transform_indices = @transform_12, window_bounds = array<i64: 1, 32>}, {pipeline_mode = #tpu.pipeline_mode<synchronous>, transform_indices = @transform_13, window_bounds = array<i64: 1, 32>}, {pipeline_mode = #tpu.pipeline_mode<synchronous>, transform_indices = @transform_14, window_bounds = array<i64: 1, 32>}, {pipeline_mode = #tpu.pipeline_mode<synchronous>, transform_indices = @transform_15, window_bounds = array<i64: 1, 32>}, {pipeline_mode = #tpu.pipeline_mode<synchronous>, transform_indices = @transform_16, window_bounds = array<i64: 1, 32>}, {transform_indices = @transform_17, window_bounds = array<i64: 1, 8, 32>}]} {
    %c0 = arith.constant 0 : index
    %c0_0 = arith.constant 0 : index
    %c0_1 = arith.constant 0 : index
    %0 = vector.load %arg1[%c0, %c0_0, %c0_1] : memref<1x8x32xf32, #tpu.memory_space<vmem>>, vector<1x8x32xf32>
    %1 = vector.shape_cast %0 : vector<1x8x32xf32> to vector<8x32xf32>
    %2 = arith.truncf %1 : vector<8x32xf32> to vector<8x32xbf16>
    %c0_2 = arith.constant 0 : index
    %c0_3 = arith.constant 0 : index
    %3 = vector.load %arg2[%c0_2, %c0_3] : memref<32x32xbf16, #tpu.memory_space<vmem>>, vector<32x32xbf16>
    %cst = arith.constant dense<0.000000e+00> : vector<8x32xf32>
    %4 = tpu.matmul %2, %3, %cst {dimension_numbers = #tpu.dot_dimension_numbers<[1], [0], [0], [1], [0, 0, 1, 1], [], []>} : vector<8x32xbf16>, vector<32x32xbf16>, vector<8x32xf32> -> vector<8x32xf32>
    %c0_4 = arith.constant 0 : index
    %c0_5 = arith.constant 0 : index
    %5 = vector.load %arg3[%c0_4, %c0_5] : memref<1x32xf32, #tpu.memory_space<vmem>>, vector<1x32xf32>
    %6 = vector.broadcast %5 : vector<1x32xf32> to vector<8x32xf32>
    %7 = arith.addf %4, %6 : vector<8x32xf32>
    %cst_6 = arith.constant 0.353553385 : f32
    %8 = vector.broadcast %cst_6 : f32 to vector<8x32xf32>
    %9 = arith.mulf %7, %8 : vector<8x32xf32>
    %10 = arith.truncf %9 : vector<8x32xf32> to vector<8x32xbf16>
    %c0_7 = arith.constant 0 : index
    %c0_8 = arith.constant 0 : index
    %11 = vector.load %arg4[%c0_7, %c0_8] : memref<32x32xbf16, #tpu.memory_space<vmem>>, vector<32x32xbf16>
    %cst_9 = arith.constant dense<0.000000e+00> : vector<8x32xf32>
    %12 = tpu.matmul %2, %11, %cst_9 {dimension_numbers = #tpu.dot_dimension_numbers<[1], [0], [0], [1], [0, 0, 1, 1], [], []>} : vector<8x32xbf16>, vector<32x32xbf16>, vector<8x32xf32> -> vector<8x32xf32>
    %c0_10 = arith.constant 0 : index
    %c0_11 = arith.constant 0 : index
    %13 = vector.load %arg5[%c0_10, %c0_11] : memref<1x32xf32, #tpu.memory_space<vmem>>, vector<1x32xf32>
    %14 = vector.broadcast %13 : vector<1x32xf32> to vector<8x32xf32>
    %15 = arith.addf %12, %14 : vector<8x32xf32>
    %16 = arith.truncf %15 : vector<8x32xf32> to vector<8x32xbf16>
    %c0_12 = arith.constant 0 : index
    %c0_13 = arith.constant 0 : index
    %17 = vector.load %arg6[%c0_12, %c0_13] : memref<32x32xbf16, #tpu.memory_space<vmem>>, vector<32x32xbf16>
    %cst_14 = arith.constant dense<0.000000e+00> : vector<8x32xf32>
    %18 = tpu.matmul %2, %17, %cst_14 {dimension_numbers = #tpu.dot_dimension_numbers<[1], [0], [0], [1], [0, 0, 1, 1], [], []>} : vector<8x32xbf16>, vector<32x32xbf16>, vector<8x32xf32> -> vector<8x32xf32>
    %c0_15 = arith.constant 0 : index
    %c0_16 = arith.constant 0 : index
    %19 = vector.load %arg7[%c0_15, %c0_16] : memref<1x32xf32, #tpu.memory_space<vmem>>, vector<1x32xf32>
    %20 = vector.broadcast %19 : vector<1x32xf32> to vector<8x32xf32>
    %21 = arith.addf %18, %20 : vector<8x32xf32>
    %22 = arith.truncf %21 : vector<8x32xf32> to vector<8x32xbf16>
    %23 = vector.extract_strided_slice %10 {offsets = [0, 0], sizes = [8, 8], strides = [1, 1]} : vector<8x32xbf16> to vector<8x8xbf16>
    %24 = vector.extract_strided_slice %10 {offsets = [0, 8], sizes = [8, 8], strides = [1, 1]} : vector<8x32xbf16> to vector<8x8xbf16>
    %25 = vector.extract_strided_slice %10 {offsets = [0, 16], sizes = [8, 8], strides = [1, 1]} : vector<8x32xbf16> to vector<8x8xbf16>
    %26 = vector.extract_strided_slice %10 {offsets = [0, 24], sizes = [8, 8], strides = [1, 1]} : vector<8x32xbf16> to vector<8x8xbf16>
    %27 = tpu.concatenate %23, %24, %25, %26 in 0 : vector<8x8xbf16>, vector<8x8xbf16>, vector<8x8xbf16>, vector<8x8xbf16> -> vector<32x8xbf16>
    %28 = vector.shape_cast %27 : vector<32x8xbf16> to vector<4x8x8xbf16>
    %29 = vector.extract_strided_slice %16 {offsets = [0, 0], sizes = [8, 8], strides = [1, 1]} : vector<8x32xbf16> to vector<8x8xbf16>
    %30 = vector.extract_strided_slice %16 {offsets = [0, 8], sizes = [8, 8], strides = [1, 1]} : vector<8x32xbf16> to vector<8x8xbf16>
    %31 = vector.extract_strided_slice %16 {offsets = [0, 16], sizes = [8, 8], strides = [1, 1]} : vector<8x32xbf16> to vector<8x8xbf16>
    %32 = vector.extract_strided_slice %16 {offsets = [0, 24], sizes = [8, 8], strides = [1, 1]} : vector<8x32xbf16> to vector<8x8xbf16>
    %33 = tpu.concatenate %29, %30, %31, %32 in 0 : vector<8x8xbf16>, vector<8x8xbf16>, vector<8x8xbf16>, vector<8x8xbf16> -> vector<32x8xbf16>
    %34 = vector.shape_cast %33 : vector<32x8xbf16> to vector<4x8x8xbf16>
    %35 = vector.extract_strided_slice %22 {offsets = [0, 0], sizes = [8, 8], strides = [1, 1]} : vector<8x32xbf16> to vector<8x8xbf16>
    %36 = vector.extract_strided_slice %22 {offsets = [0, 8], sizes = [8, 8], strides = [1, 1]} : vector<8x32xbf16> to vector<8x8xbf16>
    %37 = vector.extract_strided_slice %22 {offsets = [0, 16], sizes = [8, 8], strides = [1, 1]} : vector<8x32xbf16> to vector<8x8xbf16>
    %38 = vector.extract_strided_slice %22 {offsets = [0, 24], sizes = [8, 8], strides = [1, 1]} : vector<8x32xbf16> to vector<8x8xbf16>
    %39 = tpu.concatenate %35, %36, %37, %38 in 0 : vector<8x8xbf16>, vector<8x8xbf16>, vector<8x8xbf16>, vector<8x8xbf16> -> vector<32x8xbf16>
    %40 = vector.shape_cast %39 : vector<32x8xbf16> to vector<4x8x8xbf16>
    %cst_17 = arith.constant 0xFF800000 : f32
    %41 = vector.broadcast %cst_17 : f32 to vector<4x8x1xf32>
    %cst_18 = arith.constant 0.000000e+00 : f32
    %42 = vector.broadcast %cst_18 : f32 to vector<4x8x1xf32>
    %cst_19 = arith.constant 0.000000e+00 : f32
    %43 = vector.broadcast %cst_19 : f32 to vector<4x8x8xf32>
    "tpu.trace_start"() <{level = 10 : i32, message = "bqd,bkd->bqk"}> : () -> ()
    %cst_20 = arith.constant dense<0.000000e+00> : vector<4x8x8xf32>
    %44 = tpu.matmul %28, %34, %cst_20 {dimension_numbers = #tpu.dot_dimension_numbers<[2], [2], [1], [1], [0, 0, 0, 1, 1, 1], [0], [0]>} : vector<4x8x8xbf16>, vector<4x8x8xbf16>, vector<4x8x8xf32> -> vector<4x8x8xf32>
    "tpu.trace_stop"() : () -> ()
    %cst_21 = arith.constant dense<0xFF800000> : vector<4x8xf32>
    %45 = vector.multi_reduction <maximumf>, %44, %cst_21 [2] : vector<4x8x8xf32> to vector<4x8xf32>
    %46 = vector.shape_cast %45 : vector<4x8xf32> to vector<4x8x1xf32>
    %47 = arith.maximumf %41, %46 : vector<4x8x1xf32>
    %48 = arith.subf %41, %47 : vector<4x8x1xf32>
    %49 = math.exp %48 : vector<4x8x1xf32>
    %50 = vector.broadcast %47 : vector<4x8x1xf32> to vector<4x8x8xf32>
    %51 = arith.subf %44, %50 : vector<4x8x8xf32>
    %52 = math.exp %51 : vector<4x8x8xf32>
    %53 = arith.mulf %49, %42 : vector<4x8x1xf32>
    %cst_22 = arith.constant dense<0.000000e+00> : vector<4x8xf32>
    %54 = vector.multi_reduction <add>, %52, %cst_22 [2] : vector<4x8x8xf32> to vector<4x8xf32>
    %55 = vector.shape_cast %54 : vector<4x8xf32> to vector<4x8x1xf32>
    %56 = arith.addf %53, %55 : vector<4x8x1xf32>
    %57 = vector.broadcast %49 : vector<4x8x1xf32> to vector<4x8x8xf32>
    %58 = arith.mulf %57, %43 : vector<4x8x8xf32>
    %59 = arith.truncf %52 : vector<4x8x8xf32> to vector<4x8x8xbf16>
    "tpu.trace_start"() <{level = 10 : i32, message = "bqk,bkd->bqd"}> : () -> ()
    %cst_23 = arith.constant dense<0.000000e+00> : vector<4x8x8xf32>
    %60 = tpu.matmul %59, %40, %cst_23 {dimension_numbers = #tpu.dot_dimension_numbers<[2], [1], [1], [2], [0, 0, 0, 1, 1, 2], [0], [0]>} : vector<4x8x8xbf16>, vector<4x8x8xbf16>, vector<4x8x8xf32> -> vector<4x8x8xf32>
    "tpu.trace_stop"() : () -> ()
    %61 = arith.addf %58, %60 : vector<4x8x8xf32>
    %62 = tpu.reciprocal %56 {approx = true} : vector<4x8x1xf32> -> vector<4x8x1xf32>
    %63 = vector.broadcast %62 : vector<4x8x1xf32> to vector<4x8x8xf32>
    %64 = arith.mulf %61, %63 : vector<4x8x8xf32>
    %65 = arith.truncf %64 : vector<4x8x8xf32> to vector<4x8x8xbf16>
    %66 = vector.extract_strided_slice %65 {offsets = [0, 0, 0], sizes = [1, 8, 8], strides = [1, 1, 1]} : vector<4x8x8xbf16> to vector<1x8x8xbf16>
    %67 = vector.shape_cast %66 : vector<1x8x8xbf16> to vector<8x8xbf16>
    %68 = vector.extract_strided_slice %65 {offsets = [1, 0, 0], sizes = [1, 8, 8], strides = [1, 1, 1]} : vector<4x8x8xbf16> to vector<1x8x8xbf16>
    %69 = vector.shape_cast %68 : vector<1x8x8xbf16> to vector<8x8xbf16>
    %70 = vector.extract_strided_slice %65 {offsets = [2, 0, 0], sizes = [1, 8, 8], strides = [1, 1, 1]} : vector<4x8x8xbf16> to vector<1x8x8xbf16>
    %71 = vector.shape_cast %70 : vector<1x8x8xbf16> to vector<8x8xbf16>
    %72 = vector.extract_strided_slice %65 {offsets = [3, 0, 0], sizes = [1, 8, 8], strides = [1, 1, 1]} : vector<4x8x8xbf16> to vector<1x8x8xbf16>
    %73 = vector.shape_cast %72 : vector<1x8x8xbf16> to vector<8x8xbf16>
    %74 = tpu.concatenate %67, %69, %71, %73 in 1 : vector<8x8xbf16>, vector<8x8xbf16>, vector<8x8xbf16>, vector<8x8xbf16> -> vector<8x32xbf16>
    %c0_24 = arith.constant 0 : index
    %c0_25 = arith.constant 0 : index
    %75 = vector.load %arg8[%c0_24, %c0_25] : memref<32x32xbf16, #tpu.memory_space<vmem>>, vector<32x32xbf16>
    %cst_26 = arith.constant dense<0.000000e+00> : vector<8x32xf32>
    %76 = tpu.matmul %74, %75, %cst_26 {dimension_numbers = #tpu.dot_dimension_numbers<[1], [0], [0], [1], [0, 0, 1, 1], [], []>} : vector<8x32xbf16>, vector<32x32xbf16>, vector<8x32xf32> -> vector<8x32xf32>
    %c0_27 = arith.constant 0 : index
    %c0_28 = arith.constant 0 : index
    %77 = vector.load %arg9[%c0_27, %c0_28] : memref<1x32xf32, #tpu.memory_space<vmem>>, vector<1x32xf32>
    %78 = vector.broadcast %77 : vector<1x32xf32> to vector<8x32xf32>
    %79 = arith.addf %76, %78 : vector<8x32xf32>
    %80 = arith.addf %1, %79 : vector<8x32xf32>
    %cst_29 = arith.constant dense<0.000000e+00> : vector<8xf32>
    %81 = vector.multi_reduction <add>, %80, %cst_29 [1] : vector<8x32xf32> to vector<8xf32>
    %82 = vector.shape_cast %81 : vector<8xf32> to vector<8x1xf32>
    %cst_30 = arith.constant 3.200000e+01 : f32
    %83 = vector.broadcast %cst_30 : f32 to vector<8x1xf32>
    %84 = arith.divf %82, %83 : vector<8x1xf32>
    %85 = vector.broadcast %84 : vector<8x1xf32> to vector<8x32xf32>
    %86 = arith.subf %80, %85 : vector<8x32xf32>
    %87 = arith.mulf %86, %86 : vector<8x32xf32>
    %cst_31 = arith.constant dense<0.000000e+00> : vector<8xf32>
    %88 = vector.multi_reduction <add>, %87, %cst_31 [1] : vector<8x32xf32> to vector<8xf32>
    %89 = vector.shape_cast %88 : vector<8xf32> to vector<8x1xf32>
    %cst_32 = arith.constant 3.200000e+01 : f32
    %90 = vector.broadcast %cst_32 : f32 to vector<8x1xf32>
    %91 = arith.divf %89, %90 : vector<8x1xf32>
    %92 = vector.broadcast %84 : vector<8x1xf32> to vector<8x32xf32>
    %93 = arith.subf %80, %92 : vector<8x32xf32>
    %cst_33 = arith.constant 9.99999974E-6 : f32
    %94 = vector.broadcast %cst_33 : f32 to vector<8x1xf32>
    %95 = arith.addf %91, %94 : vector<8x1xf32>
    %96 = math.rsqrt %95 : vector<8x1xf32>
    %97 = vector.broadcast %96 : vector<8x1xf32> to vector<8x32xf32>
    %98 = arith.mulf %93, %97 : vector<8x32xf32>
    %c0_34 = arith.constant 0 : index
    %c0_35 = arith.constant 0 : index
    %99 = vector.load %arg14[%c0_34, %c0_35] : memref<1x32xf32, #tpu.memory_space<vmem>>, vector<1x32xf32>
    %100 = vector.broadcast %99 : vector<1x32xf32> to vector<8x32xf32>
    %101 = arith.mulf %98, %100 : vector<8x32xf32>
    %c0_36 = arith.constant 0 : index
    %c0_37 = arith.constant 0 : index
    %102 = vector.load %arg15[%c0_36, %c0_37] : memref<1x32xf32, #tpu.memory_space<vmem>>, vector<1x32xf32>
    %103 = vector.broadcast %102 : vector<1x32xf32> to vector<8x32xf32>
    %104 = arith.addf %101, %103 : vector<8x32xf32>
    %105 = arith.truncf %104 : vector<8x32xf32> to vector<8x32xbf16>
    %c0_38 = arith.constant 0 : index
    %c0_39 = arith.constant 0 : index
    %106 = vector.load %arg10[%c0_38, %c0_39] : memref<32x64xbf16, #tpu.memory_space<vmem>>, vector<32x64xbf16>
    %cst_40 = arith.constant dense<0.000000e+00> : vector<8x64xf32>
    %107 = tpu.matmul %105, %106, %cst_40 {dimension_numbers = #tpu.dot_dimension_numbers<[1], [0], [0], [1], [0, 0, 1, 1], [], []>} : vector<8x32xbf16>, vector<32x64xbf16>, vector<8x64xf32> -> vector<8x64xf32>
    %c0_41 = arith.constant 0 : index
    %c0_42 = arith.constant 0 : index
    %108 = vector.load %arg11[%c0_41, %c0_42] : memref<1x64xf32, #tpu.memory_space<vmem>>, vector<1x64xf32>
    %109 = vector.broadcast %108 : vector<1x64xf32> to vector<8x64xf32>
    %110 = arith.addf %107, %109 : vector<8x64xf32>
    %cst_43 = arith.constant 0.000000e+00 : f32
    %111 = vector.broadcast %cst_43 : f32 to vector<8x64xf32>
    %112 = arith.maximumf %110, %111 : vector<8x64xf32>
    %113 = arith.truncf %112 : vector<8x64xf32> to vector<8x64xbf16>
    %c0_44 = arith.constant 0 : index
    %c0_45 = arith.constant 0 : index
    %114 = vector.load %arg12[%c0_44, %c0_45] : memref<64x32xbf16, #tpu.memory_space<vmem>>, vector<64x32xbf16>
    %cst_46 = arith.constant dense<0.000000e+00> : vector<8x32xf32>
    %115 = tpu.matmul %113, %114, %cst_46 {dimension_numbers = #tpu.dot_dimension_numbers<[1], [0], [0], [1], [0, 0, 1, 1], [], []>} : vector<8x64xbf16>, vector<64x32xbf16>, vector<8x32xf32> -> vector<8x32xf32>
    %c0_47 = arith.constant 0 : index
    %c0_48 = arith.constant 0 : index
    %116 = vector.load %arg13[%c0_47, %c0_48] : memref<1x32xf32, #tpu.memory_space<vmem>>, vector<1x32xf32>
    %117 = vector.broadcast %116 : vector<1x32xf32> to vector<8x32xf32>
    %118 = arith.addf %115, %117 : vector<8x32xf32>
    %119 = arith.addf %104, %118 : vector<8x32xf32>
    %cst_49 = arith.constant dense<0.000000e+00> : vector<8xf32>
    %120 = vector.multi_reduction <add>, %119, %cst_49 [1] : vector<8x32xf32> to vector<8xf32>
    %121 = vector.shape_cast %120 : vector<8xf32> to vector<8x1xf32>
    %cst_50 = arith.constant 3.200000e+01 : f32
    %122 = vector.broadcast %cst_50 : f32 to vector<8x1xf32>
    %123 = arith.divf %121, %122 : vector<8x1xf32>
    %124 = vector.broadcast %123 : vector<8x1xf32> to vector<8x32xf32>
    %125 = arith.subf %119, %124 : vector<8x32xf32>
    %126 = arith.mulf %125, %125 : vector<8x32xf32>
    %cst_51 = arith.constant dense<0.000000e+00> : vector<8xf32>
    %127 = vector.multi_reduction <add>, %126, %cst_51 [1] : vector<8x32xf32> to vector<8xf32>
    %128 = vector.shape_cast %127 : vector<8xf32> to vector<8x1xf32>
    %cst_52 = arith.constant 3.200000e+01 : f32
    %129 = vector.broadcast %cst_52 : f32 to vector<8x1xf32>
    %130 = arith.divf %128, %129 : vector<8x1xf32>
    %131 = vector.broadcast %123 : vector<8x1xf32> to vector<8x32xf32>
    %132 = arith.subf %119, %131 : vector<8x32xf32>
    %cst_53 = arith.constant 9.99999974E-6 : f32
    %133 = vector.broadcast %cst_53 : f32 to vector<8x1xf32>
    %134 = arith.addf %130, %133 : vector<8x1xf32>
    %135 = math.rsqrt %134 : vector<8x1xf32>
    %136 = vector.broadcast %135 : vector<8x1xf32> to vector<8x32xf32>
    %137 = arith.mulf %132, %136 : vector<8x32xf32>
    %c0_54 = arith.constant 0 : index
    %c0_55 = arith.constant 0 : index
    %138 = vector.load %arg16[%c0_54, %c0_55] : memref<1x32xf32, #tpu.memory_space<vmem>>, vector<1x32xf32>
    %139 = vector.broadcast %138 : vector<1x32xf32> to vector<8x32xf32>
    %140 = arith.mulf %137, %139 : vector<8x32xf32>
    %c0_56 = arith.constant 0 : index
    %c0_57 = arith.constant 0 : index
    %141 = vector.load %arg17[%c0_56, %c0_57] : memref<1x32xf32, #tpu.memory_space<vmem>>, vector<1x32xf32>
    %142 = vector.broadcast %141 : vector<1x32xf32> to vector<8x32xf32>
    %143 = arith.addf %140, %142 : vector<8x32xf32>
    %144 = vector.shape_cast %143 : vector<8x32xf32> to vector<1x8x32xf32>
    %c0_58 = arith.constant 0 : index
    %c0_59 = arith.constant 0 : index
    %c0_60 = arith.constant 0 : index
    %145 = vector.load %arg18[%c0_58, %c0_59, %c0_60] : memref<1x8x32xf32, #tpu.memory_space<vmem>>, vector<1x8x32xf32>
    tpu.vector_store %arg18[%c0_58, %c0_59, %c0_60], %144 {strides = array<i32>} : memref<1x8x32xf32, #tpu.memory_space<vmem>>, vector<1x8x32xf32>,
    return
  }
  func.func @transform_0(%arg0: i32) -> (i32, i32, i32) {
    %c0_i32 = arith.constant 0 : i32
    %c0_i32_0 = arith.constant 0 : i32
    %c0_i32_1 = arith.constant 0 : i32
    return %arg0, %c0_i32, %c0_i32_0 : i32, i32, i32
  }
  func.func @transform_1(%arg0: i32) -> (i32, i32) {
    %c0_i32 = arith.constant 0 : i32
    %c0_i32_0 = arith.constant 0 : i32
    %c0_i32_1 = arith.constant 0 : i32
    return %c0_i32, %c0_i32_0 : i32, i32
  }
  func.func @transform_2(%arg0: i32) -> (i32, i32) {
    %c0_i32 = arith.constant 0 : i32
    %c0_i32_0 = arith.constant 0 : i32
    %c0_i32_1 = arith.constant 0 : i32
    return %c0_i32, %c0_i32_0 : i32, i32
  }
  func.func @transform_3(%arg0: i32) -> (i32, i32) {
    %c0_i32 = arith.constant 0 : i32
    %c0_i32_0 = arith.constant 0 : i32
    %c0_i32_1 = arith.constant 0 : i32
    return %c0_i32, %c0_i32_0 : i32, i32
  }
  func.func @transform_4(%arg0: i32) -> (i32, i32) {
    %c0_i32 = arith.constant 0 : i32
    %c0_i32_0 = arith.constant 0 : i32
    %c0_i32_1 = arith.constant 0 : i32
    return %c0_i32, %c0_i32_0 : i32, i32
  }
  func.func @transform_5(%arg0: i32) -> (i32, i32) {
    %c0_i32 = arith.constant 0 : i32
    %c0_i32_0 = arith.constant 0 : i32
    %c0_i32_1 = arith.constant 0 : i32
    return %c0_i32, %c0_i32_0 : i32, i32
  }
  func.func @transform_6(%arg0: i32) -> (i32, i32) {
    %c0_i32 = arith.constant 0 : i32
    %c0_i32_0 = arith.constant 0 : i32
    %c0_i32_1 = arith.constant 0 : i32
    return %c0_i32, %c0_i32_0 : i32, i32
  }
  func.func @transform_7(%arg0: i32) -> (i32, i32) {
    %c0_i32 = arith.constant 0 : i32
    %c0_i32_0 = arith.constant 0 : i32
    %c0_i32_1 = arith.constant 0 : i32
    return %c0_i32, %c0_i32_0 : i32, i32
  }
  func.func @transform_8(%arg0: i32) -> (i32, i32) {
    %c0_i32 = arith.constant 0 : i32
    %c0_i32_0 = arith.constant 0 : i32
    %c0_i32_1 = arith.constant 0 : i32
    return %c0_i32, %c0_i32_0 : i32, i32
  }
  func.func @transform_9(%arg0: i32) -> (i32, i32) {
    %c0_i32 = arith.constant 0 : i32
    %c0_i32_0 = arith.constant 0 : i32
    %c0_i32_1 = arith.constant 0 : i32
    return %c0_i32, %c0_i32_0 : i32, i32
  }
  func.func @transform_10(%arg0: i32) -> (i32, i32) {
    %c0_i32 = arith.constant 0 : i32
    %c0_i32_0 = arith.constant 0 : i32
    %c0_i32_1 = arith.constant 0 : i32
    return %c0_i32, %c0_i32_0 : i32, i32
  }
  func.func @transform_11(%arg0: i32) -> (i32, i32) {
    %c0_i32 = arith.constant 0 : i32
    %c0_i32_0 = arith.constant 0 : i32
    %c0_i32_1 = arith.constant 0 : i32
    return %c0_i32, %c0_i32_0 : i32, i32
  }
  func.func @transform_12(%arg0: i32) -> (i32, i32) {
    %c0_i32 = arith.constant 0 : i32
    %c0_i32_0 = arith.constant 0 : i32
    %c0_i32_1 = arith.constant 0 : i32
    return %c0_i32, %c0_i32_0 : i32, i32
  }
  func.func @transform_13(%arg0: i32) -> (i32, i32) {
    %c0_i32 = arith.constant 0 : i32
    %c0_i32_0 = arith.constant 0 : i32
    %c0_i32_1 = arith.constant 0 : i32
    return %c0_i32, %c0_i32_0 : i32, i32
  }
  func.func @transform_14(%arg0: i32) -> (i32, i32) {
    %c0_i32 = arith.constant 0 : i32
    %c0_i32_0 = arith.constant 0 : i32
    %c0_i32_1 = arith.constant 0 : i32
    return %c0_i32, %c0_i32_0 : i32, i32
  }
  func.func @transform_15(%arg0: i32) -> (i32, i32) {
    %c0_i32 = arith.constant 0 : i32
    %c0_i32_0 = arith.constant 0 : i32
    %c0_i32_1 = arith.constant 0 : i32
    return %c0_i32, %c0_i32_0 : i32, i32
  }
  func.func @transform_16(%arg0: i32) -> (i32, i32) {
    %c0_i32 = arith.constant 0 : i32
    %c0_i32_0 = arith.constant 0 : i32
    %c0_i32_1 = arith.constant 0 : i32
    return %c0_i32, %c0_i32_0 : i32, i32
  }
  func.func @transform_17(%arg0: i32) -> (i32, i32, i32) {
    %c0_i32 = arith.constant 0 : i32
    %c0_i32_0 = arith.constant 0 : i32
    %c0_i32_1 = arith.constant 0 : i32
    return %arg0, %c0_i32, %c0_i32_0 : i32, i32, i32
  }
}

module attributes {stable_mosaic.version = 11 : i64} {
  func.func @_encoder_layer_kernel(%arg0: i32, %arg1: memref<1x8x32xf32, #tpu.memory_space<vmem>>, %arg2: memref<32x32xbf16, #tpu.memory_space<vmem>>, %arg3: memref<1x32xf32, #tpu.memory_space<vmem>>, %arg4: memref<32x32xbf16, #tpu.memory_space<vmem>>, %arg5: memref<1x32xf32, #tpu.memory_space<vmem>>, %arg6: memref<32x32xbf16, #tpu.memory_space<vmem>>, %arg7: memref<1x32xf32, #tpu.memory_space<vmem>>, %arg8: memref<32x32xbf16, #tpu.memory_space<vmem>>, %arg9: memref<1x32xf32, #tpu.memory_space<vmem>>, %arg10: memref<32x64xbf16, #tpu.memory_space<vmem>>, %arg11: memref<1x64xf32, #tpu.memory_space<vmem>>, %arg12: memref<64x32xbf16, #tpu.memory_space<vmem>>, %arg13: memref<1x32xf32, #tpu.memory_space<vmem>>, %arg14: memref<1x32xf32, #tpu.memory_space<vmem>>, %arg15: memref<1x32xf32, #tpu.memory_space<vmem>>, %arg16: memref<1x32xf32, #tpu.memory_space<vmem>>, %arg17: memref<1x32xf32, #tpu.memory_space<vmem>>, %arg18: memref<1x8x32xf32, #tpu.memory_space<vmem>>) attributes {dimension_semantics = [#tpu.dimension_semantics<parallel>], iteration_bounds = array<i64: 2>, scalar_prefetch = 0 : i64, scratch_operands = 0 : i64, tpu.core_type = #tpu.core_type<tc>, window_params = [{transform_indices = @transform_0, window_bounds = array<i64: 1, 8, 32>}, {pipeline_mode = #tpu.pipeline_mode<synchronous>, transform_indices = @transform_1, window_bounds = array<i64: 32, 32>}, {pipeline_mode = #tpu.pipeline_mode<synchronous>, transform_indices = @transform_2, window_bounds = array<i64: 1, 32>}, {pipeline_mode = #tpu.pipeline_mode<synchronous>, transform_indices = @transform_3, window_bounds = array<i64: 32, 32>}, {pipeline_mode = #tpu.pipeline_mode<synchronous>, transform_indices = @transform_4, window_bounds = array<i64: 1, 32>}, {pipeline_mode = #tpu.pipeline_mode<synchronous>, transform_indices = @transform_5, window_bounds = array<i64: 32, 32>}, {pipeline_mode = #tpu.pipeline_mode<synchronous>, transform_indices = @transform_6, window_bounds = array<i64: 1, 32>}, {pipeline_mode = #tpu.pipeline_mode<synchronous>, transform_indices = @transform_7, window_bounds = array<i64: 32, 32>}, {pipeline_mode = #tpu.pipeline_mode<synchronous>, transform_indices = @transform_8, window_bounds = array<i64: 1, 32>}, {pipeline_mode = #tpu.pipeline_mode<synchronous>, transform_indices = @transform_9, window_bounds = array<i64: 32, 64>}, {pipeline_mode = #tpu.pipeline_mode<synchronous>, transform_indices = @transform_10, window_bounds = array<i64: 1, 64>}, {pipeline_mode = #tpu.pipeline_mode<synchronous>, transform_indices = @transform_11, window_bounds = array<i64: 64, 32>}, {pipeline_mode = #tpu.pipeline_mode<synchronous>, transform_indices = @transform_12, window_bounds = array<i64: 1, 32>}, {pipeline_mode = #tpu.pipeline_mode<synchronous>, transform_indices = @transform_13, window_bounds = array<i64: 1, 32>}, {pipeline_mode = #tpu.pipeline_mode<synchronous>, transform_indices = @transform_14, window_bounds = array<i64: 1, 32>}, {pipeline_mode = #tpu.pipeline_mode<synchronous>, transform_indices = @transform_15, window_bounds = array<i64: 1, 32>}, {pipeline_mode = #tpu.pipeline_mode<synchronous>, transform_indices = @transform_16, window_bounds = array<i64: 1, 32>}, {transform_indices = @transform_17, window_bounds = array<i64: 1, 8, 32>}]} {
    %c0 = arith.constant 0 : index
    %c0_0 = arith.constant 0 : index
    %c0_1 = arith.constant 0 : index
    %0 = vector.load %arg1[%c0, %c0_0, %c0_1] : memref<1x8x32xf32, #tpu.memory_space<vmem>>, vector<1x8x32xf32>
    %1 = vector.shape_cast %0 : vector<1x8x32xf32> to vector<8x32xf32>
    %2 = arith.truncf %1 : vector<8x32xf32> to vector<8x32xbf16>
    %c0_2 = arith.constant 0 : index
    %c0_3 = arith.constant 0 : index
    %3 = vector.load %arg2[%c0_2, %c0_3] : memref<32x32xbf16, #tpu.memory_space<vmem>>, vector<32x32xbf16>
    %cst = arith.constant dense<0.000000e+00> : vector<8x32xf32>
    %4 = tpu.matmul %2, %3, %cst {dimension_numbers = #tpu.dot_dimension_numbers<[1], [0], [0], [1], [0, 0, 1, 1], [], []>} : vector<8x32xbf16>, vector<32x32xbf16>, vector<8x32xf32> -> vector<8x32xf32>
    %c0_4 = arith.constant 0 : index
    %c0_5 = arith.constant 0 : index
    %5 = vector.load %arg3[%c0_4, %c0_5] : memref<1x32xf32, #tpu.memory_space<vmem>>, vector<1x32xf32>
    %6 = vector.broadcast %5 : vector<1x32xf32> to vector<8x32xf32>
    %7 = arith.addf %4, %6 : vector<8x32xf32>
    %cst_6 = arith.constant 0.353553385 : f32
    %8 = vector.broadcast %cst_6 : f32 to vector<8x32xf32>
    %9 = arith.mulf %7, %8 : vector<8x32xf32>
    %10 = arith.truncf %9 : vector<8x32xf32> to vector<8x32xbf16>
    %c0_7 = arith.constant 0 : index
    %c0_8 = arith.constant 0 : index
    %11 = vector.load %arg4[%c0_7, %c0_8] : memref<32x32xbf16, #tpu.memory_space<vmem>>, vector<32x32xbf16>
    %cst_9 = arith.constant dense<0.000000e+00> : vector<8x32xf32>
    %12 = tpu.matmul %2, %11, %cst_9 {dimension_numbers = #tpu.dot_dimension_numbers<[1], [0], [0], [1], [0, 0, 1, 1], [], []>} : vector<8x32xbf16>, vector<32x32xbf16>, vector<8x32xf32> -> vector<8x32xf32>
    %c0_10 = arith.constant 0 : index
    %c0_11 = arith.constant 0 : index
    %13 = vector.load %arg5[%c0_10, %c0_11] : memref<1x32xf32, #tpu.memory_space<vmem>>, vector<1x32xf32>
    %14 = vector.broadcast %13 : vector<1x32xf32> to vector<8x32xf32>
    %15 = arith.addf %12, %14 : vector<8x32xf32>
    %16 = arith.truncf %15 : vector<8x32xf32> to vector<8x32xbf16>
    %c0_12 = arith.constant 0 : index
    %c0_13 = arith.constant 0 : index
    %17 = vector.load %arg6[%c0_12, %c0_13] : memref<32x32xbf16, #tpu.memory_space<vmem>>, vector<32x32xbf16>
    %cst_14 = arith.constant dense<0.000000e+00> : vector<8x32xf32>
    %18 = tpu.matmul %2, %17, %cst_14 {dimension_numbers = #tpu.dot_dimension_numbers<[1], [0], [0], [1], [0, 0, 1, 1], [], []>} : vector<8x32xbf16>, vector<32x32xbf16>, vector<8x32xf32> -> vector<8x32xf32>
    %c0_15 = arith.constant 0 : index
    %c0_16 = arith.constant 0 : index
    %19 = vector.load %arg7[%c0_15, %c0_16] : memref<1x32xf32, #tpu.memory_space<vmem>>, vector<1x32xf32>
    %20 = vector.broadcast %19 : vector<1x32xf32> to vector<8x32xf32>
    %21 = arith.addf %18, %20 : vector<8x32xf32>
    %22 = arith.truncf %21 : vector<8x32xf32> to vector<8x32xbf16>
    %23 = vector.extract_strided_slice %10 {offsets = [0, 0], sizes = [8, 8], strides = [1, 1]} : vector<8x32xbf16> to vector<8x8xbf16>
    %24 = vector.extract_strided_slice %10 {offsets = [0, 8], sizes = [8, 8], strides = [1, 1]} : vector<8x32xbf16> to vector<8x8xbf16>
    %25 = vector.extract_strided_slice %10 {offsets = [0, 16], sizes = [8, 8], strides = [1, 1]} : vector<8x32xbf16> to vector<8x8xbf16>
    %26 = vector.extract_strided_slice %10 {offsets = [0, 24], sizes = [8, 8], strides = [1, 1]} : vector<8x32xbf16> to vector<8x8xbf16>
    %27 = tpu.concatenate %23, %24, %25, %26 in 0 : vector<8x8xbf16>, vector<8x8xbf16>, vector<8x8xbf16>, vector<8x8xbf16> -> vector<32x8xbf16>
    %28 = vector.shape_cast %27 : vector<32x8xbf16> to vector<4x8x8xbf16>
    %29 = vector.extract_strided_slice %16 {offsets = [0, 0], sizes = [8, 8], strides = [1, 1]} : vector<8x32xbf16> to vector<8x8xbf16>
    %30 = vector.extract_strided_slice %16 {offsets = [0, 8], sizes = [8, 8], strides = [1, 1]} : vector<8x32xbf16> to vector<8x8xbf16>
    %31 = vector.extract_strided_slice %16 {offsets = [0, 16], sizes = [8, 8], strides = [1, 1]} : vector<8x32xbf16> to vector<8x8xbf16>
    %32 = vector.extract_strided_slice %16 {offsets = [0, 24], sizes = [8, 8], strides = [1, 1]} : vector<8x32xbf16> to vector<8x8xbf16>
    %33 = tpu.concatenate %29, %30, %31, %32 in 0 : vector<8x8xbf16>, vector<8x8xbf16>, vector<8x8xbf16>, vector<8x8xbf16> -> vector<32x8xbf16>
    %34 = vector.shape_cast %33 : vector<32x8xbf16> to vector<4x8x8xbf16>
    %35 = vector.extract_strided_slice %22 {offsets = [0, 0], sizes = [8, 8], strides = [1, 1]} : vector<8x32xbf16> to vector<8x8xbf16>
    %36 = vector.extract_strided_slice %22 {offsets = [0, 8], sizes = [8, 8], strides = [1, 1]} : vector<8x32xbf16> to vector<8x8xbf16>
    %37 = vector.extract_strided_slice %22 {offsets = [0, 16], sizes = [8, 8], strides = [1, 1]} : vector<8x32xbf16> to vector<8x8xbf16>
    %38 = vector.extract_strided_slice %22 {offsets = [0, 24], sizes = [8, 8], strides = [1, 1]} : vector<8x32xbf16> to vector<8x8xbf16>
    %39 = tpu.concatenate %35, %36, %37, %38 in 0 : vector<8x8xbf16>, vector<8x8xbf16>, vector<8x8xbf16>, vector<8x8xbf16> -> vector<32x8xbf16>
    %40 = vector.shape_cast %39 : vector<32x8xbf16> to vector<4x8x8xbf16>
    %cst_17 = arith.constant 0xFF800000 : f32
    %41 = vector.broadcast %cst_17 : f32 to vector<4x8x1xf32>
    %cst_18 = arith.constant 0.000000e+00 : f32
    %42 = vector.broadcast %cst_18 : f32 to vector<4x8x1xf32>
    %cst_19 = arith.constant 0.000000e+00 : f32
    %43 = vector.broadcast %cst_19 : f32 to vector<4x8x8xf32>
    "tpu.trace_start"() <{level = 10 : i32, message = "bqd,bkd->bqk"}> : () -> ()
    %cst_20 = arith.constant dense<0.000000e+00> : vector<4x8x8xf32>
    %44 = tpu.matmul %28, %34, %cst_20 {dimension_numbers = #tpu.dot_dimension_numbers<[2], [2], [1], [1], [0, 0, 0, 1, 1, 1], [0], [0]>} : vector<4x8x8xbf16>, vector<4x8x8xbf16>, vector<4x8x8xf32> -> vector<4x8x8xf32>
    "tpu.trace_stop"() : () -> ()
    %cst_21 = arith.constant dense<0xFF800000> : vector<4x8xf32>
    %45 = vector.multi_reduction <maximumf>, %44, %cst_21 [2] : vector<4x8x8xf32> to vector<4x8xf32>
    %46 = vector.shape_cast %45 : vector<4x8xf32> to vector<4x8x1xf32>
    %47 = arith.maximumf %41, %46 : vector<4x8x1xf32>
    %48 = arith.subf %41, %47 : vector<4x8x1xf32>
    %49 = math.exp %48 : vector<4x8x1xf32>
    %50 = vector.broadcast %47 : vector<4x8x1xf32> to vector<4x8x8xf32>
    %51 = arith.subf %44, %50 : vector<4x8x8xf32>
    %52 = math.exp %51 : vector<4x8x8xf32>
    %53 = arith.mulf %49, %42 : vector<4x8x1xf32>
    %cst_22 = arith.constant dense<0.000000e+00> : vector<4x8xf32>
    %54 = vector.multi_reduction <add>, %52, %cst_22 [2] : vector<4x8x8xf32> to vector<4x8xf32>
    %55 = vector.shape_cast %54 : vector<4x8xf32> to vector<4x8x1xf32>
    %56 = arith.addf %53, %55 : vector<4x8x1xf32>
    %57 = vector.broadcast %49 : vector<4x8x1xf32> to vector<4x8x8xf32>
    %58 = arith.mulf %57, %43 : vector<4x8x8xf32>
    %59 = arith.truncf %52 : vector<4x8x8xf32> to vector<4x8x8xbf16>
    "tpu.trace_start"() <{level = 10 : i32, message = "bqk,bkd->bqd"}> : () -> ()
    %cst_23 = arith.constant dense<0.000000e+00> : vector<4x8x8xf32>
    %60 = tpu.matmul %59, %40, %cst_23 {dimension_numbers = #tpu.dot_dimension_numbers<[2], [1], [1], [2], [0, 0, 0, 1, 1, 2], [0], [0]>} : vector<4x8x8xbf16>, vector<4x8x8xbf16>, vector<4x8x8xf32> -> vector<4x8x8xf32>
    "tpu.trace_stop"() : () -> ()
    %61 = arith.addf %58, %60 : vector<4x8x8xf32>
    %62 = tpu.reciprocal %56 {approx = true} : vector<4x8x1xf32> -> vector<4x8x1xf32>
    %63 = vector.broadcast %62 : vector<4x8x1xf32> to vector<4x8x8xf32>
    %64 = arith.mulf %61, %63 : vector<4x8x8xf32>
    %65 = arith.truncf %64 : vector<4x8x8xf32> to vector<4x8x8xbf16>
    %66 = vector.extract_strided_slice %65 {offsets = [0, 0, 0], sizes = [1, 8, 8], strides = [1, 1, 1]} : vector<4x8x8xbf16> to vector<1x8x8xbf16>
    %67 = vector.shape_cast %66 : vector<1x8x8xbf16> to vector<8x8xbf16>
    %68 = vector.extract_strided_slice %65 {offsets = [1, 0, 0], sizes = [1, 8, 8], strides = [1, 1, 1]} : vector<4x8x8xbf16> to vector<1x8x8xbf16>
    %69 = vector.shape_cast %68 : vector<1x8x8xbf16> to vector<8x8xbf16>
    %70 = vector.extract_strided_slice %65 {offsets = [2, 0, 0], sizes = [1, 8, 8], strides = [1, 1, 1]} : vector<4x8x8xbf16> to vector<1x8x8xbf16>
    %71 = vector.shape_cast %70 : vector<1x8x8xbf16> to vector<8x8xbf16>
    %72 = vector.extract_strided_slice %65 {offsets = [3, 0, 0], sizes = [1, 8, 8], strides = [1, 1, 1]} : vector<4x8x8xbf16> to vector<1x8x8xbf16>
    %73 = vector.shape_cast %72 : vector<1x8x8xbf16> to vector<8x8xbf16>
    %74 = tpu.concatenate %67, %69, %71, %73 in 1 : vector<8x8xbf16>, vector<8x8xbf16>, vector<8x8xbf16>, vector<8x8xbf16> -> vector<8x32xbf16>
    %c0_24 = arith.constant 0 : index
    %c0_25 = arith.constant 0 : index
    %75 = vector.load %arg8[%c0_24, %c0_25] : memref<32x32xbf16, #tpu.memory_space<vmem>>, vector<32x32xbf16>
    %cst_26 = arith.constant dense<0.000000e+00> : vector<8x32xf32>
    %76 = tpu.matmul %74, %75, %cst_26 {dimension_numbers = #tpu.dot_dimension_numbers<[1], [0], [0], [1], [0, 0, 1, 1], [], []>} : vector<8x32xbf16>, vector<32x32xbf16>, vector<8x32xf32> -> vector<8x32xf32>
    %c0_27 = arith.constant 0 : index
    %c0_28 = arith.constant 0 : index
    %77 = vector.load %arg9[%c0_27, %c0_28] : memref<1x32xf32, #tpu.memory_space<vmem>>, vector<1x32xf32>
    %78 = vector.broadcast %77 : vector<1x32xf32> to vector<8x32xf32>
    %79 = arith.addf %76, %78 : vector<8x32xf32>
    %80 = arith.addf %1, %79 : vector<8x32xf32>
    %cst_29 = arith.constant dense<0.000000e+00> : vector<8xf32>
    %81 = vector.multi_reduction <add>, %80, %cst_29 [1] : vector<8x32xf32> to vector<8xf32>
    %82 = vector.shape_cast %81 : vector<8xf32> to vector<8x1xf32>
    %cst_30 = arith.constant 3.200000e+01 : f32
    %83 = vector.broadcast %cst_30 : f32 to vector<8x1xf32>
    %84 = arith.divf %82, %83 : vector<8x1xf32>
    %85 = vector.broadcast %84 : vector<8x1xf32> to vector<8x32xf32>
    %86 = arith.subf %80, %85 : vector<8x32xf32>
    %87 = arith.mulf %86, %86 : vector<8x32xf32>
    %cst_31 = arith.constant dense<0.000000e+00> : vector<8xf32>
    %88 = vector.multi_reduction <add>, %87, %cst_31 [1] : vector<8x32xf32> to vector<8xf32>
    %89 = vector.shape_cast %88 : vector<8xf32> to vector<8x1xf32>
    %cst_32 = arith.constant 3.200000e+01 : f32
    %90 = vector.broadcast %cst_32 : f32 to vector<8x1xf32>
    %91 = arith.divf %89, %90 : vector<8x1xf32>
    %92 = vector.broadcast %84 : vector<8x1xf32> to vector<8x32xf32>
    %93 = arith.subf %80, %92 : vector<8x32xf32>
    %cst_33 = arith.constant 9.99999974E-6 : f32
    %94 = vector.broadcast %cst_33 : f32 to vector<8x1xf32>
    %95 = arith.addf %91, %94 : vector<8x1xf32>
    %96 = math.rsqrt %95 : vector<8x1xf32>
    %97 = vector.broadcast %96 : vector<8x1xf32> to vector<8x32xf32>
    %98 = arith.mulf %93, %97 : vector<8x32xf32>
    %c0_34 = arith.constant 0 : index
    %c0_35 = arith.constant 0 : index
    %99 = vector.load %arg14[%c0_34, %c0_35] : memref<1x32xf32, #tpu.memory_space<vmem>>, vector<1x32xf32>
    %100 = vector.broadcast %99 : vector<1x32xf32> to vector<8x32xf32>
    %101 = arith.mulf %98, %100 : vector<8x32xf32>
    %c0_36 = arith.constant 0 : index
    %c0_37 = arith.constant 0 : index
    %102 = vector.load %arg15[%c0_36, %c0_37] : memref<1x32xf32, #tpu.memory_space<vmem>>, vector<1x32xf32>
    %103 = vector.broadcast %102 : vector<1x32xf32> to vector<8x32xf32>
    %104 = arith.addf %101, %103 : vector<8x32xf32>
    %105 = arith.truncf %104 : vector<8x32xf32> to vector<8x32xbf16>
    %c0_38 = arith.constant 0 : index
    %c0_39 = arith.constant 0 : index
    %106 = vector.load %arg10[%c0_38, %c0_39] : memref<32x64xbf16, #tpu.memory_space<vmem>>, vector<32x64xbf16>
    %cst_40 = arith.constant dense<0.000000e+00> : vector<8x64xf32>
    %107 = tpu.matmul %105, %106, %cst_40 {dimension_numbers = #tpu.dot_dimension_numbers<[1], [0], [0], [1], [0, 0, 1, 1], [], []>} : vector<8x32xbf16>, vector<32x64xbf16>, vector<8x64xf32> -> vector<8x64xf32>
    %c0_41 = arith.constant 0 : index
    %c0_42 = arith.constant 0 : index
    %108 = vector.load %arg11[%c0_41, %c0_42] : memref<1x64xf32, #tpu.memory_space<vmem>>, vector<1x64xf32>
    %109 = vector.broadcast %108 : vector<1x64xf32> to vector<8x64xf32>
    %110 = arith.addf %107, %109 : vector<8x64xf32>
    %cst_43 = arith.constant 0.000000e+00 : f32
    %111 = vector.broadcast %cst_43 : f32 to vector<8x64xf32>
    %112 = arith.maximumf %110, %111 : vector<8x64xf32>
    %113 = arith.truncf %112 : vector<8x64xf32> to vector<8x64xbf16>
    %c0_44 = arith.constant 0 : index
    %c0_45 = arith.constant 0 : index
    %114 = vector.load %arg12[%c0_44, %c0_45] : memref<64x32xbf16, #tpu.memory_space<vmem>>, vector<64x32xbf16>
    %cst_46 = arith.constant dense<0.000000e+00> : vector<8x32xf32>
    %115 = tpu.matmul %113, %114, %cst_46 {dimension_numbers = #tpu.dot_dimension_numbers<[1], [0], [0], [1], [0, 0, 1, 1], [], []>} : vector<8x64xbf16>, vector<64x32xbf16>, vector<8x32xf32> -> vector<8x32xf32>
    %c0_47 = arith.constant 0 : index
    %c0_48 = arith.constant 0 : index
    %116 = vector.load %arg13[%c0_47, %c0_48] : memref<1x32xf32, #tpu.memory_space<vmem>>, vector<1x32xf32>
    %117 = vector.broadcast %116 : vector<1x32xf32> to vector<8x32xf32>
    %118 = arith.addf %115, %117 : vector<8x32xf32>
    %119 = arith.addf %104, %118 : vector<8x32xf32>
    %cst_49 = arith.constant dense<0.000000e+00> : vector<8xf32>
    %120 = vector.multi_reduction <add>, %119, %cst_49 [1] : vector<8x32xf32> to vector<8xf32>
    %121 = vector.shape_cast %120 : vector<8xf32> to vector<8x1xf32>
    %cst_50 = arith.constant 3.200000e+01 : f32
    %122 = vector.broadcast %cst_50 : f32 to vector<8x1xf32>
    %123 = arith.divf %121, %122 : vector<8x1xf32>
    %124 = vector.broadcast %123 : vector<8x1xf32> to vector<8x32xf32>
    %125 = arith.subf %119, %124 : vector<8x32xf32>
    %126 = arith.mulf %125, %125 : vector<8x32xf32>
    %cst_51 = arith.constant dense<0.000000e+00> : vector<8xf32>
    %127 = vector.multi_reduction <add>, %126, %cst_51 [1] : vector<8x32xf32> to vector<8xf32>
    %128 = vector.shape_cast %127 : vector<8xf32> to vector<8x1xf32>
    %cst_52 = arith.constant 3.200000e+01 : f32
    %129 = vector.broadcast %cst_52 : f32 to vector<8x1xf32>
    %130 = arith.divf %128, %129 : vector<8x1xf32>
    %131 = vector.broadcast %123 : vector<8x1xf32> to vector<8x32xf32>
    %132 = arith.subf %119, %131 : vector<8x32xf32>
    %cst_53 = arith.constant 9.99999974E-6 : f32
    %133 = vector.broadcast %cst_53 : f32 to vector<8x1xf32>
    %134 = arith.addf %130, %133 : vector<8x1xf32>
    %135 = math.rsqrt %134 : vector<8x1xf32>
    %136 = vector.broadcast %135 : vector<8x1xf32> to vector<8x32xf32>
    %137 = arith.mulf %132, %136 : vector<8x32xf32>
    %c0_54 = arith.constant 0 : index
    %c0_55 = arith.constant 0 : index
    %138 = vector.load %arg16[%c0_54, %c0_55] : memref<1x32xf32, #tpu.memory_space<vmem>>, vector<1x32xf32>
    %139 = vector.broadcast %138 : vector<1x32xf32> to vector<8x32xf32>
    %140 = arith.mulf %137, %139 : vector<8x32xf32>
    %c0_56 = arith.constant 0 : index
    %c0_57 = arith.constant 0 : index
    %141 = vector.load %arg17[%c0_56, %c0_57] : memref<1x32xf32, #tpu.memory_space<vmem>>, vector<1x32xf32>
    %142 = vector.broadcast %141 : vector<1x32xf32> to vector<8x32xf32>
    %143 = arith.addf %140, %142 : vector<8x32xf32>
    %144 = vector.shape_cast %143 : vector<8x32xf32> to vector<1x8x32xf32>
    %c0_58 = arith.constant 0 : index
    %c0_59 = arith.constant 0 : index
    %c0_60 = arith.constant 0 : index
    %145 = vector.load %arg18[%c0_58, %c0_59, %c0_60] : memref<1x8x32xf32, #tpu.memory_space<vmem>>, vector<1x8x32xf32>
    tpu.vector_store %arg18[%c0_58, %c0_59, %c0_60], %144 {strides = array<i32>} : memref<1x8x32xf32, #tpu.memory_space<vmem>>, vector<1x8x32xf32>,
    return
  }
  func.func @transform_0(%arg0: i32) -> (i32, i32, i32) {
    %c0_i32 = arith.constant 0 : i32
    %c0_i32_0 = arith.constant 0 : i32
    %c0_i32_1 = arith.constant 0 : i32
    return %arg0, %c0_i32, %c0_i32_0 : i32, i32, i32
  }
  func.func @transform_1(%arg0: i32) -> (i32, i32) {
    %c0_i32 = arith.constant 0 : i32
    %c0_i32_0 = arith.constant 0 : i32
    %c0_i32_1 = arith.constant 0 : i32
    return %c0_i32, %c0_i32_0 : i32, i32
  }
  func.func @transform_2(%arg0: i32) -> (i32, i32) {
    %c0_i32 = arith.constant 0 : i32
    %c0_i32_0 = arith.constant 0 : i32
    %c0_i32_1 = arith.constant 0 : i32
    return %c0_i32, %c0_i32_0 : i32, i32
  }
  func.func @transform_3(%arg0: i32) -> (i32, i32) {
    %c0_i32 = arith.constant 0 : i32
    %c0_i32_0 = arith.constant 0 : i32
    %c0_i32_1 = arith.constant 0 : i32
    return %c0_i32, %c0_i32_0 : i32, i32
  }
  func.func @transform_4(%arg0: i32) -> (i32, i32) {
    %c0_i32 = arith.constant 0 : i32
    %c0_i32_0 = arith.constant 0 : i32
    %c0_i32_1 = arith.constant 0 : i32
    return %c0_i32, %c0_i32_0 : i32, i32
  }
  func.func @transform_5(%arg0: i32) -> (i32, i32) {
    %c0_i32 = arith.constant 0 : i32
    %c0_i32_0 = arith.constant 0 : i32
    %c0_i32_1 = arith.constant 0 : i32
    return %c0_i32, %c0_i32_0 : i32, i32
  }
  func.func @transform_6(%arg0: i32) -> (i32, i32) {
    %c0_i32 = arith.constant 0 : i32
    %c0_i32_0 = arith.constant 0 : i32
    %c0_i32_1 = arith.constant 0 : i32
    return %c0_i32, %c0_i32_0 : i32, i32
  }
  func.func @transform_7(%arg0: i32) -> (i32, i32) {
    %c0_i32 = arith.constant 0 : i32
    %c0_i32_0 = arith.constant 0 : i32
    %c0_i32_1 = arith.constant 0 : i32
    return %c0_i32, %c0_i32_0 : i32, i32
  }
  func.func @transform_8(%arg0: i32) -> (i32, i32) {
    %c0_i32 = arith.constant 0 : i32
    %c0_i32_0 = arith.constant 0 : i32
    %c0_i32_1 = arith.constant 0 : i32
    return %c0_i32, %c0_i32_0 : i32, i32
  }
  func.func @transform_9(%arg0: i32) -> (i32, i32) {
    %c0_i32 = arith.constant 0 : i32
    %c0_i32_0 = arith.constant 0 : i32
    %c0_i32_1 = arith.constant 0 : i32
    return %c0_i32, %c0_i32_0 : i32, i32
  }
  func.func @transform_10(%arg0: i32) -> (i32, i32) {
    %c0_i32 = arith.constant 0 : i32
    %c0_i32_0 = arith.constant 0 : i32
    %c0_i32_1 = arith.constant 0 : i32
    return %c0_i32, %c0_i32_0 : i32, i32
  }
  func.func @transform_11(%arg0: i32) -> (i32, i32) {
    %c0_i32 = arith.constant 0 : i32
    %c0_i32_0 = arith.constant 0 : i32
    %c0_i32_1 = arith.constant 0 : i32
    return %c0_i32, %c0_i32_0 : i32, i32
  }
  func.func @transform_12(%arg0: i32) -> (i32, i32) {
    %c0_i32 = arith.constant 0 : i32
    %c0_i32_0 = arith.constant 0 : i32
    %c0_i32_1 = arith.constant 0 : i32
    return %c0_i32, %c0_i32_0 : i32, i32
  }
  func.func @transform_13(%arg0: i32) -> (i32, i32) {
    %c0_i32 = arith.constant 0 : i32
    %c0_i32_0 = arith.constant 0 : i32
    %c0_i32_1 = arith.constant 0 : i32
    return %c0_i32, %c0_i32_0 : i32, i32
  }
  func.func @transform_14(%arg0: i32) -> (i32, i32) {
    %c0_i32 = arith.constant 0 : i32
    %c0_i32_0 = arith.constant 0 : i32
    %c0_i32_1 = arith.constant 0 : i32
    return %c0_i32, %c0_i32_0 : i32, i32
  }
  func.func @transform_15(%arg0: i32) -> (i32, i32) {
    %c0_i32 = arith.constant 0 : i32
    %c0_i32_0 = arith.constant 0 : i32
    %c0_i32_1 = arith.constant 0 : i32
    return %c0_i32, %c0_i32_0 : i32, i32
  }
  func.func @transform_16(%arg0: i32) -> (i32, i32) {
    %c0_i32 = arith.constant 0 : i32
    %c0_i32_0 = arith.constant 0 : i32
    %c0_i32_1 = arith.constant 0 : i32
    return %c0_i32, %c0_i32_0 : i32, i32
  }
  func.func @transform_17(%arg0: i32) -> (i32, i32, i32) {
    %c0_i32 = arith.constant 0 : i32
    %c0_i32_0 = arith.constant 0 : i32
    %c0_i32_1 = arith.constant 0 : i32
    return %arg0, %c0_i32, %c0_i32_0 : i32, i32, i32
  }
}

module attributes {stable_mosaic.version = 11 : i64} {
  func.func @_encoder_layer_kernel(%arg0: i32, %arg1: memref<1x8x32xf32, #tpu.memory_space<vmem>>, %arg2: memref<32x32xbf16, #tpu.memory_space<vmem>>, %arg3: memref<1x32xf32, #tpu.memory_space<vmem>>, %arg4: memref<32x32xbf16, #tpu.memory_space<vmem>>, %arg5: memref<1x32xf32, #tpu.memory_space<vmem>>, %arg6: memref<32x32xbf16, #tpu.memory_space<vmem>>, %arg7: memref<1x32xf32, #tpu.memory_space<vmem>>, %arg8: memref<32x32xbf16, #tpu.memory_space<vmem>>, %arg9: memref<1x32xf32, #tpu.memory_space<vmem>>, %arg10: memref<32x64xbf16, #tpu.memory_space<vmem>>, %arg11: memref<1x64xf32, #tpu.memory_space<vmem>>, %arg12: memref<64x32xbf16, #tpu.memory_space<vmem>>, %arg13: memref<1x32xf32, #tpu.memory_space<vmem>>, %arg14: memref<1x32xf32, #tpu.memory_space<vmem>>, %arg15: memref<1x32xf32, #tpu.memory_space<vmem>>, %arg16: memref<1x32xf32, #tpu.memory_space<vmem>>, %arg17: memref<1x32xf32, #tpu.memory_space<vmem>>, %arg18: memref<1x8x32xf32, #tpu.memory_space<vmem>>) attributes {dimension_semantics = [#tpu.dimension_semantics<parallel>], iteration_bounds = array<i64: 2>, scalar_prefetch = 0 : i64, scratch_operands = 0 : i64, tpu.core_type = #tpu.core_type<tc>, window_params = [{transform_indices = @transform_0, window_bounds = array<i64: 1, 8, 32>}, {pipeline_mode = #tpu.pipeline_mode<synchronous>, transform_indices = @transform_1, window_bounds = array<i64: 32, 32>}, {pipeline_mode = #tpu.pipeline_mode<synchronous>, transform_indices = @transform_2, window_bounds = array<i64: 1, 32>}, {pipeline_mode = #tpu.pipeline_mode<synchronous>, transform_indices = @transform_3, window_bounds = array<i64: 32, 32>}, {pipeline_mode = #tpu.pipeline_mode<synchronous>, transform_indices = @transform_4, window_bounds = array<i64: 1, 32>}, {pipeline_mode = #tpu.pipeline_mode<synchronous>, transform_indices = @transform_5, window_bounds = array<i64: 32, 32>}, {pipeline_mode = #tpu.pipeline_mode<synchronous>, transform_indices = @transform_6, window_bounds = array<i64: 1, 32>}, {pipeline_mode = #tpu.pipeline_mode<synchronous>, transform_indices = @transform_7, window_bounds = array<i64: 32, 32>}, {pipeline_mode = #tpu.pipeline_mode<synchronous>, transform_indices = @transform_8, window_bounds = array<i64: 1, 32>}, {pipeline_mode = #tpu.pipeline_mode<synchronous>, transform_indices = @transform_9, window_bounds = array<i64: 32, 64>}, {pipeline_mode = #tpu.pipeline_mode<synchronous>, transform_indices = @transform_10, window_bounds = array<i64: 1, 64>}, {pipeline_mode = #tpu.pipeline_mode<synchronous>, transform_indices = @transform_11, window_bounds = array<i64: 64, 32>}, {pipeline_mode = #tpu.pipeline_mode<synchronous>, transform_indices = @transform_12, window_bounds = array<i64: 1, 32>}, {pipeline_mode = #tpu.pipeline_mode<synchronous>, transform_indices = @transform_13, window_bounds = array<i64: 1, 32>}, {pipeline_mode = #tpu.pipeline_mode<synchronous>, transform_indices = @transform_14, window_bounds = array<i64: 1, 32>}, {pipeline_mode = #tpu.pipeline_mode<synchronous>, transform_indices = @transform_15, window_bounds = array<i64: 1, 32>}, {pipeline_mode = #tpu.pipeline_mode<synchronous>, transform_indices = @transform_16, window_bounds = array<i64: 1, 32>}, {transform_indices = @transform_17, window_bounds = array<i64: 1, 8, 32>}]} {
    %c0 = arith.constant 0 : index
    %c0_0 = arith.constant 0 : index
    %c0_1 = arith.constant 0 : index
    %0 = vector.load %arg1[%c0, %c0_0, %c0_1] : memref<1x8x32xf32, #tpu.memory_space<vmem>>, vector<1x8x32xf32>
    %1 = vector.shape_cast %0 : vector<1x8x32xf32> to vector<8x32xf32>
    %2 = arith.truncf %1 : vector<8x32xf32> to vector<8x32xbf16>
    %c0_2 = arith.constant 0 : index
    %c0_3 = arith.constant 0 : index
    %3 = vector.load %arg2[%c0_2, %c0_3] : memref<32x32xbf16, #tpu.memory_space<vmem>>, vector<32x32xbf16>
    %cst = arith.constant dense<0.000000e+00> : vector<8x32xf32>
    %4 = tpu.matmul %2, %3, %cst {dimension_numbers = #tpu.dot_dimension_numbers<[1], [0], [0], [1], [0, 0, 1, 1], [], []>} : vector<8x32xbf16>, vector<32x32xbf16>, vector<8x32xf32> -> vector<8x32xf32>
    %c0_4 = arith.constant 0 : index
    %c0_5 = arith.constant 0 : index
    %5 = vector.load %arg3[%c0_4, %c0_5] : memref<1x32xf32, #tpu.memory_space<vmem>>, vector<1x32xf32>
    %6 = vector.broadcast %5 : vector<1x32xf32> to vector<8x32xf32>
    %7 = arith.addf %4, %6 : vector<8x32xf32>
    %cst_6 = arith.constant 0.353553385 : f32
    %8 = vector.broadcast %cst_6 : f32 to vector<8x32xf32>
    %9 = arith.mulf %7, %8 : vector<8x32xf32>
    %10 = arith.truncf %9 : vector<8x32xf32> to vector<8x32xbf16>
    %c0_7 = arith.constant 0 : index
    %c0_8 = arith.constant 0 : index
    %11 = vector.load %arg4[%c0_7, %c0_8] : memref<32x32xbf16, #tpu.memory_space<vmem>>, vector<32x32xbf16>
    %cst_9 = arith.constant dense<0.000000e+00> : vector<8x32xf32>
    %12 = tpu.matmul %2, %11, %cst_9 {dimension_numbers = #tpu.dot_dimension_numbers<[1], [0], [0], [1], [0, 0, 1, 1], [], []>} : vector<8x32xbf16>, vector<32x32xbf16>, vector<8x32xf32> -> vector<8x32xf32>
    %c0_10 = arith.constant 0 : index
    %c0_11 = arith.constant 0 : index
    %13 = vector.load %arg5[%c0_10, %c0_11] : memref<1x32xf32, #tpu.memory_space<vmem>>, vector<1x32xf32>
    %14 = vector.broadcast %13 : vector<1x32xf32> to vector<8x32xf32>
    %15 = arith.addf %12, %14 : vector<8x32xf32>
    %16 = arith.truncf %15 : vector<8x32xf32> to vector<8x32xbf16>
    %c0_12 = arith.constant 0 : index
    %c0_13 = arith.constant 0 : index
    %17 = vector.load %arg6[%c0_12, %c0_13] : memref<32x32xbf16, #tpu.memory_space<vmem>>, vector<32x32xbf16>
    %cst_14 = arith.constant dense<0.000000e+00> : vector<8x32xf32>
    %18 = tpu.matmul %2, %17, %cst_14 {dimension_numbers = #tpu.dot_dimension_numbers<[1], [0], [0], [1], [0, 0, 1, 1], [], []>} : vector<8x32xbf16>, vector<32x32xbf16>, vector<8x32xf32> -> vector<8x32xf32>
    %c0_15 = arith.constant 0 : index
    %c0_16 = arith.constant 0 : index
    %19 = vector.load %arg7[%c0_15, %c0_16] : memref<1x32xf32, #tpu.memory_space<vmem>>, vector<1x32xf32>
    %20 = vector.broadcast %19 : vector<1x32xf32> to vector<8x32xf32>
    %21 = arith.addf %18, %20 : vector<8x32xf32>
    %22 = arith.truncf %21 : vector<8x32xf32> to vector<8x32xbf16>
    %23 = vector.extract_strided_slice %10 {offsets = [0, 0], sizes = [8, 8], strides = [1, 1]} : vector<8x32xbf16> to vector<8x8xbf16>
    %24 = vector.extract_strided_slice %10 {offsets = [0, 8], sizes = [8, 8], strides = [1, 1]} : vector<8x32xbf16> to vector<8x8xbf16>
    %25 = vector.extract_strided_slice %10 {offsets = [0, 16], sizes = [8, 8], strides = [1, 1]} : vector<8x32xbf16> to vector<8x8xbf16>
    %26 = vector.extract_strided_slice %10 {offsets = [0, 24], sizes = [8, 8], strides = [1, 1]} : vector<8x32xbf16> to vector<8x8xbf16>
    %27 = tpu.concatenate %23, %24, %25, %26 in 0 : vector<8x8xbf16>, vector<8x8xbf16>, vector<8x8xbf16>, vector<8x8xbf16> -> vector<32x8xbf16>
    %28 = vector.shape_cast %27 : vector<32x8xbf16> to vector<4x8x8xbf16>
    %29 = vector.extract_strided_slice %16 {offsets = [0, 0], sizes = [8, 8], strides = [1, 1]} : vector<8x32xbf16> to vector<8x8xbf16>
    %30 = vector.extract_strided_slice %16 {offsets = [0, 8], sizes = [8, 8], strides = [1, 1]} : vector<8x32xbf16> to vector<8x8xbf16>
    %31 = vector.extract_strided_slice %16 {offsets = [0, 16], sizes = [8, 8], strides = [1, 1]} : vector<8x32xbf16> to vector<8x8xbf16>
    %32 = vector.extract_strided_slice %16 {offsets = [0, 24], sizes = [8, 8], strides = [1, 1]} : vector<8x32xbf16> to vector<8x8xbf16>
    %33 = tpu.concatenate %29, %30, %31, %32 in 0 : vector<8x8xbf16>, vector<8x8xbf16>, vector<8x8xbf16>, vector<8x8xbf16> -> vector<32x8xbf16>
    %34 = vector.shape_cast %33 : vector<32x8xbf16> to vector<4x8x8xbf16>
    %35 = vector.extract_strided_slice %22 {offsets = [0, 0], sizes = [8, 8], strides = [1, 1]} : vector<8x32xbf16> to vector<8x8xbf16>
    %36 = vector.extract_strided_slice %22 {offsets = [0, 8], sizes = [8, 8], strides = [1, 1]} : vector<8x32xbf16> to vector<8x8xbf16>
    %37 = vector.extract_strided_slice %22 {offsets = [0, 16], sizes = [8, 8], strides = [1, 1]} : vector<8x32xbf16> to vector<8x8xbf16>
    %38 = vector.extract_strided_slice %22 {offsets = [0, 24], sizes = [8, 8], strides = [1, 1]} : vector<8x32xbf16> to vector<8x8xbf16>
    %39 = tpu.concatenate %35, %36, %37, %38 in 0 : vector<8x8xbf16>, vector<8x8xbf16>, vector<8x8xbf16>, vector<8x8xbf16> -> vector<32x8xbf16>
    %40 = vector.shape_cast %39 : vector<32x8xbf16> to vector<4x8x8xbf16>
    %cst_17 = arith.constant 0xFF800000 : f32
    %41 = vector.broadcast %cst_17 : f32 to vector<4x8x1xf32>
    %cst_18 = arith.constant 0.000000e+00 : f32
    %42 = vector.broadcast %cst_18 : f32 to vector<4x8x1xf32>
    %cst_19 = arith.constant 0.000000e+00 : f32
    %43 = vector.broadcast %cst_19 : f32 to vector<4x8x8xf32>
    "tpu.trace_start"() <{level = 10 : i32, message = "bqd,bkd->bqk"}> : () -> ()
    %cst_20 = arith.constant dense<0.000000e+00> : vector<4x8x8xf32>
    %44 = tpu.matmul %28, %34, %cst_20 {dimension_numbers = #tpu.dot_dimension_numbers<[2], [2], [1], [1], [0, 0, 0, 1, 1, 1], [0], [0]>} : vector<4x8x8xbf16>, vector<4x8x8xbf16>, vector<4x8x8xf32> -> vector<4x8x8xf32>
    "tpu.trace_stop"() : () -> ()
    %cst_21 = arith.constant dense<0xFF800000> : vector<4x8xf32>
    %45 = vector.multi_reduction <maximumf>, %44, %cst_21 [2] : vector<4x8x8xf32> to vector<4x8xf32>
    %46 = vector.shape_cast %45 : vector<4x8xf32> to vector<4x8x1xf32>
    %47 = arith.maximumf %41, %46 : vector<4x8x1xf32>
    %48 = arith.subf %41, %47 : vector<4x8x1xf32>
    %49 = math.exp %48 : vector<4x8x1xf32>
    %50 = vector.broadcast %47 : vector<4x8x1xf32> to vector<4x8x8xf32>
    %51 = arith.subf %44, %50 : vector<4x8x8xf32>
    %52 = math.exp %51 : vector<4x8x8xf32>
    %53 = arith.mulf %49, %42 : vector<4x8x1xf32>
    %cst_22 = arith.constant dense<0.000000e+00> : vector<4x8xf32>
    %54 = vector.multi_reduction <add>, %52, %cst_22 [2] : vector<4x8x8xf32> to vector<4x8xf32>
    %55 = vector.shape_cast %54 : vector<4x8xf32> to vector<4x8x1xf32>
    %56 = arith.addf %53, %55 : vector<4x8x1xf32>
    %57 = vector.broadcast %49 : vector<4x8x1xf32> to vector<4x8x8xf32>
    %58 = arith.mulf %57, %43 : vector<4x8x8xf32>
    %59 = arith.truncf %52 : vector<4x8x8xf32> to vector<4x8x8xbf16>
    "tpu.trace_start"() <{level = 10 : i32, message = "bqk,bkd->bqd"}> : () -> ()
    %cst_23 = arith.constant dense<0.000000e+00> : vector<4x8x8xf32>
    %60 = tpu.matmul %59, %40, %cst_23 {dimension_numbers = #tpu.dot_dimension_numbers<[2], [1], [1], [2], [0, 0, 0, 1, 1, 2], [0], [0]>} : vector<4x8x8xbf16>, vector<4x8x8xbf16>, vector<4x8x8xf32> -> vector<4x8x8xf32>
    "tpu.trace_stop"() : () -> ()
    %61 = arith.addf %58, %60 : vector<4x8x8xf32>
    %62 = tpu.reciprocal %56 {approx = true} : vector<4x8x1xf32> -> vector<4x8x1xf32>
    %63 = vector.broadcast %62 : vector<4x8x1xf32> to vector<4x8x8xf32>
    %64 = arith.mulf %61, %63 : vector<4x8x8xf32>
    %65 = arith.truncf %64 : vector<4x8x8xf32> to vector<4x8x8xbf16>
    %66 = vector.extract_strided_slice %65 {offsets = [0, 0, 0], sizes = [1, 8, 8], strides = [1, 1, 1]} : vector<4x8x8xbf16> to vector<1x8x8xbf16>
    %67 = vector.shape_cast %66 : vector<1x8x8xbf16> to vector<8x8xbf16>
    %68 = vector.extract_strided_slice %65 {offsets = [1, 0, 0], sizes = [1, 8, 8], strides = [1, 1, 1]} : vector<4x8x8xbf16> to vector<1x8x8xbf16>
    %69 = vector.shape_cast %68 : vector<1x8x8xbf16> to vector<8x8xbf16>
    %70 = vector.extract_strided_slice %65 {offsets = [2, 0, 0], sizes = [1, 8, 8], strides = [1, 1, 1]} : vector<4x8x8xbf16> to vector<1x8x8xbf16>
    %71 = vector.shape_cast %70 : vector<1x8x8xbf16> to vector<8x8xbf16>
    %72 = vector.extract_strided_slice %65 {offsets = [3, 0, 0], sizes = [1, 8, 8], strides = [1, 1, 1]} : vector<4x8x8xbf16> to vector<1x8x8xbf16>
    %73 = vector.shape_cast %72 : vector<1x8x8xbf16> to vector<8x8xbf16>
    %74 = tpu.concatenate %67, %69, %71, %73 in 1 : vector<8x8xbf16>, vector<8x8xbf16>, vector<8x8xbf16>, vector<8x8xbf16> -> vector<8x32xbf16>
    %c0_24 = arith.constant 0 : index
    %c0_25 = arith.constant 0 : index
    %75 = vector.load %arg8[%c0_24, %c0_25] : memref<32x32xbf16, #tpu.memory_space<vmem>>, vector<32x32xbf16>
    %cst_26 = arith.constant dense<0.000000e+00> : vector<8x32xf32>
    %76 = tpu.matmul %74, %75, %cst_26 {dimension_numbers = #tpu.dot_dimension_numbers<[1], [0], [0], [1], [0, 0, 1, 1], [], []>} : vector<8x32xbf16>, vector<32x32xbf16>, vector<8x32xf32> -> vector<8x32xf32>
    %c0_27 = arith.constant 0 : index
    %c0_28 = arith.constant 0 : index
    %77 = vector.load %arg9[%c0_27, %c0_28] : memref<1x32xf32, #tpu.memory_space<vmem>>, vector<1x32xf32>
    %78 = vector.broadcast %77 : vector<1x32xf32> to vector<8x32xf32>
    %79 = arith.addf %76, %78 : vector<8x32xf32>
    %80 = arith.addf %1, %79 : vector<8x32xf32>
    %cst_29 = arith.constant dense<0.000000e+00> : vector<8xf32>
    %81 = vector.multi_reduction <add>, %80, %cst_29 [1] : vector<8x32xf32> to vector<8xf32>
    %82 = vector.shape_cast %81 : vector<8xf32> to vector<8x1xf32>
    %cst_30 = arith.constant 3.200000e+01 : f32
    %83 = vector.broadcast %cst_30 : f32 to vector<8x1xf32>
    %84 = arith.divf %82, %83 : vector<8x1xf32>
    %85 = vector.broadcast %84 : vector<8x1xf32> to vector<8x32xf32>
    %86 = arith.subf %80, %85 : vector<8x32xf32>
    %87 = arith.mulf %86, %86 : vector<8x32xf32>
    %cst_31 = arith.constant dense<0.000000e+00> : vector<8xf32>
    %88 = vector.multi_reduction <add>, %87, %cst_31 [1] : vector<8x32xf32> to vector<8xf32>
    %89 = vector.shape_cast %88 : vector<8xf32> to vector<8x1xf32>
    %cst_32 = arith.constant 3.200000e+01 : f32
    %90 = vector.broadcast %cst_32 : f32 to vector<8x1xf32>
    %91 = arith.divf %89, %90 : vector<8x1xf32>
    %92 = vector.broadcast %84 : vector<8x1xf32> to vector<8x32xf32>
    %93 = arith.subf %80, %92 : vector<8x32xf32>
    %cst_33 = arith.constant 9.99999974E-6 : f32
    %94 = vector.broadcast %cst_33 : f32 to vector<8x1xf32>
    %95 = arith.addf %91, %94 : vector<8x1xf32>
    %96 = math.rsqrt %95 : vector<8x1xf32>
    %97 = vector.broadcast %96 : vector<8x1xf32> to vector<8x32xf32>
    %98 = arith.mulf %93, %97 : vector<8x32xf32>
    %c0_34 = arith.constant 0 : index
    %c0_35 = arith.constant 0 : index
    %99 = vector.load %arg14[%c0_34, %c0_35] : memref<1x32xf32, #tpu.memory_space<vmem>>, vector<1x32xf32>
    %100 = vector.broadcast %99 : vector<1x32xf32> to vector<8x32xf32>
    %101 = arith.mulf %98, %100 : vector<8x32xf32>
    %c0_36 = arith.constant 0 : index
    %c0_37 = arith.constant 0 : index
    %102 = vector.load %arg15[%c0_36, %c0_37] : memref<1x32xf32, #tpu.memory_space<vmem>>, vector<1x32xf32>
    %103 = vector.broadcast %102 : vector<1x32xf32> to vector<8x32xf32>
    %104 = arith.addf %101, %103 : vector<8x32xf32>
    %105 = arith.truncf %104 : vector<8x32xf32> to vector<8x32xbf16>
    %c0_38 = arith.constant 0 : index
    %c0_39 = arith.constant 0 : index
    %106 = vector.load %arg10[%c0_38, %c0_39] : memref<32x64xbf16, #tpu.memory_space<vmem>>, vector<32x64xbf16>
    %cst_40 = arith.constant dense<0.000000e+00> : vector<8x64xf32>
    %107 = tpu.matmul %105, %106, %cst_40 {dimension_numbers = #tpu.dot_dimension_numbers<[1], [0], [0], [1], [0, 0, 1, 1], [], []>} : vector<8x32xbf16>, vector<32x64xbf16>, vector<8x64xf32> -> vector<8x64xf32>
    %c0_41 = arith.constant 0 : index
    %c0_42 = arith.constant 0 : index
    %108 = vector.load %arg11[%c0_41, %c0_42] : memref<1x64xf32, #tpu.memory_space<vmem>>, vector<1x64xf32>
    %109 = vector.broadcast %108 : vector<1x64xf32> to vector<8x64xf32>
    %110 = arith.addf %107, %109 : vector<8x64xf32>
    %cst_43 = arith.constant 0.000000e+00 : f32
    %111 = vector.broadcast %cst_43 : f32 to vector<8x64xf32>
    %112 = arith.maximumf %110, %111 : vector<8x64xf32>
    %113 = arith.truncf %112 : vector<8x64xf32> to vector<8x64xbf16>
    %c0_44 = arith.constant 0 : index
    %c0_45 = arith.constant 0 : index
    %114 = vector.load %arg12[%c0_44, %c0_45] : memref<64x32xbf16, #tpu.memory_space<vmem>>, vector<64x32xbf16>
    %cst_46 = arith.constant dense<0.000000e+00> : vector<8x32xf32>
    %115 = tpu.matmul %113, %114, %cst_46 {dimension_numbers = #tpu.dot_dimension_numbers<[1], [0], [0], [1], [0, 0, 1, 1], [], []>} : vector<8x64xbf16>, vector<64x32xbf16>, vector<8x32xf32> -> vector<8x32xf32>
    %c0_47 = arith.constant 0 : index
    %c0_48 = arith.constant 0 : index
    %116 = vector.load %arg13[%c0_47, %c0_48] : memref<1x32xf32, #tpu.memory_space<vmem>>, vector<1x32xf32>
    %117 = vector.broadcast %116 : vector<1x32xf32> to vector<8x32xf32>
    %118 = arith.addf %115, %117 : vector<8x32xf32>
    %119 = arith.addf %104, %118 : vector<8x32xf32>
    %cst_49 = arith.constant dense<0.000000e+00> : vector<8xf32>
    %120 = vector.multi_reduction <add>, %119, %cst_49 [1] : vector<8x32xf32> to vector<8xf32>
    %121 = vector.shape_cast %120 : vector<8xf32> to vector<8x1xf32>
    %cst_50 = arith.constant 3.200000e+01 : f32
    %122 = vector.broadcast %cst_50 : f32 to vector<8x1xf32>
    %123 = arith.divf %121, %122 : vector<8x1xf32>
    %124 = vector.broadcast %123 : vector<8x1xf32> to vector<8x32xf32>
    %125 = arith.subf %119, %124 : vector<8x32xf32>
    %126 = arith.mulf %125, %125 : vector<8x32xf32>
    %cst_51 = arith.constant dense<0.000000e+00> : vector<8xf32>
    %127 = vector.multi_reduction <add>, %126, %cst_51 [1] : vector<8x32xf32> to vector<8xf32>
    %128 = vector.shape_cast %127 : vector<8xf32> to vector<8x1xf32>
    %cst_52 = arith.constant 3.200000e+01 : f32
    %129 = vector.broadcast %cst_52 : f32 to vector<8x1xf32>
    %130 = arith.divf %128, %129 : vector<8x1xf32>
    %131 = vector.broadcast %123 : vector<8x1xf32> to vector<8x32xf32>
    %132 = arith.subf %119, %131 : vector<8x32xf32>
    %cst_53 = arith.constant 9.99999974E-6 : f32
    %133 = vector.broadcast %cst_53 : f32 to vector<8x1xf32>
    %134 = arith.addf %130, %133 : vector<8x1xf32>
    %135 = math.rsqrt %134 : vector<8x1xf32>
    %136 = vector.broadcast %135 : vector<8x1xf32> to vector<8x32xf32>
    %137 = arith.mulf %132, %136 : vector<8x32xf32>
    %c0_54 = arith.constant 0 : index
    %c0_55 = arith.constant 0 : index
    %138 = vector.load %arg16[%c0_54, %c0_55] : memref<1x32xf32, #tpu.memory_space<vmem>>, vector<1x32xf32>
    %139 = vector.broadcast %138 : vector<1x32xf32> to vector<8x32xf32>
    %140 = arith.mulf %137, %139 : vector<8x32xf32>
    %c0_56 = arith.constant 0 : index
    %c0_57 = arith.constant 0 : index
    %141 = vector.load %arg17[%c0_56, %c0_57] : memref<1x32xf32, #tpu.memory_space<vmem>>, vector<1x32xf32>
    %142 = vector.broadcast %141 : vector<1x32xf32> to vector<8x32xf32>
    %143 = arith.addf %140, %142 : vector<8x32xf32>
    %144 = vector.shape_cast %143 : vector<8x32xf32> to vector<1x8x32xf32>
    %c0_58 = arith.constant 0 : index
    %c0_59 = arith.constant 0 : index
    %c0_60 = arith.constant 0 : index
    %145 = vector.load %arg18[%c0_58, %c0_59, %c0_60] : memref<1x8x32xf32, #tpu.memory_space<vmem>>, vector<1x8x32xf32>
    tpu.vector_store %arg18[%c0_58, %c0_59, %c0_60], %144 {strides = array<i32>} : memref<1x8x32xf32, #tpu.memory_space<vmem>>, vector<1x8x32xf32>,
    return
  }
  func.func @transform_0(%arg0: i32) -> (i32, i32, i32) {
    %c0_i32 = arith.constant 0 : i32
    %c0_i32_0 = arith.constant 0 : i32
    %c0_i32_1 = arith.constant 0 : i32
    return %arg0, %c0_i32, %c0_i32_0 : i32, i32, i32
  }
  func.func @transform_1(%arg0: i32) -> (i32, i32) {
    %c0_i32 = arith.constant 0 : i32
    %c0_i32_0 = arith.constant 0 : i32
    %c0_i32_1 = arith.constant 0 : i32
    return %c0_i32, %c0_i32_0 : i32, i32
  }
  func.func @transform_2(%arg0: i32) -> (i32, i32) {
    %c0_i32 = arith.constant 0 : i32
    %c0_i32_0 = arith.constant 0 : i32
    %c0_i32_1 = arith.constant 0 : i32
    return %c0_i32, %c0_i32_0 : i32, i32
  }
  func.func @transform_3(%arg0: i32) -> (i32, i32) {
    %c0_i32 = arith.constant 0 : i32
    %c0_i32_0 = arith.constant 0 : i32
    %c0_i32_1 = arith.constant 0 : i32
    return %c0_i32, %c0_i32_0 : i32, i32
  }
  func.func @transform_4(%arg0: i32) -> (i32, i32) {
    %c0_i32 = arith.constant 0 : i32
    %c0_i32_0 = arith.constant 0 : i32
    %c0_i32_1 = arith.constant 0 : i32
    return %c0_i32, %c0_i32_0 : i32, i32
  }
  func.func @transform_5(%arg0: i32) -> (i32, i32) {
    %c0_i32 = arith.constant 0 : i32
    %c0_i32_0 = arith.constant 0 : i32
    %c0_i32_1 = arith.constant 0 : i32
    return %c0_i32, %c0_i32_0 : i32, i32
  }
  func.func @transform_6(%arg0: i32) -> (i32, i32) {
    %c0_i32 = arith.constant 0 : i32
    %c0_i32_0 = arith.constant 0 : i32
    %c0_i32_1 = arith.constant 0 : i32
    return %c0_i32, %c0_i32_0 : i32, i32
  }
  func.func @transform_7(%arg0: i32) -> (i32, i32) {
    %c0_i32 = arith.constant 0 : i32
    %c0_i32_0 = arith.constant 0 : i32
    %c0_i32_1 = arith.constant 0 : i32
    return %c0_i32, %c0_i32_0 : i32, i32
  }
  func.func @transform_8(%arg0: i32) -> (i32, i32) {
    %c0_i32 = arith.constant 0 : i32
    %c0_i32_0 = arith.constant 0 : i32
    %c0_i32_1 = arith.constant 0 : i32
    return %c0_i32, %c0_i32_0 : i32, i32
  }
  func.func @transform_9(%arg0: i32) -> (i32, i32) {
    %c0_i32 = arith.constant 0 : i32
    %c0_i32_0 = arith.constant 0 : i32
    %c0_i32_1 = arith.constant 0 : i32
    return %c0_i32, %c0_i32_0 : i32, i32
  }
  func.func @transform_10(%arg0: i32) -> (i32, i32) {
    %c0_i32 = arith.constant 0 : i32
    %c0_i32_0 = arith.constant 0 : i32
    %c0_i32_1 = arith.constant 0 : i32
    return %c0_i32, %c0_i32_0 : i32, i32
  }
  func.func @transform_11(%arg0: i32) -> (i32, i32) {
    %c0_i32 = arith.constant 0 : i32
    %c0_i32_0 = arith.constant 0 : i32
    %c0_i32_1 = arith.constant 0 : i32
    return %c0_i32, %c0_i32_0 : i32, i32
  }
  func.func @transform_12(%arg0: i32) -> (i32, i32) {
    %c0_i32 = arith.constant 0 : i32
    %c0_i32_0 = arith.constant 0 : i32
    %c0_i32_1 = arith.constant 0 : i32
    return %c0_i32, %c0_i32_0 : i32, i32
  }
  func.func @transform_13(%arg0: i32) -> (i32, i32) {
    %c0_i32 = arith.constant 0 : i32
    %c0_i32_0 = arith.constant 0 : i32
    %c0_i32_1 = arith.constant 0 : i32
    return %c0_i32, %c0_i32_0 : i32, i32
  }
  func.func @transform_14(%arg0: i32) -> (i32, i32) {
    %c0_i32 = arith.constant 0 : i32
    %c0_i32_0 = arith.constant 0 : i32
    %c0_i32_1 = arith.constant 0 : i32
    return %c0_i32, %c0_i32_0 : i32, i32
  }
  func.func @transform_15(%arg0: i32) -> (i32, i32) {
    %c0_i32 = arith.constant 0 : i32
    %c0_i32_0 = arith.constant 0 : i32
    %c0_i32_1 = arith.constant 0 : i32
    return %c0_i32, %c0_i32_0 : i32, i32
  }
  func.func @transform_16(%arg0: i32) -> (i32, i32) {
    %c0_i32 = arith.constant 0 : i32
    %c0_i32_0 = arith.constant 0 : i32
    %c0_i32_1 = arith.constant 0 : i32
    return %c0_i32, %c0_i32_0 : i32, i32
  }
  func.func @transform_17(%arg0: i32) -> (i32, i32, i32) {
    %c0_i32 = arith.constant 0 : i32
    %c0_i32_0 = arith.constant 0 : i32
    %c0_i32_1 = arith.constant 0 : i32
    return %arg0, %c0_i32, %c0_i32_0 : i32, i32, i32
  }
}

</mosaic_0001>

<bundles_post_ra>
// kernel: encoder_forward.2
= control target key start
LH: loop header
LB: loop body
LE: loop exit
PB: predicated region body
PF: predicated region fallthrough
CT: control target
= control target key end

     0   :  { %s2571_s0 = inlined_call_operand.vmem [shape: f32[2,8,32], index: 0, kind: input, shape index: {}]   ;;  %s2572_s1 = inlined_call_operand.vmem [shape: bf16[32,32], index: 1, kind: input, shape index: {}]   ;;  %s2573_s2 = inlined_call_operand.vmem [shape: f32[1,32], index: 2, kind: input, shape index: {}]   ;;  %s2574_s3 = inlined_call_operand.vmem [shape: bf16[32,32], index: 3, kind: input, shape index: {}]   ;;  %s2575_s4 = inlined_call_operand.vmem [shape: f32[1,32], index: 4, kind: input, shape index: {}]   ;;  %s2576_s5 = inlined_call_operand.hbm [shape: bf16[32,32], index: 5, kind: input, shape index: {}]   ;;  %s2577_s6 = inlined_call_operand.hbm [shape: f32[1,32], index: 6, kind: input, shape index: {}]   ;;  %s2578_s7 = inlined_call_operand.hbm [shape: bf16[32,32], index: 7, kind: input, shape index: {}]   ;;  %s2579_s8 = inlined_call_operand.hbm [shape: f32[1,32], index: 8, kind: input, shape index: {}]   ;;  %s2580_s9 = inlined_call_operand.vmem [shape: bf16[32,64], index: 9, kind: input, shape index: {}]   ;;  %s2581_s10 = inlined_call_operand.vmem [shape: f32[1,64], index: 10, kind: input, shape index: {}]   ;;  %s2582_s11 = inlined_call_operand.vmem [shape: bf16[64,32], index: 11, kind: input, shape index: {}]   ;;  %s2583_s12 = inlined_call_operand.vmem [shape: f32[1,32], index: 12, kind: input, shape index: {}]   ;;  %s2584_s13 = inlined_call_operand.vmem [shape: f32[1,32], index: 13, kind: input, shape index: {}]   ;;  %s2585_s14 = inlined_call_operand.vmem [shape: f32[1,32], index: 14, kind: input, shape index: {}]   ;;  %s2586_s15 = inlined_call_operand.vmem [shape: f32[1,32], index: 15, kind: input, shape index: {}]   ;;  %s2587_s16 = inlined_call_operand.vmem [shape: f32[1,32], index: 16, kind: input, shape index: {}]   ;;  %s2588_s17 = inlined_call_operand.vmem [shape: f32[2,8,32], index: 17, kind: output, shape index: {}]  }
   0x1   :  { %2593 = sst [smem:[#allocation13_spill]] %s2571_s0 }
   0x2   :  { %2594 = sst [smem:[#allocation14_spill]] %s2572_s1 }
   0x3   :  { %2595 = sst [smem:[#allocation15_spill]] %s2577_s6 }
   0x4   :  { %2596 = sst [smem:[#allocation16_spill]] %s2587_s16 }
   0x5   :  { %2597 = sst [smem:[#allocation17_spill]] %s2588_s17 }
   0x6   :  { %22 = vsyncpa [#allocation3], 0 }
   0x7   :  { %23 = vsyncpa [#allocation5], 0 }
   0x8   :  { %24 = vsyncpa [#allocation8], 0  ;;  %s2248_s24 = smov 0  }
   0x9 LB: > { %2598 = sst [smem:[#allocation12_spill]] %s2142_s24  ;;  %s2144_s25 = smov [#allocation4]   ;;  %s2142_s24 = sphi %s2248_s24, %s30_s24  }
   0xa   : > { %s461_s26 = sshll.u32 %s2144_s25, 4  ;;  %s2254_s27 = sadd.s32 4294967295, %s2142_s24   ;;  %s2259_s26 = int_to_ptr.vmem [resolvable:$true] %s461_s26 }
   0xb   : > { %p1710_p0 = scmp.ge.s32.totalorder %s2142_s24, 1  ;;  %p423_p1 = scmp.lt.s32.totalorder %s2142_s24, 3 }
   0xc   : > { %p2591_p2 = scmp.eq.s32.totalorder %s2254_s27, 0  ;;  %s2145_s29 = smov [#allocation2]  }
   0xd   : > { %p2261_p3 = pnand %p1710_p0, %p423_p1  ;;  %s447_s0 = sshll.u32 %s2145_s29, 4  ;;  %s2267_s0 = int_to_ptr.vmem [resolvable:$true] %s447_s0 }
   0xe   : > { %s2146_s18 = smov [#allocation6]   ;;  %s2147_s1 = smov [#allocation7]  }
   0xf   : > { %s2599_s28 = scalar_select %p2261_p3, 1, 0 }
  0x10   : > { %p1927_p4 = pneg %p2261_p3  ;;  %s471_s19 = sshll.u32 %s2146_s18, 4  ;;  %s2275_s19 = int_to_ptr.vmem [resolvable:$true] %s471_s19 }
  0x11   : > { %s2277_s20 = sshll.u32 %s2147_s1, 4  ;;  %s2601_s6 = sld [smem:[#allocation15_spill]]  ;;  %s486_s20 = int_to_ptr.vmem [resolvable:$true] %s2277_s20 }
  0x12   : > { %p2271_p5 = pnand %p2591_p2, %p1927_p4 }
  0x14   : > { %p2287_p7 = pneg %p2271_p5 }
  0x17   : > { %s2012_s23 = scalar_lea.hbm %s2601_s6, 16 }
  0x18   : > { %p2013_p6 = scmp.ne.s32.totalorder %s2601_s6, %s2012_s23  ;;  %p2019_p10 = scmp.lt.u32.totalorder %s2012_s23, %s2601_s6 }
  0x1a   : > { %p2015_p8 = pnand %p2287_p7, %p2013_p6 }
  0x1c   : > { %p2016_p9 = pneg %p2015_p8 }
  0x1e   : > { %p2021_p11 = pnand %p2019_p10, %p2016_p9 }
  0x20   : > { %2024 = shalt.err (!%p2021_p11)
}
  0x21   : > { %s2025_s21 = scalar_lea.vmem %s2259_s26, 16  ;;  %s2032_s22 = scalar_lea.vmem %s2259_s26, 32 }
  0x22   : > { %p2026_p12 = scmp.ne.s32.totalorder %s2259_s26, %s2025_s21  ;;  %p2033_p1 = scmp.lt.s32.totalorder %s2259_s26, %s2259_s26 }
  0x23   : > { %p2034_p4 = scmp.lt.s32.totalorder %s2032_s22, %s2025_s21 }
  0x24   : > { %p2028_p13 = pnand %p2026_p12, %p2287_p7 }
  0x25   : > { %p2035_p6 = por %p2034_p4, %p2033_p1 }
  0x26   : > { %p2029_p0 = pneg %p2028_p13 }
  0x28   : > { %p2036_p8 = pnand %p2035_p6, %p2029_p0 }
  0x2a   : > { %2039 = shalt.err (!%p2036_p8)
}
  0x2b   : > { %1933 = dma.hbm_to_vmem [thread:$0]  (!%p2271_p5), %s2601_s6, 16, %s2259_s26, [#allocation5]  }
  0x2c   : > { %s2040_s1 = scalar_lea.hbm %s2576_s5, 256 }
  0x2d   : > { %p2041_p9 = scmp.ne.s32.totalorder %s2576_s5, %s2040_s1  ;;  %p2047_p12 = scmp.lt.u32.totalorder %s2040_s1, %s2576_s5 }
  0x2f   : > { %p2043_p10 = pnand %p2041_p9, %p2287_p7 }
  0x31   : > { %p2044_p11 = pneg %p2043_p10 }
  0x33   : > { %p2049_p13 = pnand %p2047_p12, %p2044_p11 }
  0x35   : > { %2052 = shalt.err (!%p2049_p13)
}
  0x36   : > { %s2053_s26 = scalar_lea.vmem %s2267_s0, 256  ;;  %p2061_p6 = scmp.lt.s32.totalorder %s2267_s0, %s2267_s0 }
  0x37   : > { %p2054_p0 = scmp.ne.s32.totalorder %s2267_s0, %s2053_s26  ;;  %p2062_p8 = scmp.lt.s32.totalorder %s2053_s26, %s2053_s26 }
  0x39   : > { %p2056_p1 = pnand %p2054_p0, %p2287_p7  ;;  %p2063_p9 = por %p2062_p8, %p2061_p6 }
  0x3b   : > { %p2057_p4 = pneg %p2056_p1 }
  0x3d   : > { %p2064_p10 = pnand %p2063_p9, %p2057_p4 }
  0x3f   : > { %2067 = shalt.err (!%p2064_p10)
}
  0x40   : > { %s2148_s16 = smov 64   ;;  %s2149_s17 = smov 4  }
  0x41   : > { %1930 = dma.hbm_to_vmem [thread:$0]  (!%p2271_p5), %s2576_s5, 256, %s2267_s0, [#allocation3], %s2148_s16, %s2148_s16, %s2149_s17  }
  0x42   : > { %s2068_s1 = scalar_lea.hbm %s2578_s7, 256 }
  0x43   : > { %p2069_p11 = scmp.ne.s32.totalorder %s2578_s7, %s2068_s1  ;;  %p2075_p0 = scmp.lt.u32.totalorder %s2068_s1, %s2578_s7 }
  0x45   : > { %p2071_p12 = pnand %p2069_p11, %p2287_p7 }
  0x47   : > { %p2072_p13 = pneg %p2071_p12 }
  0x49   : > { %p2077_p1 = pnand %p2075_p0, %p2072_p13 }
  0x4b   : > { %2080 = shalt.err (!%p2077_p1)
}
  0x4c   : > { %s2081_s0 = scalar_lea.vmem %s2275_s19, 256  ;;  %p2089_p9 = scmp.lt.s32.totalorder %s2275_s19, %s2275_s19 }
  0x4d   : > { %p2082_p4 = scmp.ne.s32.totalorder %s2275_s19, %s2081_s0  ;;  %p2090_p10 = scmp.lt.s32.totalorder %s2081_s0, %s2081_s0 }
  0x4f   : > { %p2084_p6 = pnand %p2082_p4, %p2287_p7  ;;  %p2091_p11 = por %p2090_p10, %p2089_p9 }
  0x51   : > { %p2085_p8 = pneg %p2084_p6 }
  0x53   : > { %p2092_p12 = pnand %p2091_p11, %p2085_p8 }
  0x55   : > { %2095 = shalt.err (!%p2092_p12)
}
  0x56   : > { %1936 = dma.hbm_to_vmem [thread:$0]  (!%p2271_p5), %s2578_s7, 256, %s2275_s19, [#allocation5], %s2148_s16, %s2148_s16, %s2149_s17  }
  0x57   : > { %s2096_s18 = scalar_lea.hbm %s2579_s8, 16 }
  0x58   : > { %p2097_p13 = scmp.ne.s32.totalorder %s2579_s8, %s2096_s18  ;;  %p2103_p4 = scmp.lt.u32.totalorder %s2096_s18, %s2579_s8 }
  0x5a   : > { %p2099_p0 = pnand %p2097_p13, %p2287_p7 }
  0x5c   : > { %p2100_p1 = pneg %p2099_p0 }
  0x5e   : > { %p2105_p6 = pnand %p2103_p4, %p2100_p1 }
  0x60   : > { %2108 = shalt.err (!%p2105_p6)
}
  0x61   : > { %s2109_s0 = scalar_lea.vmem %s486_s20, 16  ;;  %s2116_s19 = scalar_lea.vmem %s486_s20, 32 }
  0x62   : > { %p2110_p8 = scmp.ne.s32.totalorder %s486_s20, %s2109_s0  ;;  %p2117_p11 = scmp.lt.s32.totalorder %s486_s20, %s486_s20 }
  0x63   : > { %p2118_p12 = scmp.lt.s32.totalorder %s2116_s19, %s2109_s0 }
  0x64   : > { %p2112_p9 = pnand %p2110_p8, %p2287_p7 }
  0x65   : > { %p2119_p2 = por %p2118_p12, %p2117_p11 }
  0x66   : > { %p2113_p10 = pneg %p2112_p9 }
  0x68   : > { %p2120_p3 = pnand %p2119_p2, %p2113_p10 }
  0x6a   : > { %2123 = shalt.err (!%p2120_p3)
}
  0x6b   : > { %1939 = dma.hbm_to_vmem [thread:$0]  (!%p2271_p5), %s2579_s8, 16, %s486_s20, [#allocation8]  }
  0x6c   : > { %p2603_p13 = scmp.ne.s32.totalorder %s2599_s28, 0 }
  0x6d   : > { %p2604_p0 = scmp.eq.s32.totalorder (!%p2603_p13), %s2254_s27, 0 }
  0x6e   : > { %529 = sbr.rel (%p2603_p13) target bundleno = 2476 (0x9ac), region = 88 }
  0x75   : > { %2129 = dma.done.wait (%p2604_p0), [#allocation3], 256   ;;  %p2605_p7 = pmov %p2604_p0 }
  0x76   : > { %p2606_p1 = pmov %p2604_p0 }
  0x77   : > { %2131 = vsyncadd (%p2605_p7), [#allocation3], 4294967040 }
  0x78   : > { %2133 = dma.done.wait (%p2606_p1), [#allocation5], 272   ;;  %p2607_p2 = pmov %p2604_p0 }
  0x79   : > { %p2608_p3 = pmov %p2604_p0 }
  0x7a   : > { %2135 = vsyncadd (%p2607_p2), [#allocation5], 4294967024 }
  0x7b   : > { %2137 = dma.done.wait (%p2608_p3), [#allocation8], 16   ;;  %p2609_p5 = pmov %p2604_p0 }
  0x7c   : > { %p591_p4 = scmp.lt.s32.totalorder %s2254_s27, 1  ;;  %v2150_v0 = vmov 0.0   ;;  %vm2151_vm0 = vmmov 0   ;;  %v1970_v1 = vld [vmem:[%s2574_s3] sm:$0xff]   ;;  %s2610_s23 = sld [smem:[#allocation14_spill]]  ;;  %v1972_v3 = vld [vmem:[%s2574_s3 + $0x8] sm:$0xff]  }
  0x7d   : > { %2139 = vsyncadd (%p2609_p5), [#allocation8], 4294967280  ;;  %1819 = vmatprep.subr.bf16.mxu1 %v2150_v0  ;;  %1811 = vmatprep.subr.bf16.mxu0 %v2150_v0  ;;  %s2611_s18 = sld [smem:[#allocation13_spill]]  ;;  %vm625_vm1 = vcmask 261120   ;;  %v1974_v7 = vld [vmem:[#allocation2] sm:$0xff]   ;;  %v1975_v8 = vld [vmem:[#allocation2 + $0x8] sm:$0xff]  }
  0x7e   : > { %1823 = vmatprep.mubr.msk.bf16.mxu1 %vm2151_vm0, %v2150_v0  ;;  %s2616_s27 = smov (!%p591_p4, %s2254_s27), 1  ;;  %1815 = vmatprep.mubr.msk.bf16.mxu0 %vm2151_vm0, %v2150_v0  ;;  %v1727_v9 = vld [vmem:[%s2575_s4] ss:$0 sm:$0xff]  ;;  %s2152_s30 = smov 112   ;;  %v1731_v26 = vld [vmem:[#allocation4] ss:$0 sm:$0xff] }
  0x7f   : > { %s1721_s24 = sshll.u32 %s2616_s27, 3  ;;  %1820 = vmatpush3.bf16.msra.mxu1 %v1970_v1  ;;  %v1723_v10 = vld [vmem:[%s2573_s2] ss:$0 sm:$0xff]  ;;  %s2153_s20 = smov 120   ;;  %vm807_vm2 = vcmask 1043456   ;;  %vm872_vm3 = vcmask 64512  }
  0x80   : > { %1821 = vmatprep.subr.bf16.mxu1 %v2150_v0  ;;  %s2154_s6 = smov 104   ;;  %s2155_s25 = smov 8   ;;  %vm1329_vm4 = vcmask 130048   ;;  %vm1332_vm5 = vcmask 195584   ;;  %vm1539_vm6 = vcmask 523264  }
  0x81   : > { %s2156_s29 = smov 16  }
  0x82   : > { %v1971_v2 = vld [vmem:[%s2610_s23] sm:$0xff]   ;;  %v1973_v4 = vld [vmem:[%s2610_s23 + $0x8] sm:$0xff]  }
  0x83   : > { %s594_s1 = scalar_lea.vmem %s2611_s18, %s1721_s24  ;;  %1812 = vmatpush3.bf16.msra.mxu0 %v1971_v2  ;;  %1822 = vmatpush3.bf16.msra.mxu1 %v1972_v3  ;;  %s2157_s18 = smov 24  }
  0x84   : > { %1813 = vmatprep.subr.bf16.mxu0 %v2150_v0  ;;  %v2418_v5 = vld [vmem:[%s594_s1] sm:$0xff]  ;;  %1835 = vmatprep.subr.bf16.mxu1 %v2150_v0 }
  0x85   : > { %v601_v6 = vpack.c.bf16 %v2418_v5, %v2418_v5 }
  0x87   : > { %1814 = vmatpush3.bf16.msra.mxu0 %v1973_v4  ;;  %1824 = vmatmul.mubr.msk.bf16.vlgmr.msra.gmra.mrb[0].mxu1 %vm625_vm1, %v601_v6 }
  0x88   : > { %1827 = vmatprep.subr.bf16.mxu0 %v2150_v0  ;;  %1837 = vmatprep.mubr.msk.bf16.mxu1 %vm2151_vm0, %v2150_v0 }
  0x8a   : > { %1816 = vmatmul.mubr.msk.bf16.vlgmr.msra.gmra.mrb[0].mxu0 %vm625_vm1, %v601_v6 }
  0x8b   : > { %1828 = vmatpush3.bf16.msra.mxu0 %v1974_v7  ;;  %1831 = vmatprep.mubr.msk.bf16.mxu0 %vm2151_vm0, %v2150_v0 }
  0x8c   : > { %1829 = vmatprep.subr.bf16.mxu0 %v2150_v0 }
  0x8f   : > { %1830 = vmatpush3.bf16.msra.mxu0 %v1975_v8 }
  0x90   : > { %1841 = vmatprep.subr.bf16.mxu0 %v2150_v0 }
  0x92   : > { %1832 = vmatmul.mubr.msk.bf16.vlgmr.msra.gmra.mrb[4].mxu0 %vm625_vm1, %v601_v6 }
  0x93   : > { %1843 = vmatprep.mubr.msk.bf16.mxu0 %vm2151_vm0, %v2150_v0 }
 0x15a   : > { %v728_v11 = vpop.f32.mrb[0].mxu1 }
 0x15b   : > { %v729_v12 = vadd.f32 %v1727_v9, %v728_v11  ;;  %v1825_v13 = vpop.f32.mrb[1].mxu1 }
 0x15c   : > { %v731_v16 = vpop.f32.mrb[2].mxu1 }
 0x15d   : > { %v663_v14 = vpop.f32.mrb[0].mxu0  ;;  %v734_v18 = vpack.c.bf16 %v729_v12, %v729_v12  ;;  %v1826_v19 = vpop.f32.mrb[3].mxu1 }
 0x15e   : > { %v664_v15 = vadd.f32 %v1723_v10, %v663_v14  ;;  %v1817_v17 = vpop.f32.mrb[1].mxu0 }
 0x15f   : > { %v666_v20 = vpop.f32.mrb[2].mxu0  ;;  %828 = vrot.lane.b32.xlu1 %v734_v18, %s2152_s30  ;;  %v825_v23 = vrot.slane %v734_v18, 4 }
 0x160   : > { %v669_v21 = vmul.f32 0.35355338, %v664_v15  ;;  %v1818_v22 = vpop.f32.mrb[3].mxu0 }
 0x161   : > { %826 = vrot.lane.b32.xlu0 %v825_v23, %s2153_s20 }
 0x162   : > { %v670_v24 = vpack.c.bf16 %v669_v21, %v669_v21 }
 0x163   : > { %830 = vrot.lane.b32.xlu1 %v825_v23, %s2154_s6 }
 0x164   : > { %v800_v25 = vrot.slane %v670_v24, 4 }
 0x165   : > { %v792_v27 = vpop.f32.mrb[4].mxu0 }
 0x166   : > { %801 = vrot.lane.b32.xlu0 %v800_v25, %s2153_s20  ;;  %v793_v28 = vadd.f32 %v1731_v26, %v792_v27  ;;  %v1833_v29 = vpop.f32.mrb[5].mxu0 }
 0x167   : > { %805 = vrot.lane.b32.xlu1 %v800_v25, %s2154_s6  ;;  %v795_v30 = vpop.f32.mrb[6].mxu0 }
 0x168   : > { %v2445_v31 = vpack.c.bf16 %v793_v28, %v793_v28  ;;  %v1834_v32 = vpop.f32.mrb[7].mxu0 }
 0x16a   : > { %803 = vrot.lane.b32.xlu0 %v670_v24, %s2152_s30  ;;  %v849_v33 = vrot.slane %v2445_v31, 4 }
 0x16c   : > { %850 = vrot.lane.b32.xlu1 %v849_v33, %s2153_s20 }
 0x1d1   : > { %v829_v34 = vpop.permute.xlu1 %828 }
 0x1d3   : > { %v827_v35 = vpop.permute.xlu0 %826 }
 0x1d4   : > { %v834_v36 = vsel %vm807_vm2, %v734_v18, %v827_v35 }
 0x1d5   : > { %v1739_v37 = vcombine.low %v834_v36, %v834_v36  ;;  %v1740_v38 = vcombine.high %v834_v36, %v834_v36  ;;  %v831_v39 = vpop.permute.xlu1 %830 }
 0x1d6   : > { %v837_v43 = vsel %vm807_vm2, %v829_v34, %v831_v39 }
 0x1d7   : > { %v877_v41 = vsel %vm872_vm3, %v1739_v37, 0  ;;  %v923_v42 = vsel %vm872_vm3, %v1740_v38, 0  ;;  %v1741_v45 = vcombine.low %v837_v43, %v837_v43  ;;  %v1742_v46 = vcombine.high %v837_v43, %v837_v43 }
 0x1d8   : > { %v802_v40 = vpop.permute.xlu0 %801  ;;  %1836 = vmatpush3.bf16.xpose.msra.mxu1 %v877_v41  ;;  %1842 = vmatpush3.bf16.xpose.msra.mxu0 %v923_v42 }
 0x1d9   : > { %1847 = vmatprep.subr.bf16.mxu1 %v2150_v0  ;;  %1853 = vmatprep.subr.bf16.mxu0 %v2150_v0  ;;  %v810_v44 = vsel %vm807_vm2, %v670_v24, %v802_v40  ;;  %v806_v47 = vpop.permute.xlu1 %805  ;;  %v969_v51 = vsel %vm872_vm3, %v1741_v45, 0  ;;  %v1015_v52 = vsel %vm872_vm3, %v1742_v46, 0 }
 0x1da   : > { %v1735_v48 = vcombine.low %v810_v44, %v810_v44  ;;  %v1736_v49 = vcombine.high %v810_v44, %v810_v44 }
 0x1dc   : > { %v804_v50 = vpop.permute.xlu0 %803 }
 0x1dd   : > { %v813_v55 = vsel %vm807_vm2, %v804_v50, %v806_v47 }
 0x1de   : > { %v851_v53 = vpop.permute.xlu1 %850  ;;  %v1737_v58 = vcombine.low %v813_v55, %v813_v55  ;;  %v1738_v59 = vcombine.high %v813_v55, %v813_v55 }
 0x1df   : > { %1838 = vmatmul.mubr.msk.bf16.vlgmr.msra.gmra.mrb[4].mxu1 %vm872_vm3, %v1735_v48  ;;  %1844 = vmatmul.mubr.msk.bf16.vlgmr.msra.gmra.mrb[8].mxu0 %vm872_vm3, %v1736_v49  ;;  %v858_v54 = vsel %vm807_vm2, %v2445_v31, %v851_v53 }
 0x1e0   : > { %1848 = vmatpush3.bf16.xpose.msra.mxu1 %v969_v51  ;;  %1854 = vmatpush3.bf16.xpose.msra.mxu0 %v1015_v52  ;;  %v1743_v56 = vcombine.low %v858_v54, %v858_v54  ;;  %v1744_v57 = vcombine.high %v858_v54, %v858_v54 }
 0x1e1   : > { %1849 = vmatprep.mubr.msk.bf16.mxu1 %vm2151_vm0, %v2150_v0  ;;  %1855 = vmatprep.mubr.msk.bf16.mxu0 %vm2151_vm0, %v2150_v0 }
 0x1e2   : > { %1859 = vmatprep.subr.bf16.mxu1 %v2150_v0  ;;  %1865 = vmatprep.subr.bf16.mxu0 %v2150_v0  ;;  %v1121_v60 = vsel %vm807_vm2, %v1743_v56, 0  ;;  %v1167_v61 = vsel %vm807_vm2, %v1744_v57, 0 }
 0x1e7   : > { %1850 = vmatmul.mubr.msk.bf16.vlgmr.msra.gmra.mrb[8].mxu1 %vm872_vm3, %v1737_v58  ;;  %1856 = vmatmul.mubr.msk.bf16.vlgmr.msra.gmra.mrb[12].mxu0 %vm872_vm3, %v1738_v59 }
 0x1e8   : > { %1860 = vmatpush3.bf16.msra.mxu1 %v1121_v60  ;;  %1866 = vmatpush3.bf16.msra.mxu0 %v1167_v61 }
 0x1e9   : > { %1861 = vmatprep.mubr.msk.bf16.mxu1 %vm2151_vm0, %v2150_v0  ;;  %1867 = vmatprep.mubr.msk.bf16.mxu0 %vm2151_vm0, %v2150_v0 }
 0x1ea   : > { %1871 = vmatprep.subr.bf16.mxu1 %v2150_v0  ;;  %1877 = vmatprep.subr.bf16.mxu0 %v2150_v0 }
 0x2b2   : > { %v913_v62 = vpop.f32.mrb[4].mxu1  ;;  %v959_v63 = vpop.f32.mrb[8].mxu0 }
 0x2b3   : > { %v1839_v1 = vpop.f32.mrb[5].mxu1  ;;  %v1845_v2 = vpop.f32.mrb[9].mxu0  ;;  %v1057_v3 = vsel %vm872_vm3, %v913_v62, -inf  ;;  %v1060_v4 = vsel %vm872_vm3, %v959_v63, -inf }
 0x2b4   : > { %1058 = vmax.xlane.f32.xlu0 %v1057_v3  ;;  %v916_v6 = vpop.f32.mrb[6].mxu1  ;;  %1061 = vmax.xlane.f32.xlu1 %v1060_v4  ;;  %v962_v7 = vpop.f32.mrb[10].mxu0 }
 0x2b5   : > { %v1840_v8 = vpop.f32.mrb[7].mxu1  ;;  %v1846_v9 = vpop.f32.mrb[11].mxu0 }
 0x2ba   : > { %v1005_v10 = vpop.f32.mrb[8].mxu1  ;;  %v1051_v11 = vpop.f32.mrb[12].mxu0 }
 0x2bb   : > { %v1851_v12 = vpop.f32.mrb[9].mxu1  ;;  %v1857_v13 = vpop.f32.mrb[13].mxu0  ;;  %v1063_v14 = vsel %vm872_vm3, %v1005_v10, -inf  ;;  %v1066_v19 = vsel %vm872_vm3, %v1051_v11, -inf }
 0x2bc   : > { %1064 = vmax.xlane.f32.xlu0 %v1063_v14  ;;  %v1008_v15 = vpop.f32.mrb[10].mxu1  ;;  %v1054_v16 = vpop.f32.mrb[14].mxu0 }
 0x2bd   : > { %v1852_v17 = vpop.f32.mrb[11].mxu1  ;;  %v1858_v18 = vpop.f32.mrb[15].mxu0 }
 0x2c0   : > { %1067 = vmax.xlane.f32.xlu0 %v1066_v19 }
 0x2c5   : > { %854 = vrot.lane.b32.xlu1 %v849_v33, %s2154_s6 }
 0x2d6   : > { %852 = vrot.lane.b32.xlu0 %v2445_v31, %s2152_s30  ;;  %s2612_s30 = sld [smem:[#allocation16_spill]] }
 0x341   : > { %v1059_v20 = vpop.xlane.xlu0 %1058  ;;  %v1062_v21 = vpop.xlane.xlu1 %1061 }
 0x342   : > { %v1081_v22 = vsub.f32 %v913_v62, %v1059_v20  ;;  %v1082_v23 = vsub.f32 %v959_v63, %v1062_v21  ;;  %v1069_v51 = vsub.f32 -inf, %v1059_v20  ;;  %v1070_v52 = vsub.f32 -inf, %v1062_v21  ;;  %v1977_v20 = vld [vmem:[#allocation6 + $0x8] sm:$0xff]  }
 0x344   : > { %v1085_v24 = vmul.f32 1.442695, %v1081_v22  ;;  %v1087_v25 = vmul.f32 1.442695, %v1082_v23  ;;  %v1073_v53 = vmul.f32 1.442695, %v1069_v51 }
 0x345   : > { %v855_v33 = vpop.permute.xlu1 %854  ;;  %v1075_v54 = vmul.f32 1.442695, %v1070_v52 }
 0x346   : > { %1984 = vpow2.f32 %v1085_v24 }
 0x347   : > { %1986 = vpow2.f32 %v1087_v25 }
 0x349   : > { %v1065_v26 = vpop.xlane.xlu0 %1064 }
 0x34a   : > { %v1083_v27 = vsub.f32 %v1005_v10, %v1065_v26  ;;  %v1071_v55 = vsub.f32 -inf, %v1065_v26  ;;  %v1976_v10 = vld [vmem:[#allocation6] sm:$0xff]  }
 0x34c   : > { %v1089_v28 = vmul.f32 1.442695, %v1083_v27  ;;  %v1077_v56 = vmul.f32 1.442695, %v1071_v55 }
 0x34d   : > { %v1068_v29 = vpop.xlane.xlu0 %1067 }
 0x34e   : > { %v1084_v30 = vsub.f32 %v1051_v11, %v1068_v29  ;;  %1988 = vpow2.f32 %v1089_v28  ;;  %v1072_v57 = vsub.f32 -inf, %v1068_v29 }
 0x350   : > { %v1091_v32 = vmul.f32 1.442695, %v1084_v30  ;;  %v1985_v34 = vpop.eup %1984  ;;  %v1079_v59 = vmul.f32 1.442695, %v1072_v57 }
 0x351   : > { %v853_v35 = vpop.permute.xlu0 %852  ;;  %v1113_v36 = vpack.c.bf16 %v1985_v34, %v1985_v34  ;;  %v1987_v37 = vpop.eup %1986  ;;  %v1097_v44 = vsel %vm872_vm3, %v1985_v34, 0.0 }
 0x352   : > { %v861_v31 = vsel %vm807_vm2, %v853_v35, %v855_v33  ;;  %1990 = vpow2.f32 %v1091_v32  ;;  %v1100_v40 = vsel %vm872_vm3, %v1987_v37, 0.0  ;;  %v1114_v41 = vpack.c.bf16 %v1987_v37, %v1987_v37 }
 0x353   : > { %v1745_v38 = vcombine.low %v861_v31, %v861_v31  ;;  %v1746_v39 = vcombine.high %v861_v31, %v861_v31  ;;  %1862 = vmatmul.mubr.msk.bf16.vlgmr.msra.gmra.mrb[12].mxu1 %vm872_vm3, %v1113_v36  ;;  %1101 = vadd.xlane.f32.xlu1 %v1100_v40  ;;  %1992 = vpow2.f32 %v1073_v53  ;;  %v1755_v53 = vld [vmem:[#allocation7] ss:$0 sm:$0xff] }
 0x354   : > { %1873 = vmatprep.mubr.msk.bf16.mxu1 %vm2151_vm0, %v2150_v0  ;;  %1868 = vmatmul.mubr.msk.bf16.vlgmr.msra.gmra.mrb[16].mxu0 %vm872_vm3, %v1114_v41  ;;  %1994 = vpow2.f32 %v1075_v54 }
 0x355   : > { %v1213_v42 = vsel %vm807_vm2, %v1745_v38, 0  ;;  %v1259_v43 = vsel %vm807_vm2, %v1746_v39, 0  ;;  %1879 = vmatprep.mubr.msk.bf16.mxu0 %vm2151_vm0, %v2150_v0  ;;  %1996 = vpow2.f32 %v1077_v56 }
 0x356   : > { %1872 = vmatpush3.bf16.msra.mxu1 %v1213_v42  ;;  %1878 = vmatpush3.bf16.msra.mxu0 %v1259_v43  ;;  %1998 = vpow2.f32 %v1079_v59 }
 0x357   : > { %1883 = vmatprep.subr.bf16.mxu1 %v2150_v0  ;;  %1891 = vmatprep.subr.bf16.mxu0 %v2150_v0 }
 0x358   : > { %v1989_v45 = vpop.eup %1988  ;;  %1098 = vadd.xlane.f32.xlu1 %v1097_v44 }
 0x359   : > { %v1103_v46 = vsel %vm872_vm3, %v1989_v45, 0.0  ;;  %v1115_v47 = vpack.c.bf16 %v1989_v45, %v1989_v45 }
 0x35a   : > { %1104 = vadd.xlane.f32.xlu0 %v1103_v46 }
 0x35b   : > { %1874 = vmatmul.mubr.msk.bf16.vlgmr.msra.gmra.mrb[16].mxu1 %vm872_vm3, %v1115_v47 }
 0x35c   : > { %v1991_v48 = vpop.eup %1990  ;;  %1887 = vmatprep.mubr.msk.bf16.mxu1 %vm2151_vm0, %v2150_v0  ;;  %1884 = vmatpush3.bf16.msra.mxu1 %v1976_v10 }
 0x35d   : > { %v1106_v49 = vsel %vm872_vm3, %v1991_v48, 0.0  ;;  %v1116_v50 = vpack.c.bf16 %v1991_v48, %v1991_v48  ;;  %v1993_v60 = vpop.eup %1992  ;;  %1885 = vmatprep.subr.bf16.mxu1 %v2150_v0 }
 0x35e   : > { %1107 = vadd.xlane.f32.xlu0 %v1106_v49  ;;  %v1995_v61 = vpop.eup %1994  ;;  %v1093_v63 = vmul.f32 0.0, %v1993_v60 }
 0x35f   : > { %1880 = vmatmul.mubr.msk.bf16.vlgmr.msra.gmra.mrb[20].mxu0 %vm872_vm3, %v1116_v50  ;;  %v1094_v1 = vmul.f32 0.0, %v1995_v61  ;;  %v1997_v4 = vpop.eup %1996 }
 0x360   : > { %1895 = vmatprep.mubr.msk.bf16.mxu0 %vm2151_vm0, %v2150_v0  ;;  %v1095_v7 = vmul.f32 0.0, %v1997_v4  ;;  %v1999_v8 = vpop.eup %1998  ;;  %1886 = vmatpush3.bf16.msra.mxu1 %v1977_v20  ;;  %v1979_v4 = vld [vmem:[%s2580_s9 + $0x8] sm:$0xff]  }
 0x361   : > { %v1096_v12 = vmul.f32 0.0, %v1999_v8  ;;  %1899 = vmatprep.subr.bf16.mxu1 %v2150_v0 }
 0x3e0   : > { %v1102_v58 = vpop.xlane.xlu1 %1101 }
 0x3e1   : > { %v1110_v3 = vadd.f32 %v1102_v58, %v1094_v1 }
 0x3e5   : > { %v1099_v62 = vpop.xlane.xlu1 %1098 }
 0x3e6   : > { %v1109_v2 = vadd.f32 %v1099_v62, %v1093_v63 }
 0x3e7   : > { %v1105_v6 = vpop.xlane.xlu0 %1104 }
 0x3e8   : > { %2000 = vrcp.f32 %v1109_v2  ;;  %v1111_v9 = vadd.f32 %v1105_v6, %v1095_v7  ;;  %v1981_v6 = vld [vmem:[%s2582_s11 + $0x8] sm:$0xff]  }
 0x3e9   : > { %2002 = vrcp.f32 %v1110_v3  ;;  %v1978_v3 = vld [vmem:[%s2580_s9] sm:$0xff]  }
 0x3ea   : > { %2004 = vrcp.f32 %v1111_v9  ;;  %1892 = vmatpush3.bf16.msra.mxu0 %v1978_v3 }
 0x3eb   : > { %v1108_v11 = vpop.xlane.xlu0 %1107  ;;  %1893 = vmatprep.subr.bf16.mxu0 %v2150_v0 }
 0x3ec   : > { %v1112_v13 = vadd.f32 %v1108_v11, %v1096_v12  ;;  %v1759_v11 = vld [vmem:[%s2584_s13] ss:$0 sm:$0xff] }
 0x3ee   : > { %2006 = vrcp.f32 %v1112_v13  ;;  %1894 = vmatpush3.bf16.msra.mxu0 %v1979_v4  ;;  %v1760_v13 = vld [vmem:[%s2585_s14] ss:$0 sm:$0xff] }
 0x3f2   : > { %v2001_v17 = vpop.eup %2000 }
 0x3f3   : > { %v2003_v25 = vpop.eup %2002 }
 0x3f4   : > { %v2005_v33 = vpop.eup %2004 }
 0x3f8   : > { %v2007_v41 = vpop.eup %2006 }
 0x426   : > { %v1157_v14 = vpop.f32.mrb[12].mxu1 }
 0x427   : > { %v1301_v15 = vadd.f32 %v1157_v14, %v1093_v63  ;;  %v1863_v16 = vpop.f32.mrb[13].mxu1  ;;  %v1203_v18 = vpop.f32.mrb[16].mxu0 }
 0x428   : > { %v1160_v19 = vpop.f32.mrb[14].mxu1  ;;  %v1302_v22 = vadd.f32 %v1203_v18, %v1094_v1  ;;  %v1869_v23 = vpop.f32.mrb[17].mxu0  ;;  %v1983_v18 = vld [vmem:[%s2582_s11 + $0x18] sm:$0xff]  }
 0x429   : > { %v1309_v21 = vmul.f32 %v2001_v17, %v1301_v15  ;;  %v1864_v24 = vpop.f32.mrb[15].mxu1  ;;  %v1206_v26 = vpop.f32.mrb[18].mxu0  ;;  %v1982_v17 = vld [vmem:[%s2582_s11 + $0x10] sm:$0xff]   ;;  %v1761_v19 = vld [vmem:[%s2581_s10] ss:$0 sm:$0xff] }
 0x42a   : > { %v1310_v27 = vmul.f32 %v2003_v25, %v1302_v22  ;;  %v1870_v28 = vpop.f32.mrb[19].mxu0 }
 0x42b   : > { %v1313_v48 = vpack.c.bf16 %v1309_v21, %v1309_v21 }
 0x42c   : > { %v1314_v29 = vpack.c.bf16 %v1310_v27, %v1310_v27 }
 0x42e   : > { %v1249_v30 = vpop.f32.mrb[16].mxu1  ;;  %1318 = vrot.lane.b32.xlu0 %v1314_v29, %s2155_s25  ;;  %s2613_s25 = sld [smem:[#allocation17_spill]] }
 0x42f   : > { %v1303_v32 = vadd.f32 %v1249_v30, %v1095_v7  ;;  %v1875_v34 = vpop.f32.mrb[17].mxu1 }
 0x430   : > { %v1252_v35 = vpop.f32.mrb[18].mxu1 }
 0x431   : > { %v1311_v31 = vmul.f32 %v2005_v33, %v1303_v32  ;;  %v1876_v36 = vpop.f32.mrb[19].mxu1 }
 0x432   : > { %v1295_v37 = vpop.f32.mrb[20].mxu0 }
 0x433   : > { %v1315_v38 = vpack.c.bf16 %v1311_v31, %v1311_v31  ;;  %v1304_v39 = vadd.f32 %v1295_v37, %v1096_v12  ;;  %v1881_v40 = vpop.f32.mrb[21].mxu0 }
 0x434   : > { %v1298_v42 = vpop.f32.mrb[22].mxu0 }
 0x435   : > { %v1312_v43 = vmul.f32 %v2007_v41, %v1304_v39  ;;  %1321 = vrot.lane.b32.xlu1 %v1315_v38, %s2156_s29  ;;  %v1882_v44 = vpop.f32.mrb[23].mxu0  ;;  %s598_s29 = scalar_lea.vmem %s2613_s25, %s1721_s24 }
 0x437   : > { %v1316_v45 = vpack.c.bf16 %v1312_v43, %v1312_v43  ;;  %v1771_v43 = vld [vmem:[%s2586_s15] ss:$0 sm:$0xff] }
 0x439   : > { %1324 = vrot.lane.b32.xlu1 %v1316_v45, %s2157_s18  ;;  %v1772_v45 = vld [vmem:[%s2612_s30] ss:$0 sm:$0xff] }
 0x4a0   : > { %v1319_v46 = vpop.permute.xlu0 %1318 }
 0x4a1   : > { %v1328_v49 = vsel %vm872_vm3, %v1313_v48, %v1319_v46 }
 0x4a7   : > { %v1322_v47 = vpop.permute.xlu1 %1321 }
 0x4a8   : > { %v1331_v50 = vsel %vm1329_vm4, %v1328_v49, %v1322_v47 }
 0x4ab   : > { %v1325_v51 = vpop.permute.xlu1 %1324 }
 0x4ac   : > { %v1334_v52 = vsel %vm1332_vm5, %v1331_v50, %v1325_v51 }
 0x4ad   : > { %1888 = vmatmul.mubr.msk.bf16.vlgmr.msra.gmra.mrb[20].mxu1 %vm625_vm1, %v1334_v52 }
 0x4ae   : > { %1907 = vmatprep.mubr.msk.bf16.mxu1 %vm2151_vm0, %v2150_v0 }
 0x580   : > { %v1394_v54 = vpop.f32.mrb[20].mxu1 }
 0x581   : > { %v1395_v55 = vadd.f32 %v1755_v53, %v1394_v54  ;;  %v1889_v56 = vpop.f32.mrb[21].mxu1 }
 0x582   : > { %v1397_v57 = vpop.f32.mrb[22].mxu1 }
 0x583   : > { %v1890_v58 = vpop.f32.mrb[23].mxu1  ;;  %v1400_v59 = vadd.f32 %v1395_v55, %v2418_v5  ;;  %v1980_v5 = vld [vmem:[%s2582_s11] sm:$0xff]  }
 0x584   : > { %1900 = vmatpush3.bf16.msra.mxu1 %v1980_v5 }
 0x585   : > { %v1401_v60 = vsel %vm625_vm1, %v1400_v59, 0.0  ;;  %1901 = vmatprep.subr.bf16.mxu1 %v2150_v0 }
 0x586   : > { %1402 = vadd.xlane.f32.xlu0 %v1401_v60 }
 0x588   : > { %1902 = vmatpush3.bf16.msra.mxu1 %v1981_v6 }
 0x589   : > { %1903 = vmatprep.subr.bf16.mxu1 %v2150_v0 }
 0x58c   : > { %1904 = vmatpush3.bf16.msra.mxu1 %v1982_v17 }
 0x58d   : > { %1905 = vmatprep.subr.bf16.mxu1 %v2150_v0  ;;  %v1765_v0 = vld [vmem:[%s2583_s12] ss:$0 sm:$0xff] }
 0x590   : > { %1906 = vmatpush3.bf16.msra.mxu1 %v1983_v18 }
 0x613   : > { %v1403_v61 = vpop.xlane.xlu0 %1402 }
 0x614   : > { %v1405_v62 = vmul.f32 0.03125, %v1403_v61 }
 0x616   : > { %v1406_v63 = vsub.f32 %v1400_v59, %v1405_v62 }
 0x618   : > { %v1407_v1 = vmul.f32 %v1406_v63, %v1406_v63 }
 0x61a   : > { %v1408_v2 = vsel %vm625_vm1, %v1407_v1, 0.0 }
 0x61b   : > { %1409 = vadd.xlane.f32.xlu1 %v1408_v2 }
 0x6a8   : > { %v1410_v7 = vpop.xlane.xlu1 %1409 }
 0x6a9   : > { %v1411_v8 = vmul.f32 0.03125, %v1410_v7 }
 0x6ab   : > { %v1412_v9 = vadd.f32 1e-05, %v1411_v8 }
 0x6ad   : > { %2008 = vrsqrt.f32 %v1412_v9 }
 0x6b7   : > { %v2009_v10 = vpop.eup %2008 }
 0x6b8   : > { %v1414_v12 = vmul.f32 %v2009_v10, %v1406_v63 }
 0x6ba   : > { %v1422_v14 = vmul.f32 %v1759_v11, %v1414_v12 }
 0x6bc   : > { %v1430_v15 = vadd.f32 %v1760_v13, %v1422_v14 }
 0x6be   : > { %v1431_v16 = vpack.c.bf16 %v1430_v15, %v1430_v15 }
 0x6c0   : > { %1896 = vmatmul.mubr.msk.bf16.vlgmr.msra.gmra.mrb[24].mxu0 %vm625_vm1, %v1431_v16 }
 0x793   : > { %v1492_v20 = vpop.f32.mrb[24].mxu0 }
 0x794   : > { %v1493_v21 = vadd.f32 %v1761_v19, %v1492_v20  ;;  %v1897_v22 = vpop.f32.mrb[25].mxu0 }
 0x795   : > { %v1495_v23 = vpop.f32.mrb[26].mxu0 }
 0x796   : > { %v1498_v24 = vmax.f32 %v1493_v21, 0.0  ;;  %v1898_v25 = vpop.f32.mrb[27].mxu0 }
 0x798   : > { %v1499_v26 = vpack.c.bf16 %v1498_v24, %v1498_v24 }
 0x79a   : > { %1908 = vmatmul.mubr.msk.bf16.vlgmr.msra.gmra.mrb[24].mxu1 %vm1539_vm6, %v1499_v26 }
 0x86d   : > { %v1577_v27 = vpop.f32.mrb[24].mxu1 }
 0x86e   : > { %v1578_v28 = vadd.f32 %v1765_v0, %v1577_v27  ;;  %v1909_v29 = vpop.f32.mrb[25].mxu1 }
 0x86f   : > { %v1580_v30 = vpop.f32.mrb[26].mxu1 }
 0x870   : > { %v1910_v32 = vpop.f32.mrb[27].mxu1  ;;  %v1583_v34 = vadd.f32 %v1578_v28, %v1430_v15 }
 0x872   : > { %v1584_v33 = vsel %vm625_vm1, %v1583_v34, 0.0 }
 0x873   : > { %1585 = vadd.xlane.f32.xlu0 %v1584_v33 }
 0x900   : > { %v1586_v35 = vpop.xlane.xlu0 %1585 }
 0x901   : > { %v1587_v31 = vmul.f32 0.03125, %v1586_v35 }
 0x903   : > { %v1588_v36 = vsub.f32 %v1583_v34, %v1587_v31 }
 0x905   : > { %v1589_v37 = vmul.f32 %v1588_v36, %v1588_v36 }
 0x907   : > { %v1590_v38 = vsel %vm625_vm1, %v1589_v37, 0.0 }
 0x908   : > { %1591 = vadd.xlane.f32.xlu0 %v1590_v38 }
 0x995   : > { %v1592_v39 = vpop.xlane.xlu0 %1591 }
 0x996   : > { %v1593_v40 = vmul.f32 0.03125, %v1592_v39 }
 0x998   : > { %v1594_v41 = vadd.f32 1e-05, %v1593_v40 }
 0x99a   : > { %2010 = vrsqrt.f32 %v1594_v41 }
 0x9a4   : > { %v2011_v42 = vpop.eup %2010 }
 0x9a5   : > { %v1596_v44 = vmul.f32 %v2011_v42, %v1588_v36 }
 0x9a7   : > { %v1604_v46 = vmul.f32 %v1771_v43, %v1596_v44 }
 0x9a9   : > { %v1612_v47 = vadd.f32 %v1772_v45, %v1604_v46 }
 0x9ab   : > { %1613 = vst.msk [vmem:[%s598_s29] sm:$0xff] %vm625_vm1, %v1612_v47 }
 0x9ac PF: > { %s2614_s18 = sld [smem:[#allocation12_spill]] }
 0x9b2   : > { %s30_s24 = sadd.s32 1, %s2614_s18  }
 0x9b3   : > { %p27_p6 = scmp.ge.s32.totalorder %s30_s24, 4  }
 0x9b5   :  { %29 = sbr.rel (!%p27_p6) target bundleno = 9 (0x9), region = 135 }
 0x9bc   :  { %1633 = vsyncpa [#allocation3], 1 }
 0x9bd   :  { %1635 = vsyncpa [#allocation3 + $0x1], 1 }
 0x9be   :  { %1636 = vsyncpa [#allocation5], 1 }
 0x9bf   :  { %1637 = vsyncpa [#allocation8], 1 }

// kernel: encoder_forward.3
= control target key start
LH: loop header
LB: loop body
LE: loop exit
PB: predicated region body
PF: predicated region fallthrough
CT: control target
= control target key end

     0   :  { %s2363_s0 = inlined_call_operand.vmem [shape: f32[2,8,32], index: 0, kind: input, shape index: {}]   ;;  %s2364_s1 = inlined_call_operand.vmem [shape: bf16[32,32], index: 1, kind: input, shape index: {}]   ;;  %s2365_s2 = inlined_call_operand.vmem [shape: f32[1,32], index: 2, kind: input, shape index: {}]   ;;  %s2366_s3 = inlined_call_operand.vmem [shape: bf16[32,32], index: 3, kind: input, shape index: {}]   ;;  %s2367_s4 = inlined_call_operand.vmem [shape: f32[1,32], index: 4, kind: input, shape index: {}]   ;;  %s2368_s5 = inlined_call_operand.vmem [shape: bf16[32,32], index: 5, kind: input, shape index: {}]   ;;  %s2369_s6 = inlined_call_operand.vmem [shape: f32[1,32], index: 6, kind: input, shape index: {}]   ;;  %s2370_s7 = inlined_call_operand.vmem [shape: bf16[32,32], index: 7, kind: input, shape index: {}]   ;;  %s2371_s8 = inlined_call_operand.vmem [shape: f32[1,32], index: 8, kind: input, shape index: {}]   ;;  %s2372_s9 = inlined_call_operand.vmem [shape: bf16[32,64], index: 9, kind: input, shape index: {}]   ;;  %s2373_s10 = inlined_call_operand.vmem [shape: f32[1,64], index: 10, kind: input, shape index: {}]   ;;  %s2374_s11 = inlined_call_operand.vmem [shape: bf16[64,32], index: 11, kind: input, shape index: {}]   ;;  %s2375_s12 = inlined_call_operand.vmem [shape: f32[1,32], index: 12, kind: input, shape index: {}]   ;;  %s2376_s13 = inlined_call_operand.vmem [shape: f32[1,32], index: 13, kind: input, shape index: {}]   ;;  %s2377_s14 = inlined_call_operand.vmem [shape: f32[1,32], index: 14, kind: input, shape index: {}]   ;;  %s2378_s15 = inlined_call_operand.vmem [shape: f32[1,32], index: 15, kind: input, shape index: {}]   ;;  %s2379_s16 = inlined_call_operand.vmem [shape: f32[1,32], index: 16, kind: input, shape index: {}]   ;;  %s2380_s17 = inlined_call_operand.hbm [shape: f32[2,8,32], index: 17, kind: output, shape index: {}]  }
   0x1   :  { %2386 = sst [smem:[#allocation9_spill]] %s2363_s0 }
   0x2   :  { %2387 = sst [smem:[#allocation10_spill]] %s2364_s1 }
   0x3   :  { %2388 = sst [smem:[#allocation11_spill]] %s2365_s2 }
   0x4   :  { %2389 = sst [smem:[#allocation12_spill]] %s2366_s3 }
   0x5   :  { %2390 = sst [smem:[#allocation13_spill]] %s2367_s4 }
   0x6   :  { %22 = vsyncpa [#allocation3], 0 }
   0x7   :  { %24 = vsyncpa [#allocation3 + $0x1], 0  ;;  %s2080_s24 = smov 0   ;;  %s2082_s25 = smov 0  }
   0x8   :  { %s2084_s26 = smov 0   ;;  %s2086_s27 = smov 0  }
   0x9 LB: > { %2391 = sst [smem:[#allocation5_spill]] %s1975_s26  ;;  %s2101_s28 = sadd.s32 4294967295, %s1979_s27   ;;  %s1979_s27 = sphi %s2086_s27, %s2403_s27   ;;  %s1975_s26 = sphi %s2084_s26, %s2405_s26   ;;  %s1971_s25 = sphi %s2082_s25, %s2407_s25   ;;  %s1967_s24 = sphi %s2080_s24, %s2406_s24  }
   0xa   : > { %s1632_s29 = sadd.s32 4294967294, %s1979_s27   ;;  %s2105_s0 = sadd.s32 1, %s1979_s27  }
   0xb   : > { %2392 = sst [smem:[#allocation6_spill]] %s2105_s0  ;;  %s399_s30 = sadd.s32 1, %s1975_s26 }
   0xc   : > { %s396_s18 = ssub.s32 %s1979_s27, %s2105_s0  ;;  %p409_p0 = scmp.ne.s32.totalorder %s1975_s26, %s1971_s25 }
   0xd   : > { %p397_p1 = scmp.eq.s32.totalorder %s396_s18, 0  ;;  %p410_p2 = scmp.eq.s32.totalorder %s2101_s28, 1 }
   0xe   : > { %p415_p3 = scmp.ne.s32.totalorder %s1971_s25, %s1967_s24  ;;  %p416_p4 = scmp.eq.s32.totalorder %s1632_s29, 1 }
   0xf   : > { %s2116_s19 = scalar_select %p397_p1, %s1975_s26, %s399_s30  }
  0x10   : > { %p2118_p5 = por %p410_p2, %p409_p0  ;;  %p2122_p6 = por %p416_p4, %p415_p3 }
  0x11   : > { %2393 = sst [smem:[#allocation7_spill]] %s2116_s19  ;;  %p1635_p7 = scmp.ge.s32.totalorder %s1979_s27, 1 }
  0x12   : > { %s2395_s20 = scalar_select %p2122_p6, 1, 0 }
  0x13   : > { %p489_p8 = scmp.lt.s32.totalorder %s1979_s27, 3 }
  0x14   : > { %2396 = sst [smem:[#allocation8_spill]] %s2395_s20 }
  0x15   : > { %p490_p9 = pnand %p1635_p7, %p489_p8 }
  0x16   : > { %s2397_s3 = sld [smem:[#allocation12_spill]] (!%p490_p9)  ;;  %v1981_v1 = vmov (!%p490_p9), 0.0   ;;  %s2398_s30 = sld [smem:[#allocation10_spill]] (!%p490_p9)  ;;  %vm1982_vm0 = vmmov (!%p490_p9), 0   ;;  %v1879_v5 = vld [vmem:[%s2368_s5] sm:$0xff] (!%p490_p9)   ;;  %vm570_vm1 = vcmask (!%p490_p9), 261120  }
  0x17   : > { %493 = sbr.rel (%p490_p9) target bundleno = 2391 (0x957), region = 88  ;;  %1736 = vmatprep.subr.bf16.mxu1 (!%p490_p9), %v1981_v1  ;;  %1728 = vmatprep.subr.bf16.mxu0 (!%p490_p9), %v1981_v1  ;;  %p540_p10 = scmp.lt.s32.totalorder (!%p490_p9), %s2101_s28, 1  ;;  %v1880_v8 = vld [vmem:[%s2368_s5 + $0x8] sm:$0xff] (!%p490_p9)   ;;  %v1646_v26 = vld [vmem:[%s2369_s6] ss:$0 sm:$0xff] (!%p490_p9)  ;;  %vm752_vm2 = vcmask (!%p490_p9), 1043456  }
  0x18   : > { %1740 = vmatprep.mubr.msk.bf16.mxu1 (!%p490_p9), %vm1982_vm0, %v1981_v1  ;;  %1732 = vmatprep.mubr.msk.bf16.mxu0 (!%p490_p9), %vm1982_vm0, %v1981_v1  ;;  %s2399_s0 = sld [smem:[#allocation9_spill]] (!%p490_p9)  ;;  %s2400_s4 = sld [smem:[#allocation13_spill]] (!%p490_p9)  ;;  %vm817_vm3 = vcmask (!%p490_p9), 64512   ;;  %vm1274_vm4 = vcmask (!%p490_p9), 130048   ;;  %vm1277_vm5 = vcmask (!%p490_p9), 195584   ;;  %vm1484_vm6 = vcmask (!%p490_p9), 523264  }
  0x19   : > { %s2401_s2 = sld [smem:[#allocation11_spill]] (!%p490_p9)  ;;  %s1985_s29 = smov (!%p490_p9), 104  }
  0x1a   : > { %s537_s21 = sand.u32 (!%p490_p9), 1, %s1971_s25  }
  0x1b   : > { %s1636_s22 = sshll.u32 (!%p490_p9), %s537_s21, 3 }
  0x1c   : > { %v1875_v0 = vld [vmem:[%s2397_s3] sm:$0xff] (!%p490_p9)   ;;  %v1877_v3 = vld [vmem:[%s2397_s3 + $0x8] sm:$0xff] (!%p490_p9)   ;;  %s1560_s3 = scalar_lea.sflag (!%p490_p9), [#allocation3], %s537_s21 }
  0x1d   : > { %v1876_v2 = vld [vmem:[%s2398_s30] sm:$0xff] (!%p490_p9)   ;;  %1737 = vmatpush3.bf16.msra.mxu1 (!%p490_p9), %v1875_v0  ;;  %v1878_v4 = vld [vmem:[%s2398_s30 + $0x8] sm:$0xff] (!%p490_p9)  }
  0x1e   : > { %1729 = vmatpush3.bf16.msra.mxu0 %v1876_v2  ;;  %1738 = vmatprep.subr.bf16.mxu1 %v1981_v1  ;;  %s541_s23 = scalar_select %p540_p10, %s2101_s28, 1  ;;  %v1642_v9 = vld [vmem:[%s2400_s4] ss:$0 sm:$0xff] }
  0x1f   : > { %1730 = vmatprep.subr.bf16.mxu0 %v1981_v1  ;;  %v1638_v10 = vld [vmem:[%s2401_s2] ss:$0 sm:$0xff] }
  0x20   : > { %s1637_s19 = sshll.u32 %s541_s23, 3  ;;  %s1983_s23 = smov 112  }
  0x21   : > { %1739 = vmatpush3.bf16.msra.mxu1 %v1877_v3  ;;  %s543_s20 = scalar_lea.vmem %s2399_s0, %s1637_s19  ;;  %s1984_s19 = smov 120  }
  0x22   : > { %1731 = vmatpush3.bf16.msra.mxu0 %v1878_v4  ;;  %1752 = vmatprep.subr.bf16.mxu1 %v1981_v1  ;;  %v2157_v6 = vld [vmem:[%s543_s20] sm:$0xff]  ;;  %s1986_s20 = smov 8  }
  0x23   : > { %1744 = vmatprep.subr.bf16.mxu0 %v1981_v1  ;;  %v546_v7 = vpack.c.bf16 %v2157_v6, %v2157_v6 }
  0x25   : > { %1741 = vmatmul.mubr.msk.bf16.vlgmr.msra.gmra.mrb[0].mxu1 %vm570_vm1, %v546_v7  ;;  %1733 = vmatmul.mubr.msk.bf16.vlgmr.msra.gmra.mrb[0].mxu0 %vm570_vm1, %v546_v7 }
  0x26   : > { %1745 = vmatpush3.bf16.msra.mxu0 %v1879_v5  ;;  %1748 = vmatprep.mubr.msk.bf16.mxu0 %vm1982_vm0, %v1981_v1 }
  0x27   : > { %1746 = vmatprep.subr.bf16.mxu0 %v1981_v1  ;;  %1754 = vmatprep.mubr.msk.bf16.mxu1 %vm1982_vm0, %v1981_v1 }
  0x2a   : > { %1747 = vmatpush3.bf16.msra.mxu0 %v1880_v8 }
  0x2b   : > { %1758 = vmatprep.subr.bf16.mxu0 %v1981_v1 }
  0x2d   : > { %1749 = vmatmul.mubr.msk.bf16.vlgmr.msra.gmra.mrb[4].mxu0 %vm570_vm1, %v546_v7 }
  0x2e   : > { %1760 = vmatprep.mubr.msk.bf16.mxu0 %vm1982_vm0, %v1981_v1 }
  0xf8   : > { %v673_v11 = vpop.f32.mrb[0].mxu1  ;;  %v608_v12 = vpop.f32.mrb[0].mxu0 }
  0xf9   : > { %v674_v13 = vadd.f32 %v1642_v9, %v673_v11  ;;  %v1742_v14 = vpop.f32.mrb[1].mxu1  ;;  %v609_v15 = vadd.f32 %v1638_v10, %v608_v12  ;;  %v1734_v16 = vpop.f32.mrb[1].mxu0 }
  0xfa   : > { %v676_v17 = vpop.f32.mrb[2].mxu1  ;;  %v611_v18 = vpop.f32.mrb[2].mxu0 }
  0xfb   : > { %v679_v19 = vpack.c.bf16 %v674_v13, %v674_v13  ;;  %v614_v20 = vmul.f32 0.35355338, %v609_v15  ;;  %v1743_v21 = vpop.f32.mrb[3].mxu1  ;;  %v1735_v22 = vpop.f32.mrb[3].mxu0 }
  0xfd   : > { %v615_v23 = vpack.c.bf16 %v614_v20, %v614_v20  ;;  %773 = vrot.lane.b32.xlu1 %v679_v19, %s1983_s23  ;;  %v770_v24 = vrot.slane %v679_v19, 4 }
  0xff   : > { %771 = vrot.lane.b32.xlu0 %v770_v24, %s1984_s19  ;;  %v745_v25 = vrot.slane %v615_v23, 4 }
 0x100   : > { %v737_v27 = vpop.f32.mrb[4].mxu0 }
 0x101   : > { %775 = vrot.lane.b32.xlu1 %v770_v24, %s1985_s29  ;;  %v738_v28 = vadd.f32 %v1646_v26, %v737_v27  ;;  %v1750_v29 = vpop.f32.mrb[5].mxu0 }
 0x102   : > { %v740_v30 = vpop.f32.mrb[6].mxu0 }
 0x103   : > { %746 = vrot.lane.b32.xlu0 %v745_v25, %s1984_s19  ;;  %v2189_v31 = vpack.c.bf16 %v738_v28, %v738_v28  ;;  %v1751_v32 = vpop.f32.mrb[7].mxu0 }
 0x105   : > { %750 = vrot.lane.b32.xlu1 %v745_v25, %s1985_s29  ;;  %v794_v33 = vrot.slane %v2189_v31, 4 }
 0x107   : > { %748 = vrot.lane.b32.xlu0 %v615_v23, %s1983_s23 }
 0x109   : > { %795 = vrot.lane.b32.xlu1 %v794_v33, %s1984_s19  ;;  %s1988_s19 = smov 24  }
 0x16f   : > { %v774_v34 = vpop.permute.xlu1 %773 }
 0x171   : > { %v772_v35 = vpop.permute.xlu0 %771 }
 0x172   : > { %v779_v36 = vsel %vm752_vm2, %v679_v19, %v772_v35 }
 0x173   : > { %v1654_v37 = vcombine.low %v779_v36, %v779_v36  ;;  %v1655_v38 = vcombine.high %v779_v36, %v779_v36  ;;  %v776_v39 = vpop.permute.xlu1 %775 }
 0x174   : > { %v782_v43 = vsel %vm752_vm2, %v774_v34, %v776_v39 }
 0x175   : > { %v747_v40 = vpop.permute.xlu0 %746  ;;  %v822_v41 = vsel %vm817_vm3, %v1654_v37, 0  ;;  %v868_v42 = vsel %vm817_vm3, %v1655_v38, 0  ;;  %v1656_v45 = vcombine.low %v782_v43, %v782_v43  ;;  %v1657_v46 = vcombine.high %v782_v43, %v782_v43 }
 0x176   : > { %1753 = vmatpush3.bf16.xpose.msra.mxu1 %v822_v41  ;;  %1759 = vmatpush3.bf16.xpose.msra.mxu0 %v868_v42  ;;  %v755_v44 = vsel %vm752_vm2, %v615_v23, %v747_v40 }
 0x177   : > { %1764 = vmatprep.subr.bf16.mxu1 %v1981_v1  ;;  %1770 = vmatprep.subr.bf16.mxu0 %v1981_v1  ;;  %v751_v47 = vpop.permute.xlu1 %750  ;;  %v1650_v48 = vcombine.low %v755_v44, %v755_v44  ;;  %v1651_v49 = vcombine.high %v755_v44, %v755_v44  ;;  %v914_v51 = vsel %vm817_vm3, %v1656_v45, 0  ;;  %v960_v52 = vsel %vm817_vm3, %v1657_v46, 0 }
 0x179   : > { %v749_v50 = vpop.permute.xlu0 %748 }
 0x17a   : > { %v758_v55 = vsel %vm752_vm2, %v749_v50, %v751_v47 }
 0x17b   : > { %v796_v53 = vpop.permute.xlu1 %795  ;;  %v1652_v58 = vcombine.low %v758_v55, %v758_v55  ;;  %v1653_v59 = vcombine.high %v758_v55, %v758_v55 }
 0x17c   : > { %v803_v54 = vsel %vm752_vm2, %v2189_v31, %v796_v53 }
 0x17d   : > { %1755 = vmatmul.mubr.msk.bf16.vlgmr.msra.gmra.mrb[4].mxu1 %vm817_vm3, %v1650_v48  ;;  %1761 = vmatmul.mubr.msk.bf16.vlgmr.msra.gmra.mrb[8].mxu0 %vm817_vm3, %v1651_v49  ;;  %v1658_v56 = vcombine.low %v803_v54, %v803_v54  ;;  %v1659_v57 = vcombine.high %v803_v54, %v803_v54 }
 0x17e   : > { %1765 = vmatpush3.bf16.xpose.msra.mxu1 %v914_v51  ;;  %1771 = vmatpush3.bf16.xpose.msra.mxu0 %v960_v52 }
 0x17f   : > { %1766 = vmatprep.mubr.msk.bf16.mxu1 %vm1982_vm0, %v1981_v1  ;;  %1772 = vmatprep.mubr.msk.bf16.mxu0 %vm1982_vm0, %v1981_v1  ;;  %v1066_v60 = vsel %vm752_vm2, %v1658_v56, 0  ;;  %v1112_v61 = vsel %vm752_vm2, %v1659_v57, 0 }
 0x180   : > { %1776 = vmatprep.subr.bf16.mxu1 %v1981_v1  ;;  %1782 = vmatprep.subr.bf16.mxu0 %v1981_v1 }
 0x185   : > { %1767 = vmatmul.mubr.msk.bf16.vlgmr.msra.gmra.mrb[8].mxu1 %vm817_vm3, %v1652_v58  ;;  %1773 = vmatmul.mubr.msk.bf16.vlgmr.msra.gmra.mrb[12].mxu0 %vm817_vm3, %v1653_v59 }
 0x186   : > { %1777 = vmatpush3.bf16.msra.mxu1 %v1066_v60  ;;  %1783 = vmatpush3.bf16.msra.mxu0 %v1112_v61 }
 0x187   : > { %1778 = vmatprep.mubr.msk.bf16.mxu1 %vm1982_vm0, %v1981_v1  ;;  %1784 = vmatprep.mubr.msk.bf16.mxu0 %vm1982_vm0, %v1981_v1 }
 0x188   : > { %1788 = vmatprep.subr.bf16.mxu1 %v1981_v1  ;;  %1794 = vmatprep.subr.bf16.mxu0 %v1981_v1 }
 0x250   : > { %v858_v62 = vpop.f32.mrb[4].mxu1  ;;  %v904_v63 = vpop.f32.mrb[8].mxu0 }
 0x251   : > { %v1756_v0 = vpop.f32.mrb[5].mxu1  ;;  %v1762_v2 = vpop.f32.mrb[9].mxu0  ;;  %v1002_v3 = vsel %vm817_vm3, %v858_v62, -inf  ;;  %v1005_v4 = vsel %vm817_vm3, %v904_v63, -inf }
 0x252   : > { %1003 = vmax.xlane.f32.xlu0 %v1002_v3  ;;  %v861_v5 = vpop.f32.mrb[6].mxu1  ;;  %1006 = vmax.xlane.f32.xlu1 %v1005_v4  ;;  %v907_v7 = vpop.f32.mrb[10].mxu0 }
 0x253   : > { %v1757_v8 = vpop.f32.mrb[7].mxu1  ;;  %v1763_v9 = vpop.f32.mrb[11].mxu0 }
 0x258   : > { %v950_v10 = vpop.f32.mrb[8].mxu1  ;;  %v996_v11 = vpop.f32.mrb[12].mxu0 }
 0x259   : > { %v1768_v12 = vpop.f32.mrb[9].mxu1  ;;  %v1774_v13 = vpop.f32.mrb[13].mxu0  ;;  %v1008_v14 = vsel %vm817_vm3, %v950_v10, -inf  ;;  %v1011_v19 = vsel %vm817_vm3, %v996_v11, -inf }
 0x25a   : > { %1009 = vmax.xlane.f32.xlu0 %v1008_v14  ;;  %v953_v15 = vpop.f32.mrb[10].mxu1  ;;  %v999_v16 = vpop.f32.mrb[14].mxu0 }
 0x25b   : > { %v1769_v17 = vpop.f32.mrb[11].mxu1  ;;  %v1775_v18 = vpop.f32.mrb[15].mxu0 }
 0x25e   : > { %1012 = vmax.xlane.f32.xlu0 %v1011_v19 }
 0x263   : > { %799 = vrot.lane.b32.xlu1 %v794_v33, %s1985_s29 }
 0x274   : > { %797 = vrot.lane.b32.xlu0 %v2189_v31, %s1983_s23  ;;  %s1987_s23 = smov 16  }
 0x2df   : > { %v1004_v20 = vpop.xlane.xlu0 %1003  ;;  %v1007_v21 = vpop.xlane.xlu1 %1006 }
 0x2e0   : > { %v1026_v22 = vsub.f32 %v858_v62, %v1004_v20  ;;  %v1027_v23 = vsub.f32 %v904_v63, %v1007_v21  ;;  %v1014_v51 = vsub.f32 -inf, %v1004_v20  ;;  %v1015_v52 = vsub.f32 -inf, %v1007_v21  ;;  %v1882_v20 = vld [vmem:[%s2370_s7 + $0x8] sm:$0xff]  }
 0x2e2   : > { %v1030_v24 = vmul.f32 1.442695, %v1026_v22  ;;  %v1032_v25 = vmul.f32 1.442695, %v1027_v23  ;;  %v1018_v53 = vmul.f32 1.442695, %v1014_v51 }
 0x2e3   : > { %v800_v33 = vpop.permute.xlu1 %799  ;;  %v1020_v54 = vmul.f32 1.442695, %v1015_v52 }
 0x2e4   : > { %1889 = vpow2.f32 %v1030_v24 }
 0x2e5   : > { %1891 = vpow2.f32 %v1032_v25 }
 0x2e7   : > { %v1010_v26 = vpop.xlane.xlu0 %1009 }
 0x2e8   : > { %v1028_v27 = vsub.f32 %v950_v10, %v1010_v26  ;;  %v1016_v55 = vsub.f32 -inf, %v1010_v26  ;;  %v1881_v10 = vld [vmem:[%s2370_s7] sm:$0xff]  }
 0x2ea   : > { %v1034_v28 = vmul.f32 1.442695, %v1028_v27  ;;  %v1022_v56 = vmul.f32 1.442695, %v1016_v55 }
 0x2eb   : > { %v1013_v29 = vpop.xlane.xlu0 %1012 }
 0x2ec   : > { %v1029_v30 = vsub.f32 %v996_v11, %v1013_v29  ;;  %1893 = vpow2.f32 %v1034_v28  ;;  %v1017_v57 = vsub.f32 -inf, %v1013_v29 }
 0x2ee   : > { %v1036_v32 = vmul.f32 1.442695, %v1029_v30  ;;  %v1890_v34 = vpop.eup %1889  ;;  %v1024_v59 = vmul.f32 1.442695, %v1017_v57 }
 0x2ef   : > { %v798_v35 = vpop.permute.xlu0 %797  ;;  %v1058_v36 = vpack.c.bf16 %v1890_v34, %v1890_v34  ;;  %v1892_v37 = vpop.eup %1891  ;;  %v1042_v44 = vsel %vm817_vm3, %v1890_v34, 0.0 }
 0x2f0   : > { %v806_v31 = vsel %vm752_vm2, %v798_v35, %v800_v33  ;;  %1895 = vpow2.f32 %v1036_v32  ;;  %v1045_v40 = vsel %vm817_vm3, %v1892_v37, 0.0  ;;  %v1059_v41 = vpack.c.bf16 %v1892_v37, %v1892_v37 }
 0x2f1   : > { %v1660_v38 = vcombine.low %v806_v31, %v806_v31  ;;  %v1661_v39 = vcombine.high %v806_v31, %v806_v31  ;;  %1779 = vmatmul.mubr.msk.bf16.vlgmr.msra.gmra.mrb[12].mxu1 %vm817_vm3, %v1058_v36  ;;  %1046 = vadd.xlane.f32.xlu1 %v1045_v40  ;;  %1897 = vpow2.f32 %v1018_v53  ;;  %v1670_v53 = vld [vmem:[%s2371_s8] ss:$0 sm:$0xff] }
 0x2f2   : > { %1790 = vmatprep.mubr.msk.bf16.mxu1 %vm1982_vm0, %v1981_v1  ;;  %1785 = vmatmul.mubr.msk.bf16.vlgmr.msra.gmra.mrb[16].mxu0 %vm817_vm3, %v1059_v41  ;;  %1899 = vpow2.f32 %v1020_v54 }
 0x2f3   : > { %v1158_v42 = vsel %vm752_vm2, %v1660_v38, 0  ;;  %v1204_v43 = vsel %vm752_vm2, %v1661_v39, 0  ;;  %1796 = vmatprep.mubr.msk.bf16.mxu0 %vm1982_vm0, %v1981_v1  ;;  %1901 = vpow2.f32 %v1022_v56 }
 0x2f4   : > { %1789 = vmatpush3.bf16.msra.mxu1 %v1158_v42  ;;  %1795 = vmatpush3.bf16.msra.mxu0 %v1204_v43  ;;  %1903 = vpow2.f32 %v1024_v59 }
 0x2f5   : > { %1800 = vmatprep.subr.bf16.mxu1 %v1981_v1  ;;  %1808 = vmatprep.subr.bf16.mxu0 %v1981_v1 }
 0x2f6   : > { %v1894_v45 = vpop.eup %1893  ;;  %1043 = vadd.xlane.f32.xlu1 %v1042_v44 }
 0x2f7   : > { %v1048_v46 = vsel %vm817_vm3, %v1894_v45, 0.0  ;;  %v1060_v47 = vpack.c.bf16 %v1894_v45, %v1894_v45 }
 0x2f8   : > { %1049 = vadd.xlane.f32.xlu0 %v1048_v46 }
 0x2f9   : > { %1791 = vmatmul.mubr.msk.bf16.vlgmr.msra.gmra.mrb[16].mxu1 %vm817_vm3, %v1060_v47 }
 0x2fa   : > { %v1896_v48 = vpop.eup %1895  ;;  %1804 = vmatprep.mubr.msk.bf16.mxu1 %vm1982_vm0, %v1981_v1  ;;  %1801 = vmatpush3.bf16.msra.mxu1 %v1881_v10 }
 0x2fb   : > { %v1051_v49 = vsel %vm817_vm3, %v1896_v48, 0.0  ;;  %v1061_v50 = vpack.c.bf16 %v1896_v48, %v1896_v48  ;;  %v1898_v60 = vpop.eup %1897  ;;  %1802 = vmatprep.subr.bf16.mxu1 %v1981_v1 }
 0x2fc   : > { %1052 = vadd.xlane.f32.xlu0 %v1051_v49  ;;  %v1900_v61 = vpop.eup %1899  ;;  %v1038_v63 = vmul.f32 0.0, %v1898_v60 }
 0x2fd   : > { %1797 = vmatmul.mubr.msk.bf16.vlgmr.msra.gmra.mrb[20].mxu0 %vm817_vm3, %v1061_v50  ;;  %v1039_v0 = vmul.f32 0.0, %v1900_v61  ;;  %v1902_v4 = vpop.eup %1901 }
 0x2fe   : > { %1812 = vmatprep.mubr.msk.bf16.mxu0 %vm1982_vm0, %v1981_v1  ;;  %v1040_v7 = vmul.f32 0.0, %v1902_v4  ;;  %v1904_v8 = vpop.eup %1903  ;;  %1803 = vmatpush3.bf16.msra.mxu1 %v1882_v20  ;;  %v1884_v4 = vld [vmem:[%s2372_s9 + $0x8] sm:$0xff]  }
 0x2ff   : > { %v1041_v12 = vmul.f32 0.0, %v1904_v8  ;;  %1816 = vmatprep.subr.bf16.mxu1 %v1981_v1 }
 0x37e   : > { %v1047_v58 = vpop.xlane.xlu1 %1046 }
 0x37f   : > { %v1055_v3 = vadd.f32 %v1047_v58, %v1039_v0 }
 0x383   : > { %v1044_v62 = vpop.xlane.xlu1 %1043 }
 0x384   : > { %v1054_v2 = vadd.f32 %v1044_v62, %v1038_v63 }
 0x385   : > { %v1050_v5 = vpop.xlane.xlu0 %1049 }
 0x386   : > { %1905 = vrcp.f32 %v1054_v2  ;;  %v1056_v9 = vadd.f32 %v1050_v5, %v1040_v7  ;;  %v1886_v5 = vld [vmem:[%s2374_s11 + $0x8] sm:$0xff]  }
 0x387   : > { %1907 = vrcp.f32 %v1055_v3  ;;  %v1883_v3 = vld [vmem:[%s2372_s9] sm:$0xff]  }
 0x388   : > { %1909 = vrcp.f32 %v1056_v9  ;;  %1809 = vmatpush3.bf16.msra.mxu0 %v1883_v3 }
 0x389   : > { %v1053_v11 = vpop.xlane.xlu0 %1052  ;;  %1810 = vmatprep.subr.bf16.mxu0 %v1981_v1 }
 0x38a   : > { %v1057_v13 = vadd.f32 %v1053_v11, %v1041_v12  ;;  %v1674_v11 = vld [vmem:[%s2376_s13] ss:$0 sm:$0xff] }
 0x38c   : > { %1911 = vrcp.f32 %v1057_v13  ;;  %1811 = vmatpush3.bf16.msra.mxu0 %v1884_v4  ;;  %v1675_v13 = vld [vmem:[%s2377_s14] ss:$0 sm:$0xff] }
 0x390   : > { %v1906_v17 = vpop.eup %1905 }
 0x391   : > { %v1908_v25 = vpop.eup %1907 }
 0x392   : > { %v1910_v33 = vpop.eup %1909 }
 0x396   : > { %v1912_v41 = vpop.eup %1911 }
 0x3c4   : > { %v1102_v14 = vpop.f32.mrb[12].mxu1 }
 0x3c5   : > { %v1246_v15 = vadd.f32 %v1102_v14, %v1038_v63  ;;  %v1780_v16 = vpop.f32.mrb[13].mxu1  ;;  %v1148_v18 = vpop.f32.mrb[16].mxu0 }
 0x3c6   : > { %v1105_v19 = vpop.f32.mrb[14].mxu1  ;;  %v1247_v22 = vadd.f32 %v1148_v18, %v1039_v0  ;;  %v1786_v23 = vpop.f32.mrb[17].mxu0  ;;  %v1888_v18 = vld [vmem:[%s2374_s11 + $0x18] sm:$0xff]  }
 0x3c7   : > { %v1254_v21 = vmul.f32 %v1906_v17, %v1246_v15  ;;  %v1781_v24 = vpop.f32.mrb[15].mxu1  ;;  %v1151_v26 = vpop.f32.mrb[18].mxu0  ;;  %v1887_v17 = vld [vmem:[%s2374_s11 + $0x10] sm:$0xff]   ;;  %v1676_v19 = vld [vmem:[%s2373_s10] ss:$0 sm:$0xff] }
 0x3c8   : > { %v1255_v27 = vmul.f32 %v1908_v25, %v1247_v22  ;;  %v1787_v28 = vpop.f32.mrb[19].mxu0 }
 0x3c9   : > { %v1258_v48 = vpack.c.bf16 %v1254_v21, %v1254_v21 }
 0x3ca   : > { %v1259_v29 = vpack.c.bf16 %v1255_v27, %v1255_v27 }
 0x3cc   : > { %v1194_v30 = vpop.f32.mrb[16].mxu1  ;;  %1263 = vrot.lane.b32.xlu0 %v1259_v29, %s1986_s20 }
 0x3cd   : > { %v1248_v32 = vadd.f32 %v1194_v30, %v1040_v7  ;;  %v1792_v34 = vpop.f32.mrb[17].mxu1 }
 0x3ce   : > { %v1197_v35 = vpop.f32.mrb[18].mxu1 }
 0x3cf   : > { %v1256_v31 = vmul.f32 %v1910_v33, %v1248_v32  ;;  %v1793_v36 = vpop.f32.mrb[19].mxu1 }
 0x3d0   : > { %v1240_v37 = vpop.f32.mrb[20].mxu0 }
 0x3d1   : > { %v1260_v38 = vpack.c.bf16 %v1256_v31, %v1256_v31  ;;  %v1249_v39 = vadd.f32 %v1240_v37, %v1041_v12  ;;  %v1798_v40 = vpop.f32.mrb[21].mxu0 }
 0x3d2   : > { %v1243_v42 = vpop.f32.mrb[22].mxu0 }
 0x3d3   : > { %v1257_v43 = vmul.f32 %v1912_v41, %v1249_v39  ;;  %1266 = vrot.lane.b32.xlu1 %v1260_v38, %s1987_s23  ;;  %v1799_v44 = vpop.f32.mrb[23].mxu0  ;;  %s1689_s23 = sshll.u32 %s2101_s28, 7  ;;  %s1989_s28 = smov [#allocation2]  }
 0x3d4   : > { %s2320_s4 = scalar_lea.hbm %s2380_s17, %s1689_s23 }
 0x3d5   : > { %v1261_v45 = vpack.c.bf16 %v1257_v43, %v1257_v43  ;;  %v1686_v43 = vld [vmem:[%s2378_s15] ss:$0 sm:$0xff] }
 0x3d7   : > { %1269 = vrot.lane.b32.xlu1 %v1261_v45, %s1988_s19  ;;  %v1687_v45 = vld [vmem:[%s2379_s16] ss:$0 sm:$0xff]  ;;  %s539_s19 = scalar_lea.vmem [#allocation2], %s1636_s22  ;;  %s1921_s22 = sshll.u32 %s1989_s28, 4  ;;  %s1922_s22 = int_to_ptr.vmem [resolvable:$false] %s1921_s22 }
 0x3d8   : > { %s1573_s29 = sshll.u32 %s539_s19, 4  ;;  %s1923_s0 = scalar_lea.vmem %s1922_s22, 256  ;;  %s2322_s29 = int_to_ptr.vmem [resolvable:$true] %s1573_s29 }
 0x3d9   : > { %s1917_s26 = scalar_lea.vmem %s2322_s29, 128  ;;  %p1924_p0 = scmp.lt.s32.totalorder %s2322_s29, %s1922_s22 }
 0x3da   : > { %p1918_p11 = scmp.ne.s32.totalorder %s2322_s29, %s1917_s26  ;;  %p1925_p1 = scmp.lt.s32.totalorder %s1923_s0, %s1917_s26 }
 0x3dc   : > { %p1919_p12 = pnand %p1918_p11, %p2118_p5  ;;  %p1926_p2 = por %p1925_p1, %p1924_p0 }
 0x3de   : > { %p1920_p13 = pneg %p1919_p12 }
 0x3e0   : > { %p1927_p3 = pnand %p1926_p2, %p1920_p13 }
 0x43e   : > { %v1264_v46 = vpop.permute.xlu0 %1263 }
 0x43f   : > { %v1273_v49 = vsel %vm817_vm3, %v1258_v48, %v1264_v46 }
 0x445   : > { %v1267_v47 = vpop.permute.xlu1 %1266 }
 0x446   : > { %v1276_v50 = vsel %vm1274_vm4, %v1273_v49, %v1267_v47 }
 0x449   : > { %v1270_v51 = vpop.permute.xlu1 %1269 }
 0x44a   : > { %v1279_v52 = vsel %vm1277_vm5, %v1276_v50, %v1270_v51 }
 0x44b   : > { %1805 = vmatmul.mubr.msk.bf16.vlgmr.msra.gmra.mrb[20].mxu1 %vm570_vm1, %v1279_v52 }
 0x44c   : > { %1824 = vmatprep.mubr.msk.bf16.mxu1 %vm1982_vm0, %v1981_v1 }
 0x51e   : > { %v1339_v54 = vpop.f32.mrb[20].mxu1 }
 0x51f   : > { %v1340_v55 = vadd.f32 %v1670_v53, %v1339_v54  ;;  %v1806_v56 = vpop.f32.mrb[21].mxu1 }
 0x520   : > { %v1342_v57 = vpop.f32.mrb[22].mxu1 }
 0x521   : > { %v1807_v58 = vpop.f32.mrb[23].mxu1  ;;  %v1345_v59 = vadd.f32 %v1340_v55, %v2157_v6  ;;  %v1885_v6 = vld [vmem:[%s2374_s11] sm:$0xff]  }
 0x522   : > { %1817 = vmatpush3.bf16.msra.mxu1 %v1885_v6 }
 0x523   : > { %v1346_v60 = vsel %vm570_vm1, %v1345_v59, 0.0  ;;  %1818 = vmatprep.subr.bf16.mxu1 %v1981_v1 }
 0x524   : > { %1347 = vadd.xlane.f32.xlu0 %v1346_v60 }
 0x526   : > { %1819 = vmatpush3.bf16.msra.mxu1 %v1886_v5 }
 0x527   : > { %1820 = vmatprep.subr.bf16.mxu1 %v1981_v1 }
 0x52a   : > { %1821 = vmatpush3.bf16.msra.mxu1 %v1887_v17 }
 0x52b   : > { %1822 = vmatprep.subr.bf16.mxu1 %v1981_v1  ;;  %v1680_v1 = vld [vmem:[%s2375_s12] ss:$0 sm:$0xff] }
 0x52e   : > { %1823 = vmatpush3.bf16.msra.mxu1 %v1888_v18 }
 0x5b1   : > { %v1348_v61 = vpop.xlane.xlu0 %1347 }
 0x5b2   : > { %v1350_v62 = vmul.f32 0.03125, %v1348_v61 }
 0x5b4   : > { %v1351_v63 = vsub.f32 %v1345_v59, %v1350_v62 }
 0x5b6   : > { %v1352_v0 = vmul.f32 %v1351_v63, %v1351_v63 }
 0x5b8   : > { %v1353_v2 = vsel %vm570_vm1, %v1352_v0, 0.0 }
 0x5b9   : > { %1354 = vadd.xlane.f32.xlu1 %v1353_v2 }
 0x646   : > { %v1355_v7 = vpop.xlane.xlu1 %1354 }
 0x647   : > { %v1356_v8 = vmul.f32 0.03125, %v1355_v7 }
 0x649   : > { %v1357_v9 = vadd.f32 1e-05, %v1356_v8 }
 0x64b   : > { %1913 = vrsqrt.f32 %v1357_v9 }
 0x655   : > { %v1914_v10 = vpop.eup %1913 }
 0x656   : > { %v1359_v12 = vmul.f32 %v1914_v10, %v1351_v63 }
 0x658   : > { %v1367_v14 = vmul.f32 %v1674_v11, %v1359_v12 }
 0x65a   : > { %v1375_v15 = vadd.f32 %v1675_v13, %v1367_v14 }
 0x65c   : > { %v1376_v16 = vpack.c.bf16 %v1375_v15, %v1375_v15 }
 0x65e   : > { %1813 = vmatmul.mubr.msk.bf16.vlgmr.msra.gmra.mrb[24].mxu0 %vm570_vm1, %v1376_v16 }
 0x731   : > { %v1437_v20 = vpop.f32.mrb[24].mxu0 }
 0x732   : > { %v1438_v21 = vadd.f32 %v1676_v19, %v1437_v20  ;;  %v1814_v22 = vpop.f32.mrb[25].mxu0 }
 0x733   : > { %v1440_v23 = vpop.f32.mrb[26].mxu0 }
 0x734   : > { %v1443_v24 = vmax.f32 %v1438_v21, 0.0  ;;  %v1815_v25 = vpop.f32.mrb[27].mxu0 }
 0x736   : > { %v1444_v26 = vpack.c.bf16 %v1443_v24, %v1443_v24 }
 0x738   : > { %1825 = vmatmul.mubr.msk.bf16.vlgmr.msra.gmra.mrb[24].mxu1 %vm1484_vm6, %v1444_v26 }
 0x80b   : > { %v1522_v27 = vpop.f32.mrb[24].mxu1 }
 0x80c   : > { %v1523_v28 = vadd.f32 %v1680_v1, %v1522_v27  ;;  %v1826_v29 = vpop.f32.mrb[25].mxu1 }
 0x80d   : > { %v1525_v30 = vpop.f32.mrb[26].mxu1 }
 0x80e   : > { %v1827_v32 = vpop.f32.mrb[27].mxu1  ;;  %v1528_v34 = vadd.f32 %v1523_v28, %v1375_v15 }
 0x810   : > { %v1529_v33 = vsel %vm570_vm1, %v1528_v34, 0.0 }
 0x811   : > { %1530 = vadd.xlane.f32.xlu0 %v1529_v33 }
 0x89e   : > { %v1531_v35 = vpop.xlane.xlu0 %1530 }
 0x89f   : > { %v1532_v31 = vmul.f32 0.03125, %v1531_v35 }
 0x8a1   : > { %v1533_v36 = vsub.f32 %v1528_v34, %v1532_v31 }
 0x8a3   : > { %v1534_v37 = vmul.f32 %v1533_v36, %v1533_v36 }
 0x8a5   : > { %v1535_v38 = vsel %vm570_vm1, %v1534_v37, 0.0 }
 0x8a6   : > { %1536 = vadd.xlane.f32.xlu0 %v1535_v38 }
 0x933   : > { %v1537_v39 = vpop.xlane.xlu0 %1536 }
 0x934   : > { %v1538_v40 = vmul.f32 0.03125, %v1537_v39 }
 0x936   : > { %v1539_v41 = vadd.f32 1e-05, %v1538_v40 }
 0x938   : > { %1915 = vrsqrt.f32 %v1539_v41 }
 0x942   : > { %v1916_v42 = vpop.eup %1915 }
 0x943   : > { %v1541_v44 = vmul.f32 %v1916_v42, %v1533_v36 }
 0x945   : > { %v1549_v46 = vmul.f32 %v1686_v43, %v1541_v44 }
 0x947   : > { %v1557_v47 = vadd.f32 %v1687_v45, %v1549_v46 }
 0x949   : > { %1558 = vst.msk [vmem:[%s539_s19] sm:$0xff] %vm570_vm1, %v1557_v47 }
 0x94a   : > { %1930 = shalt.err (!%p1927_p3)
}
 0x94b   : > { %s1931_s2 = scalar_lea.hbm %s2320_s4, 128  ;;  %s1935_s23 = scalar_lea.hbm %s2380_s17, 256 }
 0x94c   : > { %p1932_p4 = scmp.ne.s32.totalorder %s2320_s4, %s1931_s2  ;;  %p1936_p9 = scmp.lt.u32.totalorder %s2320_s4, %s2380_s17 }
 0x94d   : > { %p1937_p10 = scmp.lt.u32.totalorder %s1935_s23, %s1931_s2  ;;  %p1939_p12 = scmp.lt.u32.totalorder %s1931_s2, %s2320_s4 }
 0x94e   : > { %p1933_p7 = pnand %p1932_p4, %p2118_p5 }
 0x94f   : > { %p1938_p11 = por %p1937_p10, %p1936_p9 }
 0x950   : > { %p1934_p8 = pneg %p1933_p7 }
 0x951   : > { %p1940_p13 = por %p1939_p12, %p1938_p11 }
 0x953   : > { %p1941_p0 = pnand %p1940_p13, %p1934_p8 }
 0x955   : > { %1944 = shalt.err (!%p1941_p0)
}
 0x956   : > { %1828 = dma.vmem_to_hbm [thread:$0]  (%p2118_p5), %s2322_s29, 128, %s2320_s4, %s1560_s3  }
 0x957 PF: > { %p1834_p1 = scmp.ge.s32.totalorder %s1979_s27, 2  ;;  %s1585_s28 = sand.u32 1, %s1967_s24  }
 0x958   : > { %s1586_s22 = scalar_lea.sflag [#allocation3], %s1585_s28 }
 0x959   : > { %p1831_p2 = pnand %p1834_p1, %p2122_p6 }
 0x95b   : > { %1962 = dma.done.wait (!%p1831_p2), %s1586_s22, 128  }
 0x95c   : > { %1964 = vsyncadd (!%p1831_p2), %s1586_s22, 4294967168  ;;  %s2403_s27 = sld [smem:[#allocation6_spill]]  ;;  %s2404_s0 = sld [smem:[#allocation5_spill]] }
 0x95d   : > { %s2405_s26 = sld [smem:[#allocation7_spill]]  ;;  %s2406_s24 = smov %s1971_s25 }
 0x962   : > { %p27_p3 = scmp.ge.s32.totalorder %s2403_s27, 4   ;;  %s2407_s25 = smov %s2404_s0 }
 0x964   :  { %29 = sbr.rel (!%p27_p3) target bundleno = 9 (0x9), region = 123 }
 0x96b   :  { %1591 = vsyncpa [#allocation3], 1 }
 0x96c   :  { %1593 = vsyncpa [#allocation3 + $0x1], 1 }

// kernel: encoder_forward.2
= control target key start
LH: loop header
LB: loop body
LE: loop exit
PB: predicated region body
PF: predicated region fallthrough
CT: control target
= control target key end

     0   :  { %s2571_s0 = inlined_call_operand.vmem [shape: f32[2,8,32], index: 0, kind: input, shape index: {}]   ;;  %s2572_s1 = inlined_call_operand.vmem [shape: bf16[32,32], index: 1, kind: input, shape index: {}]   ;;  %s2573_s2 = inlined_call_operand.vmem [shape: f32[1,32], index: 2, kind: input, shape index: {}]   ;;  %s2574_s3 = inlined_call_operand.vmem [shape: bf16[32,32], index: 3, kind: input, shape index: {}]   ;;  %s2575_s4 = inlined_call_operand.vmem [shape: f32[1,32], index: 4, kind: input, shape index: {}]   ;;  %s2576_s5 = inlined_call_operand.hbm [shape: bf16[32,32], index: 5, kind: input, shape index: {}]   ;;  %s2577_s6 = inlined_call_operand.hbm [shape: f32[1,32], index: 6, kind: input, shape index: {}]   ;;  %s2578_s7 = inlined_call_operand.hbm [shape: bf16[32,32], index: 7, kind: input, shape index: {}]   ;;  %s2579_s8 = inlined_call_operand.hbm [shape: f32[1,32], index: 8, kind: input, shape index: {}]   ;;  %s2580_s9 = inlined_call_operand.vmem [shape: bf16[32,64], index: 9, kind: input, shape index: {}]   ;;  %s2581_s10 = inlined_call_operand.vmem [shape: f32[1,64], index: 10, kind: input, shape index: {}]   ;;  %s2582_s11 = inlined_call_operand.vmem [shape: bf16[64,32], index: 11, kind: input, shape index: {}]   ;;  %s2583_s12 = inlined_call_operand.vmem [shape: f32[1,32], index: 12, kind: input, shape index: {}]   ;;  %s2584_s13 = inlined_call_operand.vmem [shape: f32[1,32], index: 13, kind: input, shape index: {}]   ;;  %s2585_s14 = inlined_call_operand.vmem [shape: f32[1,32], index: 14, kind: input, shape index: {}]   ;;  %s2586_s15 = inlined_call_operand.vmem [shape: f32[1,32], index: 15, kind: input, shape index: {}]   ;;  %s2587_s16 = inlined_call_operand.vmem [shape: f32[1,32], index: 16, kind: input, shape index: {}]   ;;  %s2588_s17 = inlined_call_operand.vmem [shape: f32[2,8,32], index: 17, kind: output, shape index: {}]  }
   0x1   :  { %2593 = sst [smem:[#allocation13_spill]] %s2571_s0 }
   0x2   :  { %2594 = sst [smem:[#allocation14_spill]] %s2572_s1 }
   0x3   :  { %2595 = sst [smem:[#allocation15_spill]] %s2577_s6 }
   0x4   :  { %2596 = sst [smem:[#allocation16_spill]] %s2587_s16 }
   0x5   :  { %2597 = sst [smem:[#allocation17_spill]] %s2588_s17 }
   0x6   :  { %22 = vsyncpa [#allocation3], 0 }
   0x7   :  { %23 = vsyncpa [#allocation5], 0 }
   0x8   :  { %24 = vsyncpa [#allocation8], 0  ;;  %s2248_s24 = smov 0  }
   0x9 LB: > { %2598 = sst [smem:[#allocation12_spill]] %s2142_s24  ;;  %s2144_s25 = smov [#allocation4]   ;;  %s2142_s24 = sphi %s2248_s24, %s30_s24  }
   0xa   : > { %s461_s26 = sshll.u32 %s2144_s25, 4  ;;  %s2254_s27 = sadd.s32 4294967295, %s2142_s24   ;;  %s2259_s26 = int_to_ptr.vmem [resolvable:$true] %s461_s26 }
   0xb   : > { %p1710_p0 = scmp.ge.s32.totalorder %s2142_s24, 1  ;;  %p423_p1 = scmp.lt.s32.totalorder %s2142_s24, 3 }
   0xc   : > { %p2591_p2 = scmp.eq.s32.totalorder %s2254_s27, 0  ;;  %s2145_s29 = smov [#allocation2]  }
   0xd   : > { %p2261_p3 = pnand %p1710_p0, %p423_p1  ;;  %s447_s0 = sshll.u32 %s2145_s29, 4  ;;  %s2267_s0 = int_to_ptr.vmem [resolvable:$true] %s447_s0 }
   0xe   : > { %s2146_s18 = smov [#allocation6]   ;;  %s2147_s1 = smov [#allocation7]  }
   0xf   : > { %s2599_s28 = scalar_select %p2261_p3, 1, 0 }
  0x10   : > { %p1927_p4 = pneg %p2261_p3  ;;  %s471_s19 = sshll.u32 %s2146_s18, 4  ;;  %s2275_s19 = int_to_ptr.vmem [resolvable:$true] %s471_s19 }
  0x11   : > { %s2277_s20 = sshll.u32 %s2147_s1, 4  ;;  %s2601_s6 = sld [smem:[#allocation15_spill]]  ;;  %s486_s20 = int_to_ptr.vmem [resolvable:$true] %s2277_s20 }
  0x12   : > { %p2271_p5 = pnand %p2591_p2, %p1927_p4 }
  0x14   : > { %p2287_p7 = pneg %p2271_p5 }
  0x17   : > { %s2012_s23 = scalar_lea.hbm %s2601_s6, 16 }
  0x18   : > { %p2013_p6 = scmp.ne.s32.totalorder %s2601_s6, %s2012_s23  ;;  %p2019_p10 = scmp.lt.u32.totalorder %s2012_s23, %s2601_s6 }
  0x1a   : > { %p2015_p8 = pnand %p2287_p7, %p2013_p6 }
  0x1c   : > { %p2016_p9 = pneg %p2015_p8 }
  0x1e   : > { %p2021_p11 = pnand %p2019_p10, %p2016_p9 }
  0x20   : > { %2024 = shalt.err (!%p2021_p11)
}
  0x21   : > { %s2025_s21 = scalar_lea.vmem %s2259_s26, 16  ;;  %s2032_s22 = scalar_lea.vmem %s2259_s26, 32 }
  0x22   : > { %p2026_p12 = scmp.ne.s32.totalorder %s2259_s26, %s2025_s21  ;;  %p2033_p1 = scmp.lt.s32.totalorder %s2259_s26, %s2259_s26 }
  0x23   : > { %p2034_p4 = scmp.lt.s32.totalorder %s2032_s22, %s2025_s21 }
  0x24   : > { %p2028_p13 = pnand %p2026_p12, %p2287_p7 }
  0x25   : > { %p2035_p6 = por %p2034_p4, %p2033_p1 }
  0x26   : > { %p2029_p0 = pneg %p2028_p13 }
  0x28   : > { %p2036_p8 = pnand %p2035_p6, %p2029_p0 }
  0x2a   : > { %2039 = shalt.err (!%p2036_p8)
}
  0x2b   : > { %1933 = dma.hbm_to_vmem [thread:$0]  (!%p2271_p5), %s2601_s6, 16, %s2259_s26, [#allocation5]  }
  0x2c   : > { %s2040_s1 = scalar_lea.hbm %s2576_s5, 256 }
  0x2d   : > { %p2041_p9 = scmp.ne.s32.totalorder %s2576_s5, %s2040_s1  ;;  %p2047_p12 = scmp.lt.u32.totalorder %s2040_s1, %s2576_s5 }
  0x2f   : > { %p2043_p10 = pnand %p2041_p9, %p2287_p7 }
  0x31   : > { %p2044_p11 = pneg %p2043_p10 }
  0x33   : > { %p2049_p13 = pnand %p2047_p12, %p2044_p11 }
  0x35   : > { %2052 = shalt.err (!%p2049_p13)
}
  0x36   : > { %s2053_s26 = scalar_lea.vmem %s2267_s0, 256  ;;  %p2061_p6 = scmp.lt.s32.totalorder %s2267_s0, %s2267_s0 }
  0x37   : > { %p2054_p0 = scmp.ne.s32.totalorder %s2267_s0, %s2053_s26  ;;  %p2062_p8 = scmp.lt.s32.totalorder %s2053_s26, %s2053_s26 }
  0x39   : > { %p2056_p1 = pnand %p2054_p0, %p2287_p7  ;;  %p2063_p9 = por %p2062_p8, %p2061_p6 }
  0x3b   : > { %p2057_p4 = pneg %p2056_p1 }
  0x3d   : > { %p2064_p10 = pnand %p2063_p9, %p2057_p4 }
  0x3f   : > { %2067 = shalt.err (!%p2064_p10)
}
  0x40   : > { %s2148_s16 = smov 64   ;;  %s2149_s17 = smov 4  }
  0x41   : > { %1930 = dma.hbm_to_vmem [thread:$0]  (!%p2271_p5), %s2576_s5, 256, %s2267_s0, [#allocation3], %s2148_s16, %s2148_s16, %s2149_s17  }
  0x42   : > { %s2068_s1 = scalar_lea.hbm %s2578_s7, 256 }
  0x43   : > { %p2069_p11 = scmp.ne.s32.totalorder %s2578_s7, %s2068_s1  ;;  %p2075_p0 = scmp.lt.u32.totalorder %s2068_s1, %s2578_s7 }
  0x45   : > { %p2071_p12 = pnand %p2069_p11, %p2287_p7 }
  0x47   : > { %p2072_p13 = pneg %p2071_p12 }
  0x49   : > { %p2077_p1 = pnand %p2075_p0, %p2072_p13 }
  0x4b   : > { %2080 = shalt.err (!%p2077_p1)
}
  0x4c   : > { %s2081_s0 = scalar_lea.vmem %s2275_s19, 256  ;;  %p2089_p9 = scmp.lt.s32.totalorder %s2275_s19, %s2275_s19 }
  0x4d   : > { %p2082_p4 = scmp.ne.s32.totalorder %s2275_s19, %s2081_s0  ;;  %p2090_p10 = scmp.lt.s32.totalorder %s2081_s0, %s2081_s0 }
  0x4f   : > { %p2084_p6 = pnand %p2082_p4, %p2287_p7  ;;  %p2091_p11 = por %p2090_p10, %p2089_p9 }
  0x51   : > { %p2085_p8 = pneg %p2084_p6 }
  0x53   : > { %p2092_p12 = pnand %p2091_p11, %p2085_p8 }
  0x55   : > { %2095 = shalt.err (!%p2092_p12)
}
  0x56   : > { %1936 = dma.hbm_to_vmem [thread:$0]  (!%p2271_p5), %s2578_s7, 256, %s2275_s19, [#allocation5], %s2148_s16, %s2148_s16, %s2149_s17  }
  0x57   : > { %s2096_s18 = scalar_lea.hbm %s2579_s8, 16 }
  0x58   : > { %p2097_p13 = scmp.ne.s32.totalorder %s2579_s8, %s2096_s18  ;;  %p2103_p4 = scmp.lt.u32.totalorder %s2096_s18, %s2579_s8 }
  0x5a   : > { %p2099_p0 = pnand %p2097_p13, %p2287_p7 }
  0x5c   : > { %p2100_p1 = pneg %p2099_p0 }
  0x5e   : > { %p2105_p6 = pnand %p2103_p4, %p2100_p1 }
  0x60   : > { %2108 = shalt.err (!%p2105_p6)
}
  0x61   : > { %s2109_s0 = scalar_lea.vmem %s486_s20, 16  ;;  %s2116_s19 = scalar_lea.vmem %s486_s20, 32 }
  0x62   : > { %p2110_p8 = scmp.ne.s32.totalorder %s486_s20, %s2109_s0  ;;  %p2117_p11 = scmp.lt.s32.totalorder %s486_s20, %s486_s20 }
  0x63   : > { %p2118_p12 = scmp.lt.s32.totalorder %s2116_s19, %s2109_s0 }
  0x64   : > { %p2112_p9 = pnand %p2110_p8, %p2287_p7 }
  0x65   : > { %p2119_p2 = por %p2118_p12, %p2117_p11 }
  0x66   : > { %p2113_p10 = pneg %p2112_p9 }
  0x68   : > { %p2120_p3 = pnand %p2119_p2, %p2113_p10 }
  0x6a   : > { %2123 = shalt.err (!%p2120_p3)
}
  0x6b   : > { %1939 = dma.hbm_to_vmem [thread:$0]  (!%p2271_p5), %s2579_s8, 16, %s486_s20, [#allocation8]  }
  0x6c   : > { %p2603_p13 = scmp.ne.s32.totalorder %s2599_s28, 0 }
  0x6d   : > { %p2604_p0 = scmp.eq.s32.totalorder (!%p2603_p13), %s2254_s27, 0 }
  0x6e   : > { %529 = sbr.rel (%p2603_p13) target bundleno = 2476 (0x9ac), region = 88 }
  0x75   : > { %2129 = dma.done.wait (%p2604_p0), [#allocation3], 256   ;;  %p2605_p7 = pmov %p2604_p0 }
  0x76   : > { %p2606_p1 = pmov %p2604_p0 }
  0x77   : > { %2131 = vsyncadd (%p2605_p7), [#allocation3], 4294967040 }
  0x78   : > { %2133 = dma.done.wait (%p2606_p1), [#allocation5], 272   ;;  %p2607_p2 = pmov %p2604_p0 }
  0x79   : > { %p2608_p3 = pmov %p2604_p0 }
  0x7a   : > { %2135 = vsyncadd (%p2607_p2), [#allocation5], 4294967024 }
  0x7b   : > { %2137 = dma.done.wait (%p2608_p3), [#allocation8], 16   ;;  %p2609_p5 = pmov %p2604_p0 }
  0x7c   : > { %p591_p4 = scmp.lt.s32.totalorder %s2254_s27, 1  ;;  %v2150_v0 = vmov 0.0   ;;  %vm2151_vm0 = vmmov 0   ;;  %v1970_v1 = vld [vmem:[%s2574_s3] sm:$0xff]   ;;  %s2610_s23 = sld [smem:[#allocation14_spill]]  ;;  %v1972_v3 = vld [vmem:[%s2574_s3 + $0x8] sm:$0xff]  }
  0x7d   : > { %2139 = vsyncadd (%p2609_p5), [#allocation8], 4294967280  ;;  %1819 = vmatprep.subr.bf16.mxu1 %v2150_v0  ;;  %1811 = vmatprep.subr.bf16.mxu0 %v2150_v0  ;;  %s2611_s18 = sld [smem:[#allocation13_spill]]  ;;  %vm625_vm1 = vcmask 261120   ;;  %v1974_v7 = vld [vmem:[#allocation2] sm:$0xff]   ;;  %v1975_v8 = vld [vmem:[#allocation2 + $0x8] sm:$0xff]  }
  0x7e   : > { %1823 = vmatprep.mubr.msk.bf16.mxu1 %vm2151_vm0, %v2150_v0  ;;  %s2616_s27 = smov (!%p591_p4, %s2254_s27), 1  ;;  %1815 = vmatprep.mubr.msk.bf16.mxu0 %vm2151_vm0, %v2150_v0  ;;  %v1727_v9 = vld [vmem:[%s2575_s4] ss:$0 sm:$0xff]  ;;  %s2152_s30 = smov 112   ;;  %v1731_v26 = vld [vmem:[#allocation4] ss:$0 sm:$0xff] }
  0x7f   : > { %s1721_s24 = sshll.u32 %s2616_s27, 3  ;;  %1820 = vmatpush3.bf16.msra.mxu1 %v1970_v1  ;;  %v1723_v10 = vld [vmem:[%s2573_s2] ss:$0 sm:$0xff]  ;;  %s2153_s20 = smov 120   ;;  %vm807_vm2 = vcmask 1043456   ;;  %vm872_vm3 = vcmask 64512  }
  0x80   : > { %1821 = vmatprep.subr.bf16.mxu1 %v2150_v0  ;;  %s2154_s6 = smov 104   ;;  %s2155_s25 = smov 8   ;;  %vm1329_vm4 = vcmask 130048   ;;  %vm1332_vm5 = vcmask 195584   ;;  %vm1539_vm6 = vcmask 523264  }
  0x81   : > { %s2156_s29 = smov 16  }
  0x82   : > { %v1971_v2 = vld [vmem:[%s2610_s23] sm:$0xff]   ;;  %v1973_v4 = vld [vmem:[%s2610_s23 + $0x8] sm:$0xff]  }
  0x83   : > { %s594_s1 = scalar_lea.vmem %s2611_s18, %s1721_s24  ;;  %1812 = vmatpush3.bf16.msra.mxu0 %v1971_v2  ;;  %1822 = vmatpush3.bf16.msra.mxu1 %v1972_v3  ;;  %s2157_s18 = smov 24  }
  0x84   : > { %1813 = vmatprep.subr.bf16.mxu0 %v2150_v0  ;;  %v2418_v5 = vld [vmem:[%s594_s1] sm:$0xff]  ;;  %1835 = vmatprep.subr.bf16.mxu1 %v2150_v0 }
  0x85   : > { %v601_v6 = vpack.c.bf16 %v2418_v5, %v2418_v5 }
  0x87   : > { %1814 = vmatpush3.bf16.msra.mxu0 %v1973_v4  ;;  %1824 = vmatmul.mubr.msk.bf16.vlgmr.msra.gmra.mrb[0].mxu1 %vm625_vm1, %v601_v6 }
  0x88   : > { %1827 = vmatprep.subr.bf16.mxu0 %v2150_v0  ;;  %1837 = vmatprep.mubr.msk.bf16.mxu1 %vm2151_vm0, %v2150_v0 }
  0x8a   : > { %1816 = vmatmul.mubr.msk.bf16.vlgmr.msra.gmra.mrb[0].mxu0 %vm625_vm1, %v601_v6 }
  0x8b   : > { %1828 = vmatpush3.bf16.msra.mxu0 %v1974_v7  ;;  %1831 = vmatprep.mubr.msk.bf16.mxu0 %vm2151_vm0, %v2150_v0 }
  0x8c   : > { %1829 = vmatprep.subr.bf16.mxu0 %v2150_v0 }
  0x8f   : > { %1830 = vmatpush3.bf16.msra.mxu0 %v1975_v8 }
  0x90   : > { %1841 = vmatprep.subr.bf16.mxu0 %v2150_v0 }
  0x92   : > { %1832 = vmatmul.mubr.msk.bf16.vlgmr.msra.gmra.mrb[4].mxu0 %vm625_vm1, %v601_v6 }
  0x93   : > { %1843 = vmatprep.mubr.msk.bf16.mxu0 %vm2151_vm0, %v2150_v0 }
 0x15a   : > { %v728_v11 = vpop.f32.mrb[0].mxu1 }
 0x15b   : > { %v729_v12 = vadd.f32 %v1727_v9, %v728_v11  ;;  %v1825_v13 = vpop.f32.mrb[1].mxu1 }
 0x15c   : > { %v731_v16 = vpop.f32.mrb[2].mxu1 }
 0x15d   : > { %v663_v14 = vpop.f32.mrb[0].mxu0  ;;  %v734_v18 = vpack.c.bf16 %v729_v12, %v729_v12  ;;  %v1826_v19 = vpop.f32.mrb[3].mxu1 }
 0x15e   : > { %v664_v15 = vadd.f32 %v1723_v10, %v663_v14  ;;  %v1817_v17 = vpop.f32.mrb[1].mxu0 }
 0x15f   : > { %v666_v20 = vpop.f32.mrb[2].mxu0  ;;  %828 = vrot.lane.b32.xlu1 %v734_v18, %s2152_s30  ;;  %v825_v23 = vrot.slane %v734_v18, 4 }
 0x160   : > { %v669_v21 = vmul.f32 0.35355338, %v664_v15  ;;  %v1818_v22 = vpop.f32.mrb[3].mxu0 }
 0x161   : > { %826 = vrot.lane.b32.xlu0 %v825_v23, %s2153_s20 }
 0x162   : > { %v670_v24 = vpack.c.bf16 %v669_v21, %v669_v21 }
 0x163   : > { %830 = vrot.lane.b32.xlu1 %v825_v23, %s2154_s6 }
 0x164   : > { %v800_v25 = vrot.slane %v670_v24, 4 }
 0x165   : > { %v792_v27 = vpop.f32.mrb[4].mxu0 }
 0x166   : > { %801 = vrot.lane.b32.xlu0 %v800_v25, %s2153_s20  ;;  %v793_v28 = vadd.f32 %v1731_v26, %v792_v27  ;;  %v1833_v29 = vpop.f32.mrb[5].mxu0 }
 0x167   : > { %805 = vrot.lane.b32.xlu1 %v800_v25, %s2154_s6  ;;  %v795_v30 = vpop.f32.mrb[6].mxu0 }
 0x168   : > { %v2445_v31 = vpack.c.bf16 %v793_v28, %v793_v28  ;;  %v1834_v32 = vpop.f32.mrb[7].mxu0 }
 0x16a   : > { %803 = vrot.lane.b32.xlu0 %v670_v24, %s2152_s30  ;;  %v849_v33 = vrot.slane %v2445_v31, 4 }
 0x16c   : > { %850 = vrot.lane.b32.xlu1 %v849_v33, %s2153_s20 }
 0x1d1   : > { %v829_v34 = vpop.permute.xlu1 %828 }
 0x1d3   : > { %v827_v35 = vpop.permute.xlu0 %826 }
 0x1d4   : > { %v834_v36 = vsel %vm807_vm2, %v734_v18, %v827_v35 }
 0x1d5   : > { %v1739_v37 = vcombine.low %v834_v36, %v834_v36  ;;  %v1740_v38 = vcombine.high %v834_v36, %v834_v36  ;;  %v831_v39 = vpop.permute.xlu1 %830 }
 0x1d6   : > { %v837_v43 = vsel %vm807_vm2, %v829_v34, %v831_v39 }
 0x1d7   : > { %v877_v41 = vsel %vm872_vm3, %v1739_v37, 0  ;;  %v923_v42 = vsel %vm872_vm3, %v1740_v38, 0  ;;  %v1741_v45 = vcombine.low %v837_v43, %v837_v43  ;;  %v1742_v46 = vcombine.high %v837_v43, %v837_v43 }
 0x1d8   : > { %v802_v40 = vpop.permute.xlu0 %801  ;;  %1836 = vmatpush3.bf16.xpose.msra.mxu1 %v877_v41  ;;  %1842 = vmatpush3.bf16.xpose.msra.mxu0 %v923_v42 }
 0x1d9   : > { %1847 = vmatprep.subr.bf16.mxu1 %v2150_v0  ;;  %1853 = vmatprep.subr.bf16.mxu0 %v2150_v0  ;;  %v810_v44 = vsel %vm807_vm2, %v670_v24, %v802_v40  ;;  %v806_v47 = vpop.permute.xlu1 %805  ;;  %v969_v51 = vsel %vm872_vm3, %v1741_v45, 0  ;;  %v1015_v52 = vsel %vm872_vm3, %v1742_v46, 0 }
 0x1da   : > { %v1735_v48 = vcombine.low %v810_v44, %v810_v44  ;;  %v1736_v49 = vcombine.high %v810_v44, %v810_v44 }
 0x1dc   : > { %v804_v50 = vpop.permute.xlu0 %803 }
 0x1dd   : > { %v813_v55 = vsel %vm807_vm2, %v804_v50, %v806_v47 }
 0x1de   : > { %v851_v53 = vpop.permute.xlu1 %850  ;;  %v1737_v58 = vcombine.low %v813_v55, %v813_v55  ;;  %v1738_v59 = vcombine.high %v813_v55, %v813_v55 }
 0x1df   : > { %1838 = vmatmul.mubr.msk.bf16.vlgmr.msra.gmra.mrb[4].mxu1 %vm872_vm3, %v1735_v48  ;;  %1844 = vmatmul.mubr.msk.bf16.vlgmr.msra.gmra.mrb[8].mxu0 %vm872_vm3, %v1736_v49  ;;  %v858_v54 = vsel %vm807_vm2, %v2445_v31, %v851_v53 }
 0x1e0   : > { %1848 = vmatpush3.bf16.xpose.msra.mxu1 %v969_v51  ;;  %1854 = vmatpush3.bf16.xpose.msra.mxu0 %v1015_v52  ;;  %v1743_v56 = vcombine.low %v858_v54, %v858_v54  ;;  %v1744_v57 = vcombine.high %v858_v54, %v858_v54 }
 0x1e1   : > { %1849 = vmatprep.mubr.msk.bf16.mxu1 %vm2151_vm0, %v2150_v0  ;;  %1855 = vmatprep.mubr.msk.bf16.mxu0 %vm2151_vm0, %v2150_v0 }
 0x1e2   : > { %1859 = vmatprep.subr.bf16.mxu1 %v2150_v0  ;;  %1865 = vmatprep.subr.bf16.mxu0 %v2150_v0  ;;  %v1121_v60 = vsel %vm807_vm2, %v1743_v56, 0  ;;  %v1167_v61 = vsel %vm807_vm2, %v1744_v57, 0 }
 0x1e7   : > { %1850 = vmatmul.mubr.msk.bf16.vlgmr.msra.gmra.mrb[8].mxu1 %vm872_vm3, %v1737_v58  ;;  %1856 = vmatmul.mubr.msk.bf16.vlgmr.msra.gmra.mrb[12].mxu0 %vm872_vm3, %v1738_v59 }
 0x1e8   : > { %1860 = vmatpush3.bf16.msra.mxu1 %v1121_v60  ;;  %1866 = vmatpush3.bf16.msra.mxu0 %v1167_v61 }
 0x1e9   : > { %1861 = vmatprep.mubr.msk.bf16.mxu1 %vm2151_vm0, %v2150_v0  ;;  %1867 = vmatprep.mubr.msk.bf16.mxu0 %vm2151_vm0, %v2150_v0 }
 0x1ea   : > { %1871 = vmatprep.subr.bf16.mxu1 %v2150_v0  ;;  %1877 = vmatprep.subr.bf16.mxu0 %v2150_v0 }
 0x2b2   : > { %v913_v62 = vpop.f32.mrb[4].mxu1  ;;  %v959_v63 = vpop.f32.mrb[8].mxu0 }
 0x2b3   : > { %v1839_v1 = vpop.f32.mrb[5].mxu1  ;;  %v1845_v2 = vpop.f32.mrb[9].mxu0  ;;  %v1057_v3 = vsel %vm872_vm3, %v913_v62, -inf  ;;  %v1060_v4 = vsel %vm872_vm3, %v959_v63, -inf }
 0x2b4   : > { %1058 = vmax.xlane.f32.xlu0 %v1057_v3  ;;  %v916_v6 = vpop.f32.mrb[6].mxu1  ;;  %1061 = vmax.xlane.f32.xlu1 %v1060_v4  ;;  %v962_v7 = vpop.f32.mrb[10].mxu0 }
 0x2b5   : > { %v1840_v8 = vpop.f32.mrb[7].mxu1  ;;  %v1846_v9 = vpop.f32.mrb[11].mxu0 }
 0x2ba   : > { %v1005_v10 = vpop.f32.mrb[8].mxu1  ;;  %v1051_v11 = vpop.f32.mrb[12].mxu0 }
 0x2bb   : > { %v1851_v12 = vpop.f32.mrb[9].mxu1  ;;  %v1857_v13 = vpop.f32.mrb[13].mxu0  ;;  %v1063_v14 = vsel %vm872_vm3, %v1005_v10, -inf  ;;  %v1066_v19 = vsel %vm872_vm3, %v1051_v11, -inf }
 0x2bc   : > { %1064 = vmax.xlane.f32.xlu0 %v1063_v14  ;;  %v1008_v15 = vpop.f32.mrb[10].mxu1  ;;  %v1054_v16 = vpop.f32.mrb[14].mxu0 }
 0x2bd   : > { %v1852_v17 = vpop.f32.mrb[11].mxu1  ;;  %v1858_v18 = vpop.f32.mrb[15].mxu0 }
 0x2c0   : > { %1067 = vmax.xlane.f32.xlu0 %v1066_v19 }
 0x2c5   : > { %854 = vrot.lane.b32.xlu1 %v849_v33, %s2154_s6 }
 0x2d6   : > { %852 = vrot.lane.b32.xlu0 %v2445_v31, %s2152_s30  ;;  %s2612_s30 = sld [smem:[#allocation16_spill]] }
 0x341   : > { %v1059_v20 = vpop.xlane.xlu0 %1058  ;;  %v1062_v21 = vpop.xlane.xlu1 %1061 }
 0x342   : > { %v1081_v22 = vsub.f32 %v913_v62, %v1059_v20  ;;  %v1082_v23 = vsub.f32 %v959_v63, %v1062_v21  ;;  %v1069_v51 = vsub.f32 -inf, %v1059_v20  ;;  %v1070_v52 = vsub.f32 -inf, %v1062_v21  ;;  %v1977_v20 = vld [vmem:[#allocation6 + $0x8] sm:$0xff]  }
 0x344   : > { %v1085_v24 = vmul.f32 1.442695, %v1081_v22  ;;  %v1087_v25 = vmul.f32 1.442695, %v1082_v23  ;;  %v1073_v53 = vmul.f32 1.442695, %v1069_v51 }
 0x345   : > { %v855_v33 = vpop.permute.xlu1 %854  ;;  %v1075_v54 = vmul.f32 1.442695, %v1070_v52 }
 0x346   : > { %1984 = vpow2.f32 %v1085_v24 }
 0x347   : > { %1986 = vpow2.f32 %v1087_v25 }
 0x349   : > { %v1065_v26 = vpop.xlane.xlu0 %1064 }
 0x34a   : > { %v1083_v27 = vsub.f32 %v1005_v10, %v1065_v26  ;;  %v1071_v55 = vsub.f32 -inf, %v1065_v26  ;;  %v1976_v10 = vld [vmem:[#allocation6] sm:$0xff]  }
 0x34c   : > { %v1089_v28 = vmul.f32 1.442695, %v1083_v27  ;;  %v1077_v56 = vmul.f32 1.442695, %v1071_v55 }
 0x34d   : > { %v1068_v29 = vpop.xlane.xlu0 %1067 }
 0x34e   : > { %v1084_v30 = vsub.f32 %v1051_v11, %v1068_v29  ;;  %1988 = vpow2.f32 %v1089_v28  ;;  %v1072_v57 = vsub.f32 -inf, %v1068_v29 }
 0x350   : > { %v1091_v32 = vmul.f32 1.442695, %v1084_v30  ;;  %v1985_v34 = vpop.eup %1984  ;;  %v1079_v59 = vmul.f32 1.442695, %v1072_v57 }
 0x351   : > { %v853_v35 = vpop.permute.xlu0 %852  ;;  %v1113_v36 = vpack.c.bf16 %v1985_v34, %v1985_v34  ;;  %v1987_v37 = vpop.eup %1986  ;;  %v1097_v44 = vsel %vm872_vm3, %v1985_v34, 0.0 }
 0x352   : > { %v861_v31 = vsel %vm807_vm2, %v853_v35, %v855_v33  ;;  %1990 = vpow2.f32 %v1091_v32  ;;  %v1100_v40 = vsel %vm872_vm3, %v1987_v37, 0.0  ;;  %v1114_v41 = vpack.c.bf16 %v1987_v37, %v1987_v37 }
 0x353   : > { %v1745_v38 = vcombine.low %v861_v31, %v861_v31  ;;  %v1746_v39 = vcombine.high %v861_v31, %v861_v31  ;;  %1862 = vmatmul.mubr.msk.bf16.vlgmr.msra.gmra.mrb[12].mxu1 %vm872_vm3, %v1113_v36  ;;  %1101 = vadd.xlane.f32.xlu1 %v1100_v40  ;;  %1992 = vpow2.f32 %v1073_v53  ;;  %v1755_v53 = vld [vmem:[#allocation7] ss:$0 sm:$0xff] }
 0x354   : > { %1873 = vmatprep.mubr.msk.bf16.mxu1 %vm2151_vm0, %v2150_v0  ;;  %1868 = vmatmul.mubr.msk.bf16.vlgmr.msra.gmra.mrb[16].mxu0 %vm872_vm3, %v1114_v41  ;;  %1994 = vpow2.f32 %v1075_v54 }
 0x355   : > { %v1213_v42 = vsel %vm807_vm2, %v1745_v38, 0  ;;  %v1259_v43 = vsel %vm807_vm2, %v1746_v39, 0  ;;  %1879 = vmatprep.mubr.msk.bf16.mxu0 %vm2151_vm0, %v2150_v0  ;;  %1996 = vpow2.f32 %v1077_v56 }
 0x356   : > { %1872 = vmatpush3.bf16.msra.mxu1 %v1213_v42  ;;  %1878 = vmatpush3.bf16.msra.mxu0 %v1259_v43  ;;  %1998 = vpow2.f32 %v1079_v59 }
 0x357   : > { %1883 = vmatprep.subr.bf16.mxu1 %v2150_v0  ;;  %1891 = vmatprep.subr.bf16.mxu0 %v2150_v0 }
 0x358   : > { %v1989_v45 = vpop.eup %1988  ;;  %1098 = vadd.xlane.f32.xlu1 %v1097_v44 }
 0x359   : > { %v1103_v46 = vsel %vm872_vm3, %v1989_v45, 0.0  ;;  %v1115_v47 = vpack.c.bf16 %v1989_v45, %v1989_v45 }
 0x35a   : > { %1104 = vadd.xlane.f32.xlu0 %v1103_v46 }
 0x35b   : > { %1874 = vmatmul.mubr.msk.bf16.vlgmr.msra.gmra.mrb[16].mxu1 %vm872_vm3, %v1115_v47 }
 0x35c   : > { %v1991_v48 = vpop.eup %1990  ;;  %1887 = vmatprep.mubr.msk.bf16.mxu1 %vm2151_vm0, %v2150_v0  ;;  %1884 = vmatpush3.bf16.msra.mxu1 %v1976_v10 }
 0x35d   : > { %v1106_v49 = vsel %vm872_vm3, %v1991_v48, 0.0  ;;  %v1116_v50 = vpack.c.bf16 %v1991_v48, %v1991_v48  ;;  %v1993_v60 = vpop.eup %1992  ;;  %1885 = vmatprep.subr.bf16.mxu1 %v2150_v0 }
 0x35e   : > { %1107 = vadd.xlane.f32.xlu0 %v1106_v49  ;;  %v1995_v61 = vpop.eup %1994  ;;  %v1093_v63 = vmul.f32 0.0, %v1993_v60 }
 0x35f   : > { %1880 = vmatmul.mubr.msk.bf16.vlgmr.msra.gmra.mrb[20].mxu0 %vm872_vm3, %v1116_v50  ;;  %v1094_v1 = vmul.f32 0.0, %v1995_v61  ;;  %v1997_v4 = vpop.eup %1996 }
 0x360   : > { %1895 = vmatprep.mubr.msk.bf16.mxu0 %vm2151_vm0, %v2150_v0  ;;  %v1095_v7 = vmul.f32 0.0, %v1997_v4  ;;  %v1999_v8 = vpop.eup %1998  ;;  %1886 = vmatpush3.bf16.msra.mxu1 %v1977_v20  ;;  %v1979_v4 = vld [vmem:[%s2580_s9 + $0x8] sm:$0xff]  }
 0x361   : > { %v1096_v12 = vmul.f32 0.0, %v1999_v8  ;;  %1899 = vmatprep.subr.bf16.mxu1 %v2150_v0 }
 0x3e0   : > { %v1102_v58 = vpop.xlane.xlu1 %1101 }
 0x3e1   : > { %v1110_v3 = vadd.f32 %v1102_v58, %v1094_v1 }
 0x3e5   : > { %v1099_v62 = vpop.xlane.xlu1 %1098 }
 0x3e6   : > { %v1109_v2 = vadd.f32 %v1099_v62, %v1093_v63 }
 0x3e7   : > { %v1105_v6 = vpop.xlane.xlu0 %1104 }
 0x3e8   : > { %2000 = vrcp.f32 %v1109_v2  ;;  %v1111_v9 = vadd.f32 %v1105_v6, %v1095_v7  ;;  %v1981_v6 = vld [vmem:[%s2582_s11 + $0x8] sm:$0xff]  }
 0x3e9   : > { %2002 = vrcp.f32 %v1110_v3  ;;  %v1978_v3 = vld [vmem:[%s2580_s9] sm:$0xff]  }
 0x3ea   : > { %2004 = vrcp.f32 %v1111_v9  ;;  %1892 = vmatpush3.bf16.msra.mxu0 %v1978_v3 }
 0x3eb   : > { %v1108_v11 = vpop.xlane.xlu0 %1107  ;;  %1893 = vmatprep.subr.bf16.mxu0 %v2150_v0 }
 0x3ec   : > { %v1112_v13 = vadd.f32 %v1108_v11, %v1096_v12  ;;  %v1759_v11 = vld [vmem:[%s2584_s13] ss:$0 sm:$0xff] }
 0x3ee   : > { %2006 = vrcp.f32 %v1112_v13  ;;  %1894 = vmatpush3.bf16.msra.mxu0 %v1979_v4  ;;  %v1760_v13 = vld [vmem:[%s2585_s14] ss:$0 sm:$0xff] }
 0x3f2   : > { %v2001_v17 = vpop.eup %2000 }
 0x3f3   : > { %v2003_v25 = vpop.eup %2002 }
 0x3f4   : > { %v2005_v33 = vpop.eup %2004 }
 0x3f8   : > { %v2007_v41 = vpop.eup %2006 }
 0x426   : > { %v1157_v14 = vpop.f32.mrb[12].mxu1 }
 0x427   : > { %v1301_v15 = vadd.f32 %v1157_v14, %v1093_v63  ;;  %v1863_v16 = vpop.f32.mrb[13].mxu1  ;;  %v1203_v18 = vpop.f32.mrb[16].mxu0 }
 0x428   : > { %v1160_v19 = vpop.f32.mrb[14].mxu1  ;;  %v1302_v22 = vadd.f32 %v1203_v18, %v1094_v1  ;;  %v1869_v23 = vpop.f32.mrb[17].mxu0  ;;  %v1983_v18 = vld [vmem:[%s2582_s11 + $0x18] sm:$0xff]  }
 0x429   : > { %v1309_v21 = vmul.f32 %v2001_v17, %v1301_v15  ;;  %v1864_v24 = vpop.f32.mrb[15].mxu1  ;;  %v1206_v26 = vpop.f32.mrb[18].mxu0  ;;  %v1982_v17 = vld [vmem:[%s2582_s11 + $0x10] sm:$0xff]   ;;  %v1761_v19 = vld [vmem:[%s2581_s10] ss:$0 sm:$0xff] }
 0x42a   : > { %v1310_v27 = vmul.f32 %v2003_v25, %v1302_v22  ;;  %v1870_v28 = vpop.f32.mrb[19].mxu0 }
 0x42b   : > { %v1313_v48 = vpack.c.bf16 %v1309_v21, %v1309_v21 }
 0x42c   : > { %v1314_v29 = vpack.c.bf16 %v1310_v27, %v1310_v27 }
 0x42e   : > { %v1249_v30 = vpop.f32.mrb[16].mxu1  ;;  %1318 = vrot.lane.b32.xlu0 %v1314_v29, %s2155_s25  ;;  %s2613_s25 = sld [smem:[#allocation17_spill]] }
 0x42f   : > { %v1303_v32 = vadd.f32 %v1249_v30, %v1095_v7  ;;  %v1875_v34 = vpop.f32.mrb[17].mxu1 }
 0x430   : > { %v1252_v35 = vpop.f32.mrb[18].mxu1 }
 0x431   : > { %v1311_v31 = vmul.f32 %v2005_v33, %v1303_v32  ;;  %v1876_v36 = vpop.f32.mrb[19].mxu1 }
 0x432   : > { %v1295_v37 = vpop.f32.mrb[20].mxu0 }
 0x433   : > { %v1315_v38 = vpack.c.bf16 %v1311_v31, %v1311_v31  ;;  %v1304_v39 = vadd.f32 %v1295_v37, %v1096_v12  ;;  %v1881_v40 = vpop.f32.mrb[21].mxu0 }
 0x434   : > { %v1298_v42 = vpop.f32.mrb[22].mxu0 }
 0x435   : > { %v1312_v43 = vmul.f32 %v2007_v41, %v1304_v39  ;;  %1321 = vrot.lane.b32.xlu1 %v1315_v38, %s2156_s29  ;;  %v1882_v44 = vpop.f32.mrb[23].mxu0  ;;  %s598_s29 = scalar_lea.vmem %s2613_s25, %s1721_s24 }
 0x437   : > { %v1316_v45 = vpack.c.bf16 %v1312_v43, %v1312_v43  ;;  %v1771_v43 = vld [vmem:[%s2586_s15] ss:$0 sm:$0xff] }
 0x439   : > { %1324 = vrot.lane.b32.xlu1 %v1316_v45, %s2157_s18  ;;  %v1772_v45 = vld [vmem:[%s2612_s30] ss:$0 sm:$0xff] }
 0x4a0   : > { %v1319_v46 = vpop.permute.xlu0 %1318 }
 0x4a1   : > { %v1328_v49 = vsel %vm872_vm3, %v1313_v48, %v1319_v46 }
 0x4a7   : > { %v1322_v47 = vpop.permute.xlu1 %1321 }
 0x4a8   : > { %v1331_v50 = vsel %vm1329_vm4, %v1328_v49, %v1322_v47 }
 0x4ab   : > { %v1325_v51 = vpop.permute.xlu1 %1324 }
 0x4ac   : > { %v1334_v52 = vsel %vm1332_vm5, %v1331_v50, %v1325_v51 }
 0x4ad   : > { %1888 = vmatmul.mubr.msk.bf16.vlgmr.msra.gmra.mrb[20].mxu1 %vm625_vm1, %v1334_v52 }
 0x4ae   : > { %1907 = vmatprep.mubr.msk.bf16.mxu1 %vm2151_vm0, %v2150_v0 }
 0x580   : > { %v1394_v54 = vpop.f32.mrb[20].mxu1 }
 0x581   : > { %v1395_v55 = vadd.f32 %v1755_v53, %v1394_v54  ;;  %v1889_v56 = vpop.f32.mrb[21].mxu1 }
 0x582   : > { %v1397_v57 = vpop.f32.mrb[22].mxu1 }
 0x583   : > { %v1890_v58 = vpop.f32.mrb[23].mxu1  ;;  %v1400_v59 = vadd.f32 %v1395_v55, %v2418_v5  ;;  %v1980_v5 = vld [vmem:[%s2582_s11] sm:$0xff]  }
 0x584   : > { %1900 = vmatpush3.bf16.msra.mxu1 %v1980_v5 }
 0x585   : > { %v1401_v60 = vsel %vm625_vm1, %v1400_v59, 0.0  ;;  %1901 = vmatprep.subr.bf16.mxu1 %v2150_v0 }
 0x586   : > { %1402 = vadd.xlane.f32.xlu0 %v1401_v60 }
 0x588   : > { %1902 = vmatpush3.bf16.msra.mxu1 %v1981_v6 }
 0x589   : > { %1903 = vmatprep.subr.bf16.mxu1 %v2150_v0 }
 0x58c   : > { %1904 = vmatpush3.bf16.msra.mxu1 %v1982_v17 }
 0x58d   : > { %1905 = vmatprep.subr.bf16.mxu1 %v2150_v0  ;;  %v1765_v0 = vld [vmem:[%s2583_s12] ss:$0 sm:$0xff] }
 0x590   : > { %1906 = vmatpush3.bf16.msra.mxu1 %v1983_v18 }
 0x613   : > { %v1403_v61 = vpop.xlane.xlu0 %1402 }
 0x614   : > { %v1405_v62 = vmul.f32 0.03125, %v1403_v61 }
 0x616   : > { %v1406_v63 = vsub.f32 %v1400_v59, %v1405_v62 }
 0x618   : > { %v1407_v1 = vmul.f32 %v1406_v63, %v1406_v63 }
 0x61a   : > { %v1408_v2 = vsel %vm625_vm1, %v1407_v1, 0.0 }
 0x61b   : > { %1409 = vadd.xlane.f32.xlu1 %v1408_v2 }
 0x6a8   : > { %v1410_v7 = vpop.xlane.xlu1 %1409 }
 0x6a9   : > { %v1411_v8 = vmul.f32 0.03125, %v1410_v7 }
 0x6ab   : > { %v1412_v9 = vadd.f32 1e-05, %v1411_v8 }
 0x6ad   : > { %2008 = vrsqrt.f32 %v1412_v9 }
 0x6b7   : > { %v2009_v10 = vpop.eup %2008 }
 0x6b8   : > { %v1414_v12 = vmul.f32 %v2009_v10, %v1406_v63 }
 0x6ba   : > { %v1422_v14 = vmul.f32 %v1759_v11, %v1414_v12 }
 0x6bc   : > { %v1430_v15 = vadd.f32 %v1760_v13, %v1422_v14 }
 0x6be   : > { %v1431_v16 = vpack.c.bf16 %v1430_v15, %v1430_v15 }
 0x6c0   : > { %1896 = vmatmul.mubr.msk.bf16.vlgmr.msra.gmra.mrb[24].mxu0 %vm625_vm1, %v1431_v16 }
 0x793   : > { %v1492_v20 = vpop.f32.mrb[24].mxu0 }
 0x794   : > { %v1493_v21 = vadd.f32 %v1761_v19, %v1492_v20  ;;  %v1897_v22 = vpop.f32.mrb[25].mxu0 }
 0x795   : > { %v1495_v23 = vpop.f32.mrb[26].mxu0 }
 0x796   : > { %v1498_v24 = vmax.f32 %v1493_v21, 0.0  ;;  %v1898_v25 = vpop.f32.mrb[27].mxu0 }
 0x798   : > { %v1499_v26 = vpack.c.bf16 %v1498_v24, %v1498_v24 }
 0x79a   : > { %1908 = vmatmul.mubr.msk.bf16.vlgmr.msra.gmra.mrb[24].mxu1 %vm1539_vm6, %v1499_v26 }
 0x86d   : > { %v1577_v27 = vpop.f32.mrb[24].mxu1 }
 0x86e   : > { %v1578_v28 = vadd.f32 %v1765_v0, %v1577_v27  ;;  %v1909_v29 = vpop.f32.mrb[25].mxu1 }
 0x86f   : > { %v1580_v30 = vpop.f32.mrb[26].mxu1 }
 0x870   : > { %v1910_v32 = vpop.f32.mrb[27].mxu1  ;;  %v1583_v34 = vadd.f32 %v1578_v28, %v1430_v15 }
 0x872   : > { %v1584_v33 = vsel %vm625_vm1, %v1583_v34, 0.0 }
 0x873   : > { %1585 = vadd.xlane.f32.xlu0 %v1584_v33 }
 0x900   : > { %v1586_v35 = vpop.xlane.xlu0 %1585 }
 0x901   : > { %v1587_v31 = vmul.f32 0.03125, %v1586_v35 }
 0x903   : > { %v1588_v36 = vsub.f32 %v1583_v34, %v1587_v31 }
 0x905   : > { %v1589_v37 = vmul.f32 %v1588_v36, %v1588_v36 }
 0x907   : > { %v1590_v38 = vsel %vm625_vm1, %v1589_v37, 0.0 }
 0x908   : > { %1591 = vadd.xlane.f32.xlu0 %v1590_v38 }
 0x995   : > { %v1592_v39 = vpop.xlane.xlu0 %1591 }
 0x996   : > { %v1593_v40 = vmul.f32 0.03125, %v1592_v39 }
 0x998   : > { %v1594_v41 = vadd.f32 1e-05, %v1593_v40 }
 0x99a   : > { %2010 = vrsqrt.f32 %v1594_v41 }
 0x9a4   : > { %v2011_v42 = vpop.eup %2010 }
 0x9a5   : > { %v1596_v44 = vmul.f32 %v2011_v42, %v1588_v36 }
 0x9a7   : > { %v1604_v46 = vmul.f32 %v1771_v43, %v1596_v44 }
 0x9a9   : > { %v1612_v47 = vadd.f32 %v1772_v45, %v1604_v46 }
 0x9ab   : > { %1613 = vst.msk [vmem:[%s598_s29] sm:$0xff] %vm625_vm1, %v1612_v47 }
 0x9ac PF: > { %s2614_s18 = sld [smem:[#allocation12_spill]] }
 0x9b2   : > { %s30_s24 = sadd.s32 1, %s2614_s18  }
 0x9b3   : > { %p27_p6 = scmp.ge.s32.totalorder %s30_s24, 4  }
 0x9b5   :  { %29 = sbr.rel (!%p27_p6) target bundleno = 9 (0x9), region = 135 }
 0x9bc   :  { %1633 = vsyncpa [#allocation3], 1 }
 0x9bd   :  { %1635 = vsyncpa [#allocation3 + $0x1], 1 }
 0x9be   :  { %1636 = vsyncpa [#allocation5], 1 }
 0x9bf   :  { %1637 = vsyncpa [#allocation8], 1 }

// kernel: encoder_forward.3
= control target key start
LH: loop header
LB: loop body
LE: loop exit
PB: predicated region body
PF: predicated region fallthrough
CT: control target
= control target key end

     0   :  { %s2363_s0 = inlined_call_operand.vmem [shape: f32[2,8,32], index: 0, kind: input, shape index: {}]   ;;  %s2364_s1 = inlined_call_operand.vmem [shape: bf16[32,32], index: 1, kind: input, shape index: {}]   ;;  %s2365_s2 = inlined_call_operand.vmem [shape: f32[1,32], index: 2, kind: input, shape index: {}]   ;;  %s2366_s3 = inlined_call_operand.vmem [shape: bf16[32,32], index: 3, kind: input, shape index: {}]   ;;  %s2367_s4 = inlined_call_operand.vmem [shape: f32[1,32], index: 4, kind: input, shape index: {}]   ;;  %s2368_s5 = inlined_call_operand.vmem [shape: bf16[32,32], index: 5, kind: input, shape index: {}]   ;;  %s2369_s6 = inlined_call_operand.vmem [shape: f32[1,32], index: 6, kind: input, shape index: {}]   ;;  %s2370_s7 = inlined_call_operand.vmem [shape: bf16[32,32], index: 7, kind: input, shape index: {}]   ;;  %s2371_s8 = inlined_call_operand.vmem [shape: f32[1,32], index: 8, kind: input, shape index: {}]   ;;  %s2372_s9 = inlined_call_operand.vmem [shape: bf16[32,64], index: 9, kind: input, shape index: {}]   ;;  %s2373_s10 = inlined_call_operand.vmem [shape: f32[1,64], index: 10, kind: input, shape index: {}]   ;;  %s2374_s11 = inlined_call_operand.vmem [shape: bf16[64,32], index: 11, kind: input, shape index: {}]   ;;  %s2375_s12 = inlined_call_operand.vmem [shape: f32[1,32], index: 12, kind: input, shape index: {}]   ;;  %s2376_s13 = inlined_call_operand.vmem [shape: f32[1,32], index: 13, kind: input, shape index: {}]   ;;  %s2377_s14 = inlined_call_operand.vmem [shape: f32[1,32], index: 14, kind: input, shape index: {}]   ;;  %s2378_s15 = inlined_call_operand.vmem [shape: f32[1,32], index: 15, kind: input, shape index: {}]   ;;  %s2379_s16 = inlined_call_operand.vmem [shape: f32[1,32], index: 16, kind: input, shape index: {}]   ;;  %s2380_s17 = inlined_call_operand.hbm [shape: f32[2,8,32], index: 17, kind: output, shape index: {}]  }
   0x1   :  { %2386 = sst [smem:[#allocation9_spill]] %s2363_s0 }
   0x2   :  { %2387 = sst [smem:[#allocation10_spill]] %s2364_s1 }
   0x3   :  { %2388 = sst [smem:[#allocation11_spill]] %s2365_s2 }
   0x4   :  { %2389 = sst [smem:[#allocation12_spill]] %s2366_s3 }
   0x5   :  { %2390 = sst [smem:[#allocation13_spill]] %s2367_s4 }
   0x6   :  { %22 = vsyncpa [#allocation3], 0 }
   0x7   :  { %24 = vsyncpa [#allocation3 + $0x1], 0  ;;  %s2080_s24 = smov 0   ;;  %s2082_s25 = smov 0  }
   0x8   :  { %s2084_s26 = smov 0   ;;  %s2086_s27 = smov 0  }
   0x9 LB: > { %2391 = sst [smem:[#allocation5_spill]] %s1975_s26  ;;  %s2101_s28 = sadd.s32 4294967295, %s1979_s27   ;;  %s1979_s27 = sphi %s2086_s27, %s2403_s27   ;;  %s1975_s26 = sphi %s2084_s26, %s2405_s26   ;;  %s1971_s25 = sphi %s2082_s25, %s2407_s25   ;;  %s1967_s24 = sphi %s2080_s24, %s2406_s24  }
   0xa   : > { %s1632_s29 = sadd.s32 4294967294, %s1979_s27   ;;  %s2105_s0 = sadd.s32 1, %s1979_s27  }
   0xb   : > { %2392 = sst [smem:[#allocation6_spill]] %s2105_s0  ;;  %s399_s30 = sadd.s32 1, %s1975_s26 }
   0xc   : > { %s396_s18 = ssub.s32 %s1979_s27, %s2105_s0  ;;  %p409_p0 = scmp.ne.s32.totalorder %s1975_s26, %s1971_s25 }
   0xd   : > { %p397_p1 = scmp.eq.s32.totalorder %s396_s18, 0  ;;  %p410_p2 = scmp.eq.s32.totalorder %s2101_s28, 1 }
   0xe   : > { %p415_p3 = scmp.ne.s32.totalorder %s1971_s25, %s1967_s24  ;;  %p416_p4 = scmp.eq.s32.totalorder %s1632_s29, 1 }
   0xf   : > { %s2116_s19 = scalar_select %p397_p1, %s1975_s26, %s399_s30  }
  0x10   : > { %p2118_p5 = por %p410_p2, %p409_p0  ;;  %p2122_p6 = por %p416_p4, %p415_p3 }
  0x11   : > { %2393 = sst [smem:[#allocation7_spill]] %s2116_s19  ;;  %p1635_p7 = scmp.ge.s32.totalorder %s1979_s27, 1 }
  0x12   : > { %s2395_s20 = scalar_select %p2122_p6, 1, 0 }
  0x13   : > { %p489_p8 = scmp.lt.s32.totalorder %s1979_s27, 3 }
  0x14   : > { %2396 = sst [smem:[#allocation8_spill]] %s2395_s20 }
  0x15   : > { %p490_p9 = pnand %p1635_p7, %p489_p8 }
  0x16   : > { %s2397_s3 = sld [smem:[#allocation12_spill]] (!%p490_p9)  ;;  %v1981_v1 = vmov (!%p490_p9), 0.0   ;;  %s2398_s30 = sld [smem:[#allocation10_spill]] (!%p490_p9)  ;;  %vm1982_vm0 = vmmov (!%p490_p9), 0   ;;  %v1879_v5 = vld [vmem:[%s2368_s5] sm:$0xff] (!%p490_p9)   ;;  %vm570_vm1 = vcmask (!%p490_p9), 261120  }
  0x17   : > { %493 = sbr.rel (%p490_p9) target bundleno = 2391 (0x957), region = 88  ;;  %1736 = vmatprep.subr.bf16.mxu1 (!%p490_p9), %v1981_v1  ;;  %1728 = vmatprep.subr.bf16.mxu0 (!%p490_p9), %v1981_v1  ;;  %p540_p10 = scmp.lt.s32.totalorder (!%p490_p9), %s2101_s28, 1  ;;  %v1880_v8 = vld [vmem:[%s2368_s5 + $0x8] sm:$0xff] (!%p490_p9)   ;;  %v1646_v26 = vld [vmem:[%s2369_s6] ss:$0 sm:$0xff] (!%p490_p9)  ;;  %vm752_vm2 = vcmask (!%p490_p9), 1043456  }
  0x18   : > { %1740 = vmatprep.mubr.msk.bf16.mxu1 (!%p490_p9), %vm1982_vm0, %v1981_v1  ;;  %1732 = vmatprep.mubr.msk.bf16.mxu0 (!%p490_p9), %vm1982_vm0, %v1981_v1  ;;  %s2399_s0 = sld [smem:[#allocation9_spill]] (!%p490_p9)  ;;  %s2400_s4 = sld [smem:[#allocation13_spill]] (!%p490_p9)  ;;  %vm817_vm3 = vcmask (!%p490_p9), 64512   ;;  %vm1274_vm4 = vcmask (!%p490_p9), 130048   ;;  %vm1277_vm5 = vcmask (!%p490_p9), 195584   ;;  %vm1484_vm6 = vcmask (!%p490_p9), 523264  }
  0x19   : > { %s2401_s2 = sld [smem:[#allocation11_spill]] (!%p490_p9)  ;;  %s1985_s29 = smov (!%p490_p9), 104  }
  0x1a   : > { %s537_s21 = sand.u32 (!%p490_p9), 1, %s1971_s25  }
  0x1b   : > { %s1636_s22 = sshll.u32 (!%p490_p9), %s537_s21, 3 }
  0x1c   : > { %v1875_v0 = vld [vmem:[%s2397_s3] sm:$0xff] (!%p490_p9)   ;;  %v1877_v3 = vld [vmem:[%s2397_s3 + $0x8] sm:$0xff] (!%p490_p9)   ;;  %s1560_s3 = scalar_lea.sflag (!%p490_p9), [#allocation3], %s537_s21 }
  0x1d   : > { %v1876_v2 = vld [vmem:[%s2398_s30] sm:$0xff] (!%p490_p9)   ;;  %1737 = vmatpush3.bf16.msra.mxu1 (!%p490_p9), %v1875_v0  ;;  %v1878_v4 = vld [vmem:[%s2398_s30 + $0x8] sm:$0xff] (!%p490_p9)  }
  0x1e   : > { %1729 = vmatpush3.bf16.msra.mxu0 %v1876_v2  ;;  %1738 = vmatprep.subr.bf16.mxu1 %v1981_v1  ;;  %s541_s23 = scalar_select %p540_p10, %s2101_s28, 1  ;;  %v1642_v9 = vld [vmem:[%s2400_s4] ss:$0 sm:$0xff] }
  0x1f   : > { %1730 = vmatprep.subr.bf16.mxu0 %v1981_v1  ;;  %v1638_v10 = vld [vmem:[%s2401_s2] ss:$0 sm:$0xff] }
  0x20   : > { %s1637_s19 = sshll.u32 %s541_s23, 3  ;;  %s1983_s23 = smov 112  }
  0x21   : > { %1739 = vmatpush3.bf16.msra.mxu1 %v1877_v3  ;;  %s543_s20 = scalar_lea.vmem %s2399_s0, %s1637_s19  ;;  %s1984_s19 = smov 120  }
  0x22   : > { %1731 = vmatpush3.bf16.msra.mxu0 %v1878_v4  ;;  %1752 = vmatprep.subr.bf16.mxu1 %v1981_v1  ;;  %v2157_v6 = vld [vmem:[%s543_s20] sm:$0xff]  ;;  %s1986_s20 = smov 8  }
  0x23   : > { %1744 = vmatprep.subr.bf16.mxu0 %v1981_v1  ;;  %v546_v7 = vpack.c.bf16 %v2157_v6, %v2157_v6 }
  0x25   : > { %1741 = vmatmul.mubr.msk.bf16.vlgmr.msra.gmra.mrb[0].mxu1 %vm570_vm1, %v546_v7  ;;  %1733 = vmatmul.mubr.msk.bf16.vlgmr.msra.gmra.mrb[0].mxu0 %vm570_vm1, %v546_v7 }
  0x26   : > { %1745 = vmatpush3.bf16.msra.mxu0 %v1879_v5  ;;  %1748 = vmatprep.mubr.msk.bf16.mxu0 %vm1982_vm0, %v1981_v1 }
  0x27   : > { %1746 = vmatprep.subr.bf16.mxu0 %v1981_v1  ;;  %1754 = vmatprep.mubr.msk.bf16.mxu1 %vm1982_vm0, %v1981_v1 }
  0x2a   : > { %1747 = vmatpush3.bf16.msra.mxu0 %v1880_v8 }
  0x2b   : > { %1758 = vmatprep.subr.bf16.mxu0 %v1981_v1 }
  0x2d   : > { %1749 = vmatmul.mubr.msk.bf16.vlgmr.msra.gmra.mrb[4].mxu0 %vm570_vm1, %v546_v7 }
  0x2e   : > { %1760 = vmatprep.mubr.msk.bf16.mxu0 %vm1982_vm0, %v1981_v1 }
  0xf8   : > { %v673_v11 = vpop.f32.mrb[0].mxu1  ;;  %v608_v12 = vpop.f32.mrb[0].mxu0 }
  0xf9   : > { %v674_v13 = vadd.f32 %v1642_v9, %v673_v11  ;;  %v1742_v14 = vpop.f32.mrb[1].mxu1  ;;  %v609_v15 = vadd.f32 %v1638_v10, %v608_v12  ;;  %v1734_v16 = vpop.f32.mrb[1].mxu0 }
  0xfa   : > { %v676_v17 = vpop.f32.mrb[2].mxu1  ;;  %v611_v18 = vpop.f32.mrb[2].mxu0 }
  0xfb   : > { %v679_v19 = vpack.c.bf16 %v674_v13, %v674_v13  ;;  %v614_v20 = vmul.f32 0.35355338, %v609_v15  ;;  %v1743_v21 = vpop.f32.mrb[3].mxu1  ;;  %v1735_v22 = vpop.f32.mrb[3].mxu0 }
  0xfd   : > { %v615_v23 = vpack.c.bf16 %v614_v20, %v614_v20  ;;  %773 = vrot.lane.b32.xlu1 %v679_v19, %s1983_s23  ;;  %v770_v24 = vrot.slane %v679_v19, 4 }
  0xff   : > { %771 = vrot.lane.b32.xlu0 %v770_v24, %s1984_s19  ;;  %v745_v25 = vrot.slane %v615_v23, 4 }
 0x100   : > { %v737_v27 = vpop.f32.mrb[4].mxu0 }
 0x101   : > { %775 = vrot.lane.b32.xlu1 %v770_v24, %s1985_s29  ;;  %v738_v28 = vadd.f32 %v1646_v26, %v737_v27  ;;  %v1750_v29 = vpop.f32.mrb[5].mxu0 }
 0x102   : > { %v740_v30 = vpop.f32.mrb[6].mxu0 }
 0x103   : > { %746 = vrot.lane.b32.xlu0 %v745_v25, %s1984_s19  ;;  %v2189_v31 = vpack.c.bf16 %v738_v28, %v738_v28  ;;  %v1751_v32 = vpop.f32.mrb[7].mxu0 }
 0x105   : > { %750 = vrot.lane.b32.xlu1 %v745_v25, %s1985_s29  ;;  %v794_v33 = vrot.slane %v2189_v31, 4 }
 0x107   : > { %748 = vrot.lane.b32.xlu0 %v615_v23, %s1983_s23 }
 0x109   : > { %795 = vrot.lane.b32.xlu1 %v794_v33, %s1984_s19  ;;  %s1988_s19 = smov 24  }
 0x16f   : > { %v774_v34 = vpop.permute.xlu1 %773 }
 0x171   : > { %v772_v35 = vpop.permute.xlu0 %771 }
 0x172   : > { %v779_v36 = vsel %vm752_vm2, %v679_v19, %v772_v35 }
 0x173   : > { %v1654_v37 = vcombine.low %v779_v36, %v779_v36  ;;  %v1655_v38 = vcombine.high %v779_v36, %v779_v36  ;;  %v776_v39 = vpop.permute.xlu1 %775 }
 0x174   : > { %v782_v43 = vsel %vm752_vm2, %v774_v34, %v776_v39 }
 0x175   : > { %v747_v40 = vpop.permute.xlu0 %746  ;;  %v822_v41 = vsel %vm817_vm3, %v1654_v37, 0  ;;  %v868_v42 = vsel %vm817_vm3, %v1655_v38, 0  ;;  %v1656_v45 = vcombine.low %v782_v43, %v782_v43  ;;  %v1657_v46 = vcombine.high %v782_v43, %v782_v43 }
 0x176   : > { %1753 = vmatpush3.bf16.xpose.msra.mxu1 %v822_v41  ;;  %1759 = vmatpush3.bf16.xpose.msra.mxu0 %v868_v42  ;;  %v755_v44 = vsel %vm752_vm2, %v615_v23, %v747_v40 }
 0x177   : > { %1764 = vmatprep.subr.bf16.mxu1 %v1981_v1  ;;  %1770 = vmatprep.subr.bf16.mxu0 %v1981_v1  ;;  %v751_v47 = vpop.permute.xlu1 %750  ;;  %v1650_v48 = vcombine.low %v755_v44, %v755_v44  ;;  %v1651_v49 = vcombine.high %v755_v44, %v755_v44  ;;  %v914_v51 = vsel %vm817_vm3, %v1656_v45, 0  ;;  %v960_v52 = vsel %vm817_vm3, %v1657_v46, 0 }
 0x179   : > { %v749_v50 = vpop.permute.xlu0 %748 }
 0x17a   : > { %v758_v55 = vsel %vm752_vm2, %v749_v50, %v751_v47 }
 0x17b   : > { %v796_v53 = vpop.permute.xlu1 %795  ;;  %v1652_v58 = vcombine.low %v758_v55, %v758_v55  ;;  %v1653_v59 = vcombine.high %v758_v55, %v758_v55 }
 0x17c   : > { %v803_v54 = vsel %vm752_vm2, %v2189_v31, %v796_v53 }
 0x17d   : > { %1755 = vmatmul.mubr.msk.bf16.vlgmr.msra.gmra.mrb[4].mxu1 %vm817_vm3, %v1650_v48  ;;  %1761 = vmatmul.mubr.msk.bf16.vlgmr.msra.gmra.mrb[8].mxu0 %vm817_vm3, %v1651_v49  ;;  %v1658_v56 = vcombine.low %v803_v54, %v803_v54  ;;  %v1659_v57 = vcombine.high %v803_v54, %v803_v54 }
 0x17e   : > { %1765 = vmatpush3.bf16.xpose.msra.mxu1 %v914_v51  ;;  %1771 = vmatpush3.bf16.xpose.msra.mxu0 %v960_v52 }
 0x17f   : > { %1766 = vmatprep.mubr.msk.bf16.mxu1 %vm1982_vm0, %v1981_v1  ;;  %1772 = vmatprep.mubr.msk.bf16.mxu0 %vm1982_vm0, %v1981_v1  ;;  %v1066_v60 = vsel %vm752_vm2, %v1658_v56, 0  ;;  %v1112_v61 = vsel %vm752_vm2, %v1659_v57, 0 }
 0x180   : > { %1776 = vmatprep.subr.bf16.mxu1 %v1981_v1  ;;  %1782 = vmatprep.subr.bf16.mxu0 %v1981_v1 }
 0x185   : > { %1767 = vmatmul.mubr.msk.bf16.vlgmr.msra.gmra.mrb[8].mxu1 %vm817_vm3, %v1652_v58  ;;  %1773 = vmatmul.mubr.msk.bf16.vlgmr.msra.gmra.mrb[12].mxu0 %vm817_vm3, %v1653_v59 }
 0x186   : > { %1777 = vmatpush3.bf16.msra.mxu1 %v1066_v60  ;;  %1783 = vmatpush3.bf16.msra.mxu0 %v1112_v61 }
 0x187   : > { %1778 = vmatprep.mubr.msk.bf16.mxu1 %vm1982_vm0, %v1981_v1  ;;  %1784 = vmatprep.mubr.msk.bf16.mxu0 %vm1982_vm0, %v1981_v1 }
 0x188   : > { %1788 = vmatprep.subr.bf16.mxu1 %v1981_v1  ;;  %1794 = vmatprep.subr.bf16.mxu0 %v1981_v1 }
 0x250   : > { %v858_v62 = vpop.f32.mrb[4].mxu1  ;;  %v904_v63 = vpop.f32.mrb[8].mxu0 }
 0x251   : > { %v1756_v0 = vpop.f32.mrb[5].mxu1  ;;  %v1762_v2 = vpop.f32.mrb[9].mxu0  ;;  %v1002_v3 = vsel %vm817_vm3, %v858_v62, -inf  ;;  %v1005_v4 = vsel %vm817_vm3, %v904_v63, -inf }
 0x252   : > { %1003 = vmax.xlane.f32.xlu0 %v1002_v3  ;;  %v861_v5 = vpop.f32.mrb[6].mxu1  ;;  %1006 = vmax.xlane.f32.xlu1 %v1005_v4  ;;  %v907_v7 = vpop.f32.mrb[10].mxu0 }
 0x253   : > { %v1757_v8 = vpop.f32.mrb[7].mxu1  ;;  %v1763_v9 = vpop.f32.mrb[11].mxu0 }
 0x258   : > { %v950_v10 = vpop.f32.mrb[8].mxu1  ;;  %v996_v11 = vpop.f32.mrb[12].mxu0 }
 0x259   : > { %v1768_v12 = vpop.f32.mrb[9].mxu1  ;;  %v1774_v13 = vpop.f32.mrb[13].mxu0  ;;  %v1008_v14 = vsel %vm817_vm3, %v950_v10, -inf  ;;  %v1011_v19 = vsel %vm817_vm3, %v996_v11, -inf }
 0x25a   : > { %1009 = vmax.xlane.f32.xlu0 %v1008_v14  ;;  %v953_v15 = vpop.f32.mrb[10].mxu1  ;;  %v999_v16 = vpop.f32.mrb[14].mxu0 }
 0x25b   : > { %v1769_v17 = vpop.f32.mrb[11].mxu1  ;;  %v1775_v18 = vpop.f32.mrb[15].mxu0 }
 0x25e   : > { %1012 = vmax.xlane.f32.xlu0 %v1011_v19 }
 0x263   : > { %799 = vrot.lane.b32.xlu1 %v794_v33, %s1985_s29 }
 0x274   : > { %797 = vrot.lane.b32.xlu0 %v2189_v31, %s1983_s23  ;;  %s1987_s23 = smov 16  }
 0x2df   : > { %v1004_v20 = vpop.xlane.xlu0 %1003  ;;  %v1007_v21 = vpop.xlane.xlu1 %1006 }
 0x2e0   : > { %v1026_v22 = vsub.f32 %v858_v62, %v1004_v20  ;;  %v1027_v23 = vsub.f32 %v904_v63, %v1007_v21  ;;  %v1014_v51 = vsub.f32 -inf, %v1004_v20  ;;  %v1015_v52 = vsub.f32 -inf, %v1007_v21  ;;  %v1882_v20 = vld [vmem:[%s2370_s7 + $0x8] sm:$0xff]  }
 0x2e2   : > { %v1030_v24 = vmul.f32 1.442695, %v1026_v22  ;;  %v1032_v25 = vmul.f32 1.442695, %v1027_v23  ;;  %v1018_v53 = vmul.f32 1.442695, %v1014_v51 }
 0x2e3   : > { %v800_v33 = vpop.permute.xlu1 %799  ;;  %v1020_v54 = vmul.f32 1.442695, %v1015_v52 }
 0x2e4   : > { %1889 = vpow2.f32 %v1030_v24 }
 0x2e5   : > { %1891 = vpow2.f32 %v1032_v25 }
 0x2e7   : > { %v1010_v26 = vpop.xlane.xlu0 %1009 }
 0x2e8   : > { %v1028_v27 = vsub.f32 %v950_v10, %v1010_v26  ;;  %v1016_v55 = vsub.f32 -inf, %v1010_v26  ;;  %v1881_v10 = vld [vmem:[%s2370_s7] sm:$0xff]  }
 0x2ea   : > { %v1034_v28 = vmul.f32 1.442695, %v1028_v27  ;;  %v1022_v56 = vmul.f32 1.442695, %v1016_v55 }
 0x2eb   : > { %v1013_v29 = vpop.xlane.xlu0 %1012 }
 0x2ec   : > { %v1029_v30 = vsub.f32 %v996_v11, %v1013_v29  ;;  %1893 = vpow2.f32 %v1034_v28  ;;  %v1017_v57 = vsub.f32 -inf, %v1013_v29 }
 0x2ee   : > { %v1036_v32 = vmul.f32 1.442695, %v1029_v30  ;;  %v1890_v34 = vpop.eup %1889  ;;  %v1024_v59 = vmul.f32 1.442695, %v1017_v57 }
 0x2ef   : > { %v798_v35 = vpop.permute.xlu0 %797  ;;  %v1058_v36 = vpack.c.bf16 %v1890_v34, %v1890_v34  ;;  %v1892_v37 = vpop.eup %1891  ;;  %v1042_v44 = vsel %vm817_vm3, %v1890_v34, 0.0 }
 0x2f0   : > { %v806_v31 = vsel %vm752_vm2, %v798_v35, %v800_v33  ;;  %1895 = vpow2.f32 %v1036_v32  ;;  %v1045_v40 = vsel %vm817_vm3, %v1892_v37, 0.0  ;;  %v1059_v41 = vpack.c.bf16 %v1892_v37, %v1892_v37 }
 0x2f1   : > { %v1660_v38 = vcombine.low %v806_v31, %v806_v31  ;;  %v1661_v39 = vcombine.high %v806_v31, %v806_v31  ;;  %1779 = vmatmul.mubr.msk.bf16.vlgmr.msra.gmra.mrb[12].mxu1 %vm817_vm3, %v1058_v36  ;;  %1046 = vadd.xlane.f32.xlu1 %v1045_v40  ;;  %1897 = vpow2.f32 %v1018_v53  ;;  %v1670_v53 = vld [vmem:[%s2371_s8] ss:$0 sm:$0xff] }
 0x2f2   : > { %1790 = vmatprep.mubr.msk.bf16.mxu1 %vm1982_vm0, %v1981_v1  ;;  %1785 = vmatmul.mubr.msk.bf16.vlgmr.msra.gmra.mrb[16].mxu0 %vm817_vm3, %v1059_v41  ;;  %1899 = vpow2.f32 %v1020_v54 }
 0x2f3   : > { %v1158_v42 = vsel %vm752_vm2, %v1660_v38, 0  ;;  %v1204_v43 = vsel %vm752_vm2, %v1661_v39, 0  ;;  %1796 = vmatprep.mubr.msk.bf16.mxu0 %vm1982_vm0, %v1981_v1  ;;  %1901 = vpow2.f32 %v1022_v56 }
 0x2f4   : > { %1789 = vmatpush3.bf16.msra.mxu1 %v1158_v42  ;;  %1795 = vmatpush3.bf16.msra.mxu0 %v1204_v43  ;;  %1903 = vpow2.f32 %v1024_v59 }
 0x2f5   : > { %1800 = vmatprep.subr.bf16.mxu1 %v1981_v1  ;;  %1808 = vmatprep.subr.bf16.mxu0 %v1981_v1 }
 0x2f6   : > { %v1894_v45 = vpop.eup %1893  ;;  %1043 = vadd.xlane.f32.xlu1 %v1042_v44 }
 0x2f7   : > { %v1048_v46 = vsel %vm817_vm3, %v1894_v45, 0.0  ;;  %v1060_v47 = vpack.c.bf16 %v1894_v45, %v1894_v45 }
 0x2f8   : > { %1049 = vadd.xlane.f32.xlu0 %v1048_v46 }
 0x2f9   : > { %1791 = vmatmul.mubr.msk.bf16.vlgmr.msra.gmra.mrb[16].mxu1 %vm817_vm3, %v1060_v47 }
 0x2fa   : > { %v1896_v48 = vpop.eup %1895  ;;  %1804 = vmatprep.mubr.msk.bf16.mxu1 %vm1982_vm0, %v1981_v1  ;;  %1801 = vmatpush3.bf16.msra.mxu1 %v1881_v10 }
 0x2fb   : > { %v1051_v49 = vsel %vm817_vm3, %v1896_v48, 0.0  ;;  %v1061_v50 = vpack.c.bf16 %v1896_v48, %v1896_v48  ;;  %v1898_v60 = vpop.eup %1897  ;;  %1802 = vmatprep.subr.bf16.mxu1 %v1981_v1 }
 0x2fc   : > { %1052 = vadd.xlane.f32.xlu0 %v1051_v49  ;;  %v1900_v61 = vpop.eup %1899  ;;  %v1038_v63 = vmul.f32 0.0, %v1898_v60 }
 0x2fd   : > { %1797 = vmatmul.mubr.msk.bf16.vlgmr.msra.gmra.mrb[20].mxu0 %vm817_vm3, %v1061_v50  ;;  %v1039_v0 = vmul.f32 0.0, %v1900_v61  ;;  %v1902_v4 = vpop.eup %1901 }
 0x2fe   : > { %1812 = vmatprep.mubr.msk.bf16.mxu0 %vm1982_vm0, %v1981_v1  ;;  %v1040_v7 = vmul.f32 0.0, %v1902_v4  ;;  %v1904_v8 = vpop.eup %1903  ;;  %1803 = vmatpush3.bf16.msra.mxu1 %v1882_v20  ;;  %v1884_v4 = vld [vmem:[%s2372_s9 + $0x8] sm:$0xff]  }
 0x2ff   : > { %v1041_v12 = vmul.f32 0.0, %v1904_v8  ;;  %1816 = vmatprep.subr.bf16.mxu1 %v1981_v1 }
 0x37e   : > { %v1047_v58 = vpop.xlane.xlu1 %1046 }
 0x37f   : > { %v1055_v3 = vadd.f32 %v1047_v58, %v1039_v0 }
 0x383   : > { %v1044_v62 = vpop.xlane.xlu1 %1043 }
 0x384   : > { %v1054_v2 = vadd.f32 %v1044_v62, %v1038_v63 }
 0x385   : > { %v1050_v5 = vpop.xlane.xlu0 %1049 }
 0x386   : > { %1905 = vrcp.f32 %v1054_v2  ;;  %v1056_v9 = vadd.f32 %v1050_v5, %v1040_v7  ;;  %v1886_v5 = vld [vmem:[%s2374_s11 + $0x8] sm:$0xff]  }
 0x387   : > { %1907 = vrcp.f32 %v1055_v3  ;;  %v1883_v3 = vld [vmem:[%s2372_s9] sm:$0xff]  }
 0x388   : > { %1909 = vrcp.f32 %v1056_v9  ;;  %1809 = vmatpush3.bf16.msra.mxu0 %v1883_v3 }
 0x389   : > { %v1053_v11 = vpop.xlane.xlu0 %1052  ;;  %1810 = vmatprep.subr.bf16.mxu0 %v1981_v1 }
 0x38a   : > { %v1057_v13 = vadd.f32 %v1053_v11, %v1041_v12  ;;  %v1674_v11 = vld [vmem:[%s2376_s13] ss:$0 sm:$0xff] }
 0x38c   : > { %1911 = vrcp.f32 %v1057_v13  ;;  %1811 = vmatpush3.bf16.msra.mxu0 %v1884_v4  ;;  %v1675_v13 = vld [vmem:[%s2377_s14] ss:$0 sm:$0xff] }
 0x390   : > { %v1906_v17 = vpop.eup %1905 }
 0x391   : > { %v1908_v25 = vpop.eup %1907 }
 0x392   : > { %v1910_v33 = vpop.eup %1909 }
 0x396   : > { %v1912_v41 = vpop.eup %1911 }
 0x3c4   : > { %v1102_v14 = vpop.f32.mrb[12].mxu1 }
 0x3c5   : > { %v1246_v15 = vadd.f32 %v1102_v14, %v1038_v63  ;;  %v1780_v16 = vpop.f32.mrb[13].mxu1  ;;  %v1148_v18 = vpop.f32.mrb[16].mxu0 }
 0x3c6   : > { %v1105_v19 = vpop.f32.mrb[14].mxu1  ;;  %v1247_v22 = vadd.f32 %v1148_v18, %v1039_v0  ;;  %v1786_v23 = vpop.f32.mrb[17].mxu0  ;;  %v1888_v18 = vld [vmem:[%s2374_s11 + $0x18] sm:$0xff]  }
 0x3c7   : > { %v1254_v21 = vmul.f32 %v1906_v17, %v1246_v15  ;;  %v1781_v24 = vpop.f32.mrb[15].mxu1  ;;  %v1151_v26 = vpop.f32.mrb[18].mxu0  ;;  %v1887_v17 = vld [vmem:[%s2374_s11 + $0x10] sm:$0xff]   ;;  %v1676_v19 = vld [vmem:[%s2373_s10] ss:$0 sm:$0xff] }
 0x3c8   : > { %v1255_v27 = vmul.f32 %v1908_v25, %v1247_v22  ;;  %v1787_v28 = vpop.f32.mrb[19].mxu0 }
 0x3c9   : > { %v1258_v48 = vpack.c.bf16 %v1254_v21, %v1254_v21 }
 0x3ca   : > { %v1259_v29 = vpack.c.bf16 %v1255_v27, %v1255_v27 }
 0x3cc   : > { %v1194_v30 = vpop.f32.mrb[16].mxu1  ;;  %1263 = vrot.lane.b32.xlu0 %v1259_v29, %s1986_s20 }
 0x3cd   : > { %v1248_v32 = vadd.f32 %v1194_v30, %v1040_v7  ;;  %v1792_v34 = vpop.f32.mrb[17].mxu1 }
 0x3ce   : > { %v1197_v35 = vpop.f32.mrb[18].mxu1 }
 0x3cf   : > { %v1256_v31 = vmul.f32 %v1910_v33, %v1248_v32  ;;  %v1793_v36 = vpop.f32.mrb[19].mxu1 }
 0x3d0   : > { %v1240_v37 = vpop.f32.mrb[20].mxu0 }
 0x3d1   : > { %v1260_v38 = vpack.c.bf16 %v1256_v31, %v1256_v31  ;;  %v1249_v39 = vadd.f32 %v1240_v37, %v1041_v12  ;;  %v1798_v40 = vpop.f32.mrb[21].mxu0 }
 0x3d2   : > { %v1243_v42 = vpop.f32.mrb[22].mxu0 }
 0x3d3   : > { %v1257_v43 = vmul.f32 %v1912_v41, %v1249_v39  ;;  %1266 = vrot.lane.b32.xlu1 %v1260_v38, %s1987_s23  ;;  %v1799_v44 = vpop.f32.mrb[23].mxu0  ;;  %s1689_s23 = sshll.u32 %s2101_s28, 7  ;;  %s1989_s28 = smov [#allocation2]  }
 0x3d4   : > { %s2320_s4 = scalar_lea.hbm %s2380_s17, %s1689_s23 }
 0x3d5   : > { %v1261_v45 = vpack.c.bf16 %v1257_v43, %v1257_v43  ;;  %v1686_v43 = vld [vmem:[%s2378_s15] ss:$0 sm:$0xff] }
 0x3d7   : > { %1269 = vrot.lane.b32.xlu1 %v1261_v45, %s1988_s19  ;;  %v1687_v45 = vld [vmem:[%s2379_s16] ss:$0 sm:$0xff]  ;;  %s539_s19 = scalar_lea.vmem [#allocation2], %s1636_s22  ;;  %s1921_s22 = sshll.u32 %s1989_s28, 4  ;;  %s1922_s22 = int_to_ptr.vmem [resolvable:$false] %s1921_s22 }
 0x3d8   : > { %s1573_s29 = sshll.u32 %s539_s19, 4  ;;  %s1923_s0 = scalar_lea.vmem %s1922_s22, 256  ;;  %s2322_s29 = int_to_ptr.vmem [resolvable:$true] %s1573_s29 }
 0x3d9   : > { %s1917_s26 = scalar_lea.vmem %s2322_s29, 128  ;;  %p1924_p0 = scmp.lt.s32.totalorder %s2322_s29, %s1922_s22 }
 0x3da   : > { %p1918_p11 = scmp.ne.s32.totalorder %s2322_s29, %s1917_s26  ;;  %p1925_p1 = scmp.lt.s32.totalorder %s1923_s0, %s1917_s26 }
 0x3dc   : > { %p1919_p12 = pnand %p1918_p11, %p2118_p5  ;;  %p1926_p2 = por %p1925_p1, %p1924_p0 }
 0x3de   : > { %p1920_p13 = pneg %p1919_p12 }
 0x3e0   : > { %p1927_p3 = pnand %p1926_p2, %p1920_p13 }
 0x43e   : > { %v1264_v46 = vpop.permute.xlu0 %1263 }
 0x43f   : > { %v1273_v49 = vsel %vm817_vm3, %v1258_v48, %v1264_v46 }
 0x445   : > { %v1267_v47 = vpop.permute.xlu1 %1266 }
 0x446   : > { %v1276_v50 = vsel %vm1274_vm4, %v1273_v49, %v1267_v47 }
 0x449   : > { %v1270_v51 = vpop.permute.xlu1 %1269 }
 0x44a   : > { %v1279_v52 = vsel %vm1277_vm5, %v1276_v50, %v1270_v51 }
 0x44b   : > { %1805 = vmatmul.mubr.msk.bf16.vlgmr.msra.gmra.mrb[20].mxu1 %vm570_vm1, %v1279_v52 }
 0x44c   : > { %1824 = vmatprep.mubr.msk.bf16.mxu1 %vm1982_vm0, %v1981_v1 }
 0x51e   : > { %v1339_v54 = vpop.f32.mrb[20].mxu1 }
 0x51f   : > { %v1340_v55 = vadd.f32 %v1670_v53, %v1339_v54  ;;  %v1806_v56 = vpop.f32.mrb[21].mxu1 }
 0x520   : > { %v1342_v57 = vpop.f32.mrb[22].mxu1 }
 0x521   : > { %v1807_v58 = vpop.f32.mrb[23].mxu1  ;;  %v1345_v59 = vadd.f32 %v1340_v55, %v2157_v6  ;;  %v1885_v6 = vld [vmem:[%s2374_s11] sm:$0xff]  }
 0x522   : > { %1817 = vmatpush3.bf16.msra.mxu1 %v1885_v6 }
 0x523   : > { %v1346_v60 = vsel %vm570_vm1, %v1345_v59, 0.0  ;;  %1818 = vmatprep.subr.bf16.mxu1 %v1981_v1 }
 0x524   : > { %1347 = vadd.xlane.f32.xlu0 %v1346_v60 }
 0x526   : > { %1819 = vmatpush3.bf16.msra.mxu1 %v1886_v5 }
 0x527   : > { %1820 = vmatprep.subr.bf16.mxu1 %v1981_v1 }
 0x52a   : > { %1821 = vmatpush3.bf16.msra.mxu1 %v1887_v17 }
 0x52b   : > { %1822 = vmatprep.subr.bf16.mxu1 %v1981_v1  ;;  %v1680_v1 = vld [vmem:[%s2375_s12] ss:$0 sm:$0xff] }
 0x52e   : > { %1823 = vmatpush3.bf16.msra.mxu1 %v1888_v18 }
 0x5b1   : > { %v1348_v61 = vpop.xlane.xlu0 %1347 }
 0x5b2   : > { %v1350_v62 = vmul.f32 0.03125, %v1348_v61 }
 0x5b4   : > { %v1351_v63 = vsub.f32 %v1345_v59, %v1350_v62 }
 0x5b6   : > { %v1352_v0 = vmul.f32 %v1351_v63, %v1351_v63 }
 0x5b8   : > { %v1353_v2 = vsel %vm570_vm1, %v1352_v0, 0.0 }
 0x5b9   : > { %1354 = vadd.xlane.f32.xlu1 %v1353_v2 }
 0x646   : > { %v1355_v7 = vpop.xlane.xlu1 %1354 }
 0x647   : > { %v1356_v8 = vmul.f32 0.03125, %v1355_v7 }
 0x649   : > { %v1357_v9 = vadd.f32 1e-05, %v1356_v8 }
 0x64b   : > { %1913 = vrsqrt.f32 %v1357_v9 }
 0x655   : > { %v1914_v10 = vpop.eup %1913 }
 0x656   : > { %v1359_v12 = vmul.f32 %v1914_v10, %v1351_v63 }
 0x658   : > { %v1367_v14 = vmul.f32 %v1674_v11, %v1359_v12 }
 0x65a   : > { %v1375_v15 = vadd.f32 %v1675_v13, %v1367_v14 }
 0x65c   : > { %v1376_v16 = vpack.c.bf16 %v1375_v15, %v1375_v15 }
 0x65e   : > { %1813 = vmatmul.mubr.msk.bf16.vlgmr.msra.gmra.mrb[24].mxu0 %vm570_vm1, %v1376_v16 }
 0x731   : > { %v1437_v20 = vpop.f32.mrb[24].mxu0 }
 0x732   : > { %v1438_v21 = vadd.f32 %v1676_v19, %v1437_v20  ;;  %v1814_v22 = vpop.f32.mrb[25].mxu0 }
 0x733   : > { %v1440_v23 = vpop.f32.mrb[26].mxu0 }
 0x734   : > { %v1443_v24 = vmax.f32 %v1438_v21, 0.0  ;;  %v1815_v25 = vpop.f32.mrb[27].mxu0 }
 0x736   : > { %v1444_v26 = vpack.c.bf16 %v1443_v24, %v1443_v24 }
 0x738   : > { %1825 = vmatmul.mubr.msk.bf16.vlgmr.msra.gmra.mrb[24].mxu1 %vm1484_vm6, %v1444_v26 }
 0x80b   : > { %v1522_v27 = vpop.f32.mrb[24].mxu1 }
 0x80c   : > { %v1523_v28 = vadd.f32 %v1680_v1, %v1522_v27  ;;  %v1826_v29 = vpop.f32.mrb[25].mxu1 }
 0x80d   : > { %v1525_v30 = vpop.f32.mrb[26].mxu1 }
 0x80e   : > { %v1827_v32 = vpop.f32.mrb[27].mxu1  ;;  %v1528_v34 = vadd.f32 %v1523_v28, %v1375_v15 }
 0x810   : > { %v1529_v33 = vsel %vm570_vm1, %v1528_v34, 0.0 }
 0x811   : > { %1530 = vadd.xlane.f32.xlu0 %v1529_v33 }
 0x89e   : > { %v1531_v35 = vpop.xlane.xlu0 %1530 }
 0x89f   : > { %v1532_v31 = vmul.f32 0.03125, %v1531_v35 }
 0x8a1   : > { %v1533_v36 = vsub.f32 %v1528_v34, %v1532_v31 }
 0x8a3   : > { %v1534_v37 = vmul.f32 %v1533_v36, %v1533_v36 }
 0x8a5   : > { %v1535_v38 = vsel %vm570_vm1, %v1534_v37, 0.0 }
 0x8a6   : > { %1536 = vadd.xlane.f32.xlu0 %v1535_v38 }
 0x933   : > { %v1537_v39 = vpop.xlane.xlu0 %1536 }
 0x934   : > { %v1538_v40 = vmul.f32 0.03125, %v1537_v39 }
 0x936   : > { %v1539_v41 = vadd.f32 1e-05, %v1538_v40 }
 0x938   : > { %1915 = vrsqrt.f32 %v1539_v41 }
 0x942   : > { %v1916_v42 = vpop.eup %1915 }
 0x943   : > { %v1541_v44 = vmul.f32 %v1916_v42, %v1533_v36 }
 0x945   : > { %v1549_v46 = vmul.f32 %v1686_v43, %v1541_v44 }
 0x947   : > { %v1557_v47 = vadd.f32 %v1687_v45, %v1549_v46 }
 0x949   : > { %1558 = vst.msk [vmem:[%s539_s19] sm:$0xff] %vm570_vm1, %v1557_v47 }
 0x94a   : > { %1930 = shalt.err (!%p1927_p3)
}
 0x94b   : > { %s1931_s2 = scalar_lea.hbm %s2320_s4, 128  ;;  %s1935_s23 = scalar_lea.hbm %s2380_s17, 256 }
 0x94c   : > { %p1932_p4 = scmp.ne.s32.totalorder %s2320_s4, %s1931_s2  ;;  %p1936_p9 = scmp.lt.u32.totalorder %s2320_s4, %s2380_s17 }
 0x94d   : > { %p1937_p10 = scmp.lt.u32.totalorder %s1935_s23, %s1931_s2  ;;  %p1939_p12 = scmp.lt.u32.totalorder %s1931_s2, %s2320_s4 }
 0x94e   : > { %p1933_p7 = pnand %p1932_p4, %p2118_p5 }
 0x94f   : > { %p1938_p11 = por %p1937_p10, %p1936_p9 }
 0x950   : > { %p1934_p8 = pneg %p1933_p7 }
 0x951   : > { %p1940_p13 = por %p1939_p12, %p1938_p11 }
 0x953   : > { %p1941_p0 = pnand %p1940_p13, %p1934_p8 }
 0x955   : > { %1944 = shalt.err (!%p1941_p0)
}
 0x956   : > { %1828 = dma.vmem_to_hbm [thread:$0]  (%p2118_p5), %s2322_s29, 128, %s2320_s4, %s1560_s3  }
 0x957 PF: > { %p1834_p1 = scmp.ge.s32.totalorder %s1979_s27, 2  ;;  %s1585_s28 = sand.u32 1, %s1967_s24  }
 0x958   : > { %s1586_s22 = scalar_lea.sflag [#allocation3], %s1585_s28 }
 0x959   : > { %p1831_p2 = pnand %p1834_p1, %p2122_p6 }
 0x95b   : > { %1962 = dma.done.wait (!%p1831_p2), %s1586_s22, 128  }
 0x95c   : > { %1964 = vsyncadd (!%p1831_p2), %s1586_s22, 4294967168  ;;  %s2403_s27 = sld [smem:[#allocation6_spill]]  ;;  %s2404_s0 = sld [smem:[#allocation5_spill]] }
 0x95d   : > { %s2405_s26 = sld [smem:[#allocation7_spill]]  ;;  %s2406_s24 = smov %s1971_s25 }
 0x962   : > { %p27_p3 = scmp.ge.s32.totalorder %s2403_s27, 4   ;;  %s2407_s25 = smov %s2404_s0 }
 0x964   :  { %29 = sbr.rel (!%p27_p3) target bundleno = 9 (0x9), region = 123 }
 0x96b   :  { %1591 = vsyncpa [#allocation3], 1 }
 0x96c   :  { %1593 = vsyncpa [#allocation3 + $0x1], 1 }

</bundles_post_ra>
